<compile_context>
chip_gen: v6e
topology: v6e:2x2x1
jax: 0.10.0
libtpu: 0.0.40
codegen_flags: <defaults>
</compile_context>

<pallas_src>
import functools

import jax
import jax.numpy as jnp
from jax.experimental import pallas as pl
from jax.experimental.pallas import tpu as pltpu


def _nbytes(a):
    return a.size * a.dtype.itemsize


# ----------------------------------------------------------------------------
# Kernel A: conv1 lowered to im2col matmul + bias + ReLU (bf16 MXU, f32 acc).
# ----------------------------------------------------------------------------
def _conv1_kernel(p_ref, w_ref, b_ref, o_ref):
    acc = jnp.dot(p_ref[...], w_ref[...], preferred_element_type=jnp.float32)
    acc = jnp.maximum(acc + b_ref[...], 0.0)          # bias + ReLU in f32
    o_ref[...] = acc.astype(o_ref.dtype)


def _conv1_matmul(p1, w1, b1, *, rows_per_block):
    M, K = p1.shape
    _, N = w1.shape
    grid_m = M // rows_per_block
    cost = pl.CostEstimate(
        flops=2 * M * K * N,
        transcendentals=0,
        bytes_accessed=_nbytes(p1) + _nbytes(w1) + _nbytes(b1) + M * N * 2,
    )
    return pl.pallas_call(
        _conv1_kernel,
        out_shape=jax.ShapeDtypeStruct((M, N), jnp.bfloat16),
        grid=(grid_m,),
        in_specs=[
            pl.BlockSpec((rows_per_block, K), lambda i: (i, 0)),
            pl.BlockSpec((K, N), lambda i: (0, 0)),
            pl.BlockSpec((1, N), lambda i: (0, 0)),
        ],
        out_specs=pl.BlockSpec((rows_per_block, N), lambda i: (i, 0)),
        compiler_params=pltpu.CompilerParams(dimension_semantics=("parallel",)),
        cost_estimate=cost,
    )(p1, w1, b1)


# ----------------------------------------------------------------------------
# Kernel B: conv2 + Flatten + fc1 + ReLU + fc2 (+ optional action mask), fused.
# One grid step per batch element ("parallel" so v7x's two TCs split batch).
# ----------------------------------------------------------------------------
def _head_kernel(p2t_ref, w2_ref, b2_ref, w3_ref, b3_ref, w4_ref, b4_ref,
                 *rest, c2out):
    if len(rest) == 2:
        a_ref, o_ref = rest
    else:
        a_ref = None
        (o_ref,) = rest

    # conv2, transposed: (Cout2, K2) @ (K2, S) -> (Cout2, S), f32 accumulate.
    y2 = jnp.dot(w2_ref[...], p2t_ref[0], preferred_element_type=jnp.float32)
    y2 = jnp.maximum(y2 + b2_ref[...], 0.0).astype(jnp.bfloat16)

    # fc1 with PyTorch's NCHW flatten baked into w3 (Cout2, S, 256):
    #   h = b3 + sum_c y2[c, :] @ w3[c]   -- no in-kernel reshape needed.
    acc = b3_ref[...]                                  # (1, 256) f32
    for c in range(c2out):
        acc = acc + jnp.dot(y2[c:c + 1, :], w3_ref[c],
                            preferred_element_type=jnp.float32)
    h = jnp.maximum(acc, 0.0).astype(jnp.bfloat16)     # (1, 256)

    # fc2 (+ optional "* actions"), bias added in the f32 accumulator.
    q = jnp.dot(h, w4_ref[...], preferred_element_type=jnp.float32) + b4_ref[...]
    if a_ref is not None:
        q = q * a_ref[0]
    o_ref[0] = q.astype(o_ref.dtype)


def _head_call(p2t, w2, b2, w3, b3, w4, b4, actions):
    B, K2, S = p2t.shape          # (B, 256, 88)
    C2 = w2.shape[0]              # 32
    N1 = w3.shape[2]              # 256
    NA = w4.shape[1]              # actions_count

    flops = B * (2 * C2 * K2 * S + 2 * (C2 * S) * N1 + 2 * N1 * NA)
    nbytes = sum(_nbytes(a) for a in (p2t, w2, b2, w3, b3, w4, b4)) + B * NA * 4

    in_specs = [
        pl.BlockSpec((1, K2, S), lambda b: (b, 0, 0)),
        pl.BlockSpec((C2, K2), lambda b: (0, 0)),
        pl.BlockSpec((C2, 1), lambda b: (0, 0)),
        pl.BlockSpec((C2, S, N1), lambda b: (0, 0, 0)),
        pl.BlockSpec((1, N1), lambda b: (0, 0)),
        pl.BlockSpec((N1, NA), lambda b: (0, 0)),
        pl.BlockSpec((1, NA), lambda b: (0, 0)),
    ]
    args = [p2t, w2, b2, w3, b3, w4, b4]
    if actions is not None:
        a3 = actions.astype(jnp.float32).reshape(B, 1, NA)
        in_specs.append(pl.BlockSpec((1, 1, NA), lambda b: (b, 0, 0)))
        args.append(a3)
        nbytes += _nbytes(a3)

    out = pl.pallas_call(
        functools.partial(_head_kernel, c2out=C2),
        out_shape=jax.ShapeDtypeStruct((B, 1, NA), jnp.float32),
        grid=(B,),
        in_specs=in_specs,
        out_specs=pl.BlockSpec((1, 1, NA), lambda b: (b, 0, 0)),
        compiler_params=pltpu.CompilerParams(dimension_semantics=("parallel",)),
        cost_estimate=pl.CostEstimate(flops=flops, transcendentals=0,
                                      bytes_accessed=nbytes),
    )(*args)
    return out.reshape(B, NA)


# ----------------------------------------------------------------------------
# im2col glue (plain-JAX strided slicing; pure layout plumbing).
# Patch feature ordering is (kh, kw, Cin); prepared weights match it.
# ----------------------------------------------------------------------------
def _im2col_nhwc(x, kh, kw, sh, sw):
    B, H, W, C = x.shape
    Ho = (H - kh) // sh + 1
    Wo = (W - kw) // sw + 1
    cols = []
    for i in range(kh):
        for j in range(kw):
            cols.append(x[:, i:i + sh * (Ho - 1) + 1:sh,
                          j:j + sw * (Wo - 1) + 1:sw, :])
    p = jnp.stack(cols, axis=3)                      # (B, Ho, Wo, kh*kw, C)
    return p.reshape(B, Ho, Wo, kh * kw * C), Ho, Wo


def _im2col_t(x, kh, kw, sh, sw):
    """Transposed patches: (B, kh*kw*C, Ho*Wo), feature order (kh, kw, C)."""
    B, H, W, C = x.shape
    Ho = (H - kh) // sh + 1
    Wo = (W - kw) // sw + 1
    cols = []
    for i in range(kh):
        for j in range(kw):
            cols.append(x[:, i:i + sh * (Ho - 1) + 1:sh,
                          j:j + sw * (Wo - 1) + 1:sw, :])
    p = jnp.stack(cols, axis=1)                      # (B, kh*kw, Ho, Wo, C)
    p = jnp.transpose(p, (0, 1, 4, 2, 3))            # (B, kh*kw, C, Ho, Wo)
    return p.reshape(B, kh * kw * C, Ho * Wo), Ho, Wo


# ----------------------------------------------------------------------------
# Parameters: PyTorch-style init, plus one-time layout/dtype preparation.
# ----------------------------------------------------------------------------
def init_params(key, stacked_frames=4, actions_count=4):
    ks = jax.random.split(key, 8)

    def u(k, shape, fan_in):
        bound = 1.0 / (fan_in ** 0.5)
        return jax.random.uniform(k, shape, jnp.float32, -bound, bound)

    return {
        "conv1_w": u(ks[0], (16, stacked_frames, 8, 8), stacked_frames * 64),
        "conv1_b": u(ks[1], (16,), stacked_frames * 64),
        "conv2_w": u(ks[2], (32, 16, 4, 4), 16 * 16),
        "conv2_b": u(ks[3], (32,), 16 * 16),
        "fc1_w":   u(ks[4], (256, 2816), 2816),
        "fc1_b":   u(ks[5], (256,), 2816),
        "fc2_w":   u(ks[6], (actions_count, 256), 256),
        "fc2_b":   u(ks[7], (actions_count,), 256),
    }


def prepare_params(params):
    """One-time weight layout + bf16 prep (hoisted out of the traced forward)."""
    c1w, c2w = params["conv1_w"], params["conv2_w"]
    fc1_w, fc2_w = params["fc1_w"], params["fc2_w"]
    co2 = c2w.shape[0]                       # 32
    n1 = fc1_w.shape[0]                      # 256
    spatial2 = fc1_w.shape[1] // co2         # 88 = 8 * 11
    return {
        # conv1: (Cout,Cin,kh,kw) -> (kh*kw*Cin, Cout)
        "w1": jnp.transpose(c1w, (2, 3, 1, 0)).reshape(-1, c1w.shape[0]).astype(jnp.bfloat16),
        "b1": params["conv1_b"].reshape(1, -1).astype(jnp.float32),
        # conv2 (used transposed): (Cout,Cin,kh,kw) -> (Cout, kh*kw*Cin)
        "w2": jnp.transpose(c2w, (0, 2, 3, 1)).reshape(co2, -1).astype(jnp.bfloat16),
        "b2": params["conv2_b"].reshape(-1, 1).astype(jnp.float32),
        # fc1 with NCHW-flatten baked in: (256,2816) -> (Cout2, Ho*Wo, 256)
        "w3": fc1_w.T.reshape(co2, spatial2, n1).astype(jnp.bfloat16),
        "b3": params["fc1_b"].reshape(1, -1).astype(jnp.float32),
        "w4": fc2_w.T.astype(jnp.bfloat16),
        "b4": params["fc2_b"].reshape(1, -1).astype(jnp.float32),
    }


# ----------------------------------------------------------------------------
# Forward pass matching DeepQNet.forward semantics.
# ----------------------------------------------------------------------------
@jax.jit
def deep_q_net_forward(prep, frames, actions=None):
    # frames: NCHW (B, 4, H, W) float32 -> NHWC bf16 internally.
    x = jnp.transpose(frames, (0, 2, 3, 1)).astype(jnp.bfloat16)
    B = x.shape[0]

    # Conv2d(4,16,k=8,s=4) + ReLU: im2col glue + Pallas MXU kernel.
    p1, H1, W1 = _im2col_nhwc(x, 8, 8, 4, 4)
    rows = H1 * W1
    p1 = p1.reshape(B * rows, -1)
    rpb = rows if rows % 8 == 0 else B * rows
    y1 = _conv1_matmul(p1, prep["w1"], prep["b1"], rows_per_block=rpb)
    y1 = y1.reshape(B, H1, W1, -1)

    # Conv2d(16,32,k=4,s=2)+ReLU + Flatten + Linear(2816,256)+ReLU +
    # Linear(256,A) [+ "* actions"]: one fused Pallas kernel.
    p2t, _, _ = _im2col_t(y1, 4, 4, 2, 2)
    return _head_call(p2t, prep["w2"], prep["b2"], prep["w3"], prep["b3"],
                      prep["w4"], prep["b4"], actions)


if __name__ == "__main__":
    key = jax.random.PRNGKey(0)
    k_param, k_frames, k_actions = jax.random.split(key, 3)

    params = init_params(k_param)
    prep = prepare_params(params)            # one-time, outside the forward

    # Input shape implied by Linear(2816, 256): (B, 4, 76, 100).
    frames = jax.random.normal(k_frames, (2, 4, 76, 100), dtype=jnp.float32)
    act_idx = jax.random.randint(k_actions, (2,), 0, 4)
    actions = jax.nn.one_hot(act_idx, 4, dtype=jnp.float32)

    q_vals = deep_q_net_forward(prep, frames)             # raw Q-values
    q_masked = deep_q_net_forward(prep, frames, actions)  # Q-values * actions

    jax.block_until_ready((q_vals, q_masked))
    assert q_vals.shape == (2, 4) and q_masked.shape == (2, 4)
    print("KERNEL_OK")
</pallas_src>

<mosaic_0001>
module attributes {stable_mosaic.version = 11 : i64} {
  func.func @_conv1_kernel(%arg0: i32, %arg1: memref<432x256xbf16, #tpu.memory_space<vmem>>, %arg2: memref<256x16xbf16, #tpu.memory_space<vmem>>, %arg3: memref<1x16xf32, #tpu.memory_space<vmem>>, %arg4: memref<432x16xbf16, #tpu.memory_space<vmem>>) attributes {dimension_semantics = [#tpu.dimension_semantics<parallel>], iteration_bounds = array<i64: 2>, scalar_prefetch = 0 : i64, scratch_operands = 0 : i64, tpu.core_type = #tpu.core_type<tc>, window_params = [{transform_indices = @transform_0, window_bounds = array<i64: 432, 256>}, {pipeline_mode = #tpu.pipeline_mode<synchronous>, transform_indices = @transform_1, window_bounds = array<i64: 256, 16>}, {pipeline_mode = #tpu.pipeline_mode<synchronous>, transform_indices = @transform_2, window_bounds = array<i64: 1, 16>}, {transform_indices = @transform_3, window_bounds = array<i64: 432, 16>}]} {
    %c0 = arith.constant 0 : index
    %c0_0 = arith.constant 0 : index
    %0 = vector.load %arg1[%c0, %c0_0] : memref<432x256xbf16, #tpu.memory_space<vmem>>, vector<432x256xbf16>
    %c0_1 = arith.constant 0 : index
    %c0_2 = arith.constant 0 : index
    %1 = vector.load %arg2[%c0_1, %c0_2] : memref<256x16xbf16, #tpu.memory_space<vmem>>, vector<256x16xbf16>
    %cst = arith.constant dense<0.000000e+00> : vector<432x16xf32>
    %2 = tpu.matmul %0, %1, %cst {dimension_numbers = #tpu.dot_dimension_numbers<[1], [0], [0], [1], [0, 0, 1, 1], [], []>} : vector<432x256xbf16>, vector<256x16xbf16>, vector<432x16xf32> -> vector<432x16xf32>
    %c0_3 = arith.constant 0 : index
    %c0_4 = arith.constant 0 : index
    %3 = vector.load %arg3[%c0_3, %c0_4] : memref<1x16xf32, #tpu.memory_space<vmem>>, vector<1x16xf32>
    %4 = vector.broadcast %3 : vector<1x16xf32> to vector<432x16xf32>
    %5 = arith.addf %2, %4 : vector<432x16xf32>
    %cst_5 = arith.constant 0.000000e+00 : f32
    %6 = vector.broadcast %cst_5 : f32 to vector<432x16xf32>
    %7 = arith.maximumf %5, %6 : vector<432x16xf32>
    %8 = arith.truncf %7 : vector<432x16xf32> to vector<432x16xbf16>
    %c0_6 = arith.constant 0 : index
    %c0_7 = arith.constant 0 : index
    %9 = vector.load %arg4[%c0_6, %c0_7] : memref<432x16xbf16, #tpu.memory_space<vmem>>, vector<432x16xbf16>
    tpu.vector_store %arg4[%c0_6, %c0_7], %8 {strides = array<i32>} : memref<432x16xbf16, #tpu.memory_space<vmem>>, vector<432x16xbf16>,
    return
  }
  func.func @transform_0(%arg0: i32) -> (i32, i32) {
    %c0_i32 = arith.constant 0 : i32
    %c0_i32_0 = arith.constant 0 : i32
    return %arg0, %c0_i32 : i32, i32
  }
  func.func @transform_1(%arg0: i32) -> (i32, i32) {
    %c0_i32 = arith.constant 0 : i32
    %c0_i32_0 = arith.constant 0 : i32
    %c0_i32_1 = arith.constant 0 : i32
    return %c0_i32, %c0_i32_0 : i32, i32
  }
  func.func @transform_2(%arg0: i32) -> (i32, i32) {
    %c0_i32 = arith.constant 0 : i32
    %c0_i32_0 = arith.constant 0 : i32
    %c0_i32_1 = arith.constant 0 : i32
    return %c0_i32, %c0_i32_0 : i32, i32
  }
  func.func @transform_3(%arg0: i32) -> (i32, i32) {
    %c0_i32 = arith.constant 0 : i32
    %c0_i32_0 = arith.constant 0 : i32
    return %arg0, %c0_i32 : i32, i32
  }
}

module attributes {stable_mosaic.version = 11 : i64} {
  func.func @_head_kernel(%arg0: i32, %arg1: memref<1x256x88xbf16, #tpu.memory_space<vmem>>, %arg2: memref<32x256xbf16, #tpu.memory_space<vmem>>, %arg3: memref<32x1xf32, #tpu.memory_space<vmem>>, %arg4: memref<32x88x256xbf16, #tpu.memory_space<vmem>>, %arg5: memref<1x256xf32, #tpu.memory_space<vmem>>, %arg6: memref<256x4xbf16, #tpu.memory_space<vmem>>, %arg7: memref<1x4xf32, #tpu.memory_space<vmem>>, %arg8: memref<1x1x4xf32, #tpu.memory_space<vmem>>) attributes {dimension_semantics = [#tpu.dimension_semantics<parallel>], iteration_bounds = array<i64: 2>, scalar_prefetch = 0 : i64, scratch_operands = 0 : i64, tpu.core_type = #tpu.core_type<tc>, window_params = [{transform_indices = @transform_0, window_bounds = array<i64: 1, 256, 88>}, {pipeline_mode = #tpu.pipeline_mode<synchronous>, transform_indices = @transform_1, window_bounds = array<i64: 32, 256>}, {pipeline_mode = #tpu.pipeline_mode<synchronous>, transform_indices = @transform_2, window_bounds = array<i64: 32, 1>}, {pipeline_mode = #tpu.pipeline_mode<synchronous>, transform_indices = @transform_3, window_bounds = array<i64: 32, 88, 256>}, {pipeline_mode = #tpu.pipeline_mode<synchronous>, transform_indices = @transform_4, window_bounds = array<i64: 1, 256>}, {pipeline_mode = #tpu.pipeline_mode<synchronous>, transform_indices = @transform_5, window_bounds = array<i64: 256, 4>}, {pipeline_mode = #tpu.pipeline_mode<synchronous>, transform_indices = @transform_6, window_bounds = array<i64: 1, 4>}, {transform_indices = @transform_7, window_bounds = array<i64: 1, 1, 4>}]} {
    %c0 = arith.constant 0 : index
    %c0_0 = arith.constant 0 : index
    %0 = vector.load %arg2[%c0, %c0_0] : memref<32x256xbf16, #tpu.memory_space<vmem>>, vector<32x256xbf16>
    %c0_1 = arith.constant 0 : index
    %c0_2 = arith.constant 0 : index
    %c0_3 = arith.constant 0 : index
    %1 = vector.load %arg1[%c0_1, %c0_2, %c0_3] : memref<1x256x88xbf16, #tpu.memory_space<vmem>>, vector<1x256x88xbf16>
    %2 = vector.shape_cast %1 : vector<1x256x88xbf16> to vector<256x88xbf16>
    %cst = arith.constant dense<0.000000e+00> : vector<32x88xf32>
    %3 = tpu.matmul %0, %2, %cst {dimension_numbers = #tpu.dot_dimension_numbers<[1], [0], [0], [1], [0, 0, 1, 1], [], []>} : vector<32x256xbf16>, vector<256x88xbf16>, vector<32x88xf32> -> vector<32x88xf32>
    %c0_4 = arith.constant 0 : index
    %c0_5 = arith.constant 0 : index
    %4 = vector.load %arg3[%c0_4, %c0_5] : memref<32x1xf32, #tpu.memory_space<vmem>>, vector<32x1xf32>
    %5 = vector.broadcast %4 : vector<32x1xf32> to vector<32x88xf32>
    %6 = arith.addf %3, %5 : vector<32x88xf32>
    %cst_6 = arith.constant 0.000000e+00 : f32
    %7 = vector.broadcast %cst_6 : f32 to vector<32x88xf32>
    %8 = arith.maximumf %6, %7 : vector<32x88xf32>
    %9 = arith.truncf %8 : vector<32x88xf32> to vector<32x88xbf16>
    %c0_7 = arith.constant 0 : index
    %c0_8 = arith.constant 0 : index
    %10 = vector.load %arg5[%c0_7, %c0_8] : memref<1x256xf32, #tpu.memory_space<vmem>>, vector<1x256xf32>
    %11 = vector.extract_strided_slice %9 {offsets = [0, 0], sizes = [1, 88], strides = [1, 1]} : vector<32x88xbf16> to vector<1x88xbf16>
    %c0_9 = arith.constant 0 : index
    %c0_10 = arith.constant 0 : index
    %c0_11 = arith.constant 0 : index
    %12 = vector.load %arg4[%c0_9, %c0_10, %c0_11] : memref<32x88x256xbf16, #tpu.memory_space<vmem>>, vector<1x88x256xbf16>
    %13 = vector.shape_cast %12 : vector<1x88x256xbf16> to vector<88x256xbf16>
    %cst_12 = arith.constant dense<0.000000e+00> : vector<1x256xf32>
    %14 = tpu.matmul %11, %13, %cst_12 {dimension_numbers = #tpu.dot_dimension_numbers<[1], [0], [0], [1], [0, 0, 1, 1], [], []>} : vector<1x88xbf16>, vector<88x256xbf16>, vector<1x256xf32> -> vector<1x256xf32>
    %15 = arith.addf %10, %14 : vector<1x256xf32>
    %16 = vector.extract_strided_slice %9 {offsets = [1, 0], sizes = [1, 88], strides = [1, 1]} : vector<32x88xbf16> to vector<1x88xbf16>
    %c1 = arith.constant 1 : index
    %c0_13 = arith.constant 0 : index
    %c0_14 = arith.constant 0 : index
    %17 = vector.load %arg4[%c1, %c0_13, %c0_14] : memref<32x88x256xbf16, #tpu.memory_space<vmem>>, vector<1x88x256xbf16>
    %18 = vector.shape_cast %17 : vector<1x88x256xbf16> to vector<88x256xbf16>
    %cst_15 = arith.constant dense<0.000000e+00> : vector<1x256xf32>
    %19 = tpu.matmul %16, %18, %cst_15 {dimension_numbers = #tpu.dot_dimension_numbers<[1], [0], [0], [1], [0, 0, 1, 1], [], []>} : vector<1x88xbf16>, vector<88x256xbf16>, vector<1x256xf32> -> vector<1x256xf32>
    %20 = arith.addf %15, %19 : vector<1x256xf32>
    %21 = vector.extract_strided_slice %9 {offsets = [2, 0], sizes = [1, 88], strides = [1, 1]} : vector<32x88xbf16> to vector<1x88xbf16>
    %c2 = arith.constant 2 : index
    %c0_16 = arith.constant 0 : index
    %c0_17 = arith.constant 0 : index
    %22 = vector.load %arg4[%c2, %c0_16, %c0_17] : memref<32x88x256xbf16, #tpu.memory_space<vmem>>, vector<1x88x256xbf16>
    %23 = vector.shape_cast %22 : vector<1x88x256xbf16> to vector<88x256xbf16>
    %cst_18 = arith.constant dense<0.000000e+00> : vector<1x256xf32>
    %24 = tpu.matmul %21, %23, %cst_18 {dimension_numbers = #tpu.dot_dimension_numbers<[1], [0], [0], [1], [0, 0, 1, 1], [], []>} : vector<1x88xbf16>, vector<88x256xbf16>, vector<1x256xf32> -> vector<1x256xf32>
    %25 = arith.addf %20, %24 : vector<1x256xf32>
    %26 = vector.extract_strided_slice %9 {offsets = [3, 0], sizes = [1, 88], strides = [1, 1]} : vector<32x88xbf16> to vector<1x88xbf16>
    %c3 = arith.constant 3 : index
    %c0_19 = arith.constant 0 : index
    %c0_20 = arith.constant 0 : index
    %27 = vector.load %arg4[%c3, %c0_19, %c0_20] : memref<32x88x256xbf16, #tpu.memory_space<vmem>>, vector<1x88x256xbf16>
    %28 = vector.shape_cast %27 : vector<1x88x256xbf16> to vector<88x256xbf16>
    %cst_21 = arith.constant dense<0.000000e+00> : vector<1x256xf32>
    %29 = tpu.matmul %26, %28, %cst_21 {dimension_numbers = #tpu.dot_dimension_numbers<[1], [0], [0], [1], [0, 0, 1, 1], [], []>} : vector<1x88xbf16>, vector<88x256xbf16>, vector<1x256xf32> -> vector<1x256xf32>
    %30 = arith.addf %25, %29 : vector<1x256xf32>
    %31 = vector.extract_strided_slice %9 {offsets = [4, 0], sizes = [1, 88], strides = [1, 1]} : vector<32x88xbf16> to vector<1x88xbf16>
    %c4 = arith.constant 4 : index
    %c0_22 = arith.constant 0 : index
    %c0_23 = arith.constant 0 : index
    %32 = vector.load %arg4[%c4, %c0_22, %c0_23] : memref<32x88x256xbf16, #tpu.memory_space<vmem>>, vector<1x88x256xbf16>
    %33 = vector.shape_cast %32 : vector<1x88x256xbf16> to vector<88x256xbf16>
    %cst_24 = arith.constant dense<0.000000e+00> : vector<1x256xf32>
    %34 = tpu.matmul %31, %33, %cst_24 {dimension_numbers = #tpu.dot_dimension_numbers<[1], [0], [0], [1], [0, 0, 1, 1], [], []>} : vector<1x88xbf16>, vector<88x256xbf16>, vector<1x256xf32> -> vector<1x256xf32>
    %35 = arith.addf %30, %34 : vector<1x256xf32>
    %36 = vector.extract_strided_slice %9 {offsets = [5, 0], sizes = [1, 88], strides = [1, 1]} : vector<32x88xbf16> to vector<1x88xbf16>
    %c5 = arith.constant 5 : index
    %c0_25 = arith.constant 0 : index
    %c0_26 = arith.constant 0 : index
    %37 = vector.load %arg4[%c5, %c0_25, %c0_26] : memref<32x88x256xbf16, #tpu.memory_space<vmem>>, vector<1x88x256xbf16>
    %38 = vector.shape_cast %37 : vector<1x88x256xbf16> to vector<88x256xbf16>
    %cst_27 = arith.constant dense<0.000000e+00> : vector<1x256xf32>
    %39 = tpu.matmul %36, %38, %cst_27 {dimension_numbers = #tpu.dot_dimension_numbers<[1], [0], [0], [1], [0, 0, 1, 1], [], []>} : vector<1x88xbf16>, vector<88x256xbf16>, vector<1x256xf32> -> vector<1x256xf32>
    %40 = arith.addf %35, %39 : vector<1x256xf32>
    %41 = vector.extract_strided_slice %9 {offsets = [6, 0], sizes = [1, 88], strides = [1, 1]} : vector<32x88xbf16> to vector<1x88xbf16>
    %c6 = arith.constant 6 : index
    %c0_28 = arith.constant 0 : index
    %c0_29 = arith.constant 0 : index
    %42 = vector.load %arg4[%c6, %c0_28, %c0_29] : memref<32x88x256xbf16, #tpu.memory_space<vmem>>, vector<1x88x256xbf16>
    %43 = vector.shape_cast %42 : vector<1x88x256xbf16> to vector<88x256xbf16>
    %cst_30 = arith.constant dense<0.000000e+00> : vector<1x256xf32>
    %44 = tpu.matmul %41, %43, %cst_30 {dimension_numbers = #tpu.dot_dimension_numbers<[1], [0], [0], [1], [0, 0, 1, 1], [], []>} : vector<1x88xbf16>, vector<88x256xbf16>, vector<1x256xf32> -> vector<1x256xf32>
    %45 = arith.addf %40, %44 : vector<1x256xf32>
    %46 = vector.extract_strided_slice %9 {offsets = [7, 0], sizes = [1, 88], strides = [1, 1]} : vector<32x88xbf16> to vector<1x88xbf16>
    %c7 = arith.constant 7 : index
    %c0_31 = arith.constant 0 : index
    %c0_32 = arith.constant 0 : index
    %47 = vector.load %arg4[%c7, %c0_31, %c0_32] : memref<32x88x256xbf16, #tpu.memory_space<vmem>>, vector<1x88x256xbf16>
    %48 = vector.shape_cast %47 : vector<1x88x256xbf16> to vector<88x256xbf16>
    %cst_33 = arith.constant dense<0.000000e+00> : vector<1x256xf32>
    %49 = tpu.matmul %46, %48, %cst_33 {dimension_numbers = #tpu.dot_dimension_numbers<[1], [0], [0], [1], [0, 0, 1, 1], [], []>} : vector<1x88xbf16>, vector<88x256xbf16>, vector<1x256xf32> -> vector<1x256xf32>
    %50 = arith.addf %45, %49 : vector<1x256xf32>
    %51 = vector.extract_strided_slice %9 {offsets = [8, 0], sizes = [1, 88], strides = [1, 1]} : vector<32x88xbf16> to vector<1x88xbf16>
    %c8 = arith.constant 8 : index
    %c0_34 = arith.constant 0 : index
    %c0_35 = arith.constant 0 : index
    %52 = vector.load %arg4[%c8, %c0_34, %c0_35] : memref<32x88x256xbf16, #tpu.memory_space<vmem>>, vector<1x88x256xbf16>
    %53 = vector.shape_cast %52 : vector<1x88x256xbf16> to vector<88x256xbf16>
    %cst_36 = arith.constant dense<0.000000e+00> : vector<1x256xf32>
    %54 = tpu.matmul %51, %53, %cst_36 {dimension_numbers = #tpu.dot_dimension_numbers<[1], [0], [0], [1], [0, 0, 1, 1], [], []>} : vector<1x88xbf16>, vector<88x256xbf16>, vector<1x256xf32> -> vector<1x256xf32>
    %55 = arith.addf %50, %54 : vector<1x256xf32>
    %56 = vector.extract_strided_slice %9 {offsets = [9, 0], sizes = [1, 88], strides = [1, 1]} : vector<32x88xbf16> to vector<1x88xbf16>
    %c9 = arith.constant 9 : index
    %c0_37 = arith.constant 0 : index
    %c0_38 = arith.constant 0 : index
    %57 = vector.load %arg4[%c9, %c0_37, %c0_38] : memref<32x88x256xbf16, #tpu.memory_space<vmem>>, vector<1x88x256xbf16>
    %58 = vector.shape_cast %57 : vector<1x88x256xbf16> to vector<88x256xbf16>
    %cst_39 = arith.constant dense<0.000000e+00> : vector<1x256xf32>
    %59 = tpu.matmul %56, %58, %cst_39 {dimension_numbers = #tpu.dot_dimension_numbers<[1], [0], [0], [1], [0, 0, 1, 1], [], []>} : vector<1x88xbf16>, vector<88x256xbf16>, vector<1x256xf32> -> vector<1x256xf32>
    %60 = arith.addf %55, %59 : vector<1x256xf32>
    %61 = vector.extract_strided_slice %9 {offsets = [10, 0], sizes = [1, 88], strides = [1, 1]} : vector<32x88xbf16> to vector<1x88xbf16>
    %c10 = arith.constant 10 : index
    %c0_40 = arith.constant 0 : index
    %c0_41 = arith.constant 0 : index
    %62 = vector.load %arg4[%c10, %c0_40, %c0_41] : memref<32x88x256xbf16, #tpu.memory_space<vmem>>, vector<1x88x256xbf16>
    %63 = vector.shape_cast %62 : vector<1x88x256xbf16> to vector<88x256xbf16>
    %cst_42 = arith.constant dense<0.000000e+00> : vector<1x256xf32>
    %64 = tpu.matmul %61, %63, %cst_42 {dimension_numbers = #tpu.dot_dimension_numbers<[1], [0], [0], [1], [0, 0, 1, 1], [], []>} : vector<1x88xbf16>, vector<88x256xbf16>, vector<1x256xf32> -> vector<1x256xf32>
    %65 = arith.addf %60, %64 : vector<1x256xf32>
    %66 = vector.extract_strided_slice %9 {offsets = [11, 0], sizes = [1, 88], strides = [1, 1]} : vector<32x88xbf16> to vector<1x88xbf16>
    %c11 = arith.constant 11 : index
    %c0_43 = arith.constant 0 : index
    %c0_44 = arith.constant 0 : index
    %67 = vector.load %arg4[%c11, %c0_43, %c0_44] : memref<32x88x256xbf16, #tpu.memory_space<vmem>>, vector<1x88x256xbf16>
    %68 = vector.shape_cast %67 : vector<1x88x256xbf16> to vector<88x256xbf16>
    %cst_45 = arith.constant dense<0.000000e+00> : vector<1x256xf32>
    %69 = tpu.matmul %66, %68, %cst_45 {dimension_numbers = #tpu.dot_dimension_numbers<[1], [0], [0], [1], [0, 0, 1, 1], [], []>} : vector<1x88xbf16>, vector<88x256xbf16>, vector<1x256xf32> -> vector<1x256xf32>
    %70 = arith.addf %65, %69 : vector<1x256xf32>
    %71 = vector.extract_strided_slice %9 {offsets = [12, 0], sizes = [1, 88], strides = [1, 1]} : vector<32x88xbf16> to vector<1x88xbf16>
    %c12 = arith.constant 12 : index
    %c0_46 = arith.constant 0 : index
    %c0_47 = arith.constant 0 : index
    %72 = vector.load %arg4[%c12, %c0_46, %c0_47] : memref<32x88x256xbf16, #tpu.memory_space<vmem>>, vector<1x88x256xbf16>
    %73 = vector.shape_cast %72 : vector<1x88x256xbf16> to vector<88x256xbf16>
    %cst_48 = arith.constant dense<0.000000e+00> : vector<1x256xf32>
    %74 = tpu.matmul %71, %73, %cst_48 {dimension_numbers = #tpu.dot_dimension_numbers<[1], [0], [0], [1], [0, 0, 1, 1], [], []>} : vector<1x88xbf16>, vector<88x256xbf16>, vector<1x256xf32> -> vector<1x256xf32>
    %75 = arith.addf %70, %74 : vector<1x256xf32>
    %76 = vector.extract_strided_slice %9 {offsets = [13, 0], sizes = [1, 88], strides = [1, 1]} : vector<32x88xbf16> to vector<1x88xbf16>
    %c13 = arith.constant 13 : index
    %c0_49 = arith.constant 0 : index
    %c0_50 = arith.constant 0 : index
    %77 = vector.load %arg4[%c13, %c0_49, %c0_50] : memref<32x88x256xbf16, #tpu.memory_space<vmem>>, vector<1x88x256xbf16>
    %78 = vector.shape_cast %77 : vector<1x88x256xbf16> to vector<88x256xbf16>
    %cst_51 = arith.constant dense<0.000000e+00> : vector<1x256xf32>
    %79 = tpu.matmul %76, %78, %cst_51 {dimension_numbers = #tpu.dot_dimension_numbers<[1], [0], [0], [1], [0, 0, 1, 1], [], []>} : vector<1x88xbf16>, vector<88x256xbf16>, vector<1x256xf32> -> vector<1x256xf32>
    %80 = arith.addf %75, %79 : vector<1x256xf32>
    %81 = vector.extract_strided_slice %9 {offsets = [14, 0], sizes = [1, 88], strides = [1, 1]} : vector<32x88xbf16> to vector<1x88xbf16>
    %c14 = arith.constant 14 : index
    %c0_52 = arith.constant 0 : index
    %c0_53 = arith.constant 0 : index
    %82 = vector.load %arg4[%c14, %c0_52, %c0_53] : memref<32x88x256xbf16, #tpu.memory_space<vmem>>, vector<1x88x256xbf16>
    %83 = vector.shape_cast %82 : vector<1x88x256xbf16> to vector<88x256xbf16>
    %cst_54 = arith.constant dense<0.000000e+00> : vector<1x256xf32>
    %84 = tpu.matmul %81, %83, %cst_54 {dimension_numbers = #tpu.dot_dimension_numbers<[1], [0], [0], [1], [0, 0, 1, 1], [], []>} : vector<1x88xbf16>, vector<88x256xbf16>, vector<1x256xf32> -> vector<1x256xf32>
    %85 = arith.addf %80, %84 : vector<1x256xf32>
    %86 = vector.extract_strided_slice %9 {offsets = [15, 0], sizes = [1, 88], strides = [1, 1]} : vector<32x88xbf16> to vector<1x88xbf16>
    %c15 = arith.constant 15 : index
    %c0_55 = arith.constant 0 : index
    %c0_56 = arith.constant 0 : index
    %87 = vector.load %arg4[%c15, %c0_55, %c0_56] : memref<32x88x256xbf16, #tpu.memory_space<vmem>>, vector<1x88x256xbf16>
    %88 = vector.shape_cast %87 : vector<1x88x256xbf16> to vector<88x256xbf16>
    %cst_57 = arith.constant dense<0.000000e+00> : vector<1x256xf32>
    %89 = tpu.matmul %86, %88, %cst_57 {dimension_numbers = #tpu.dot_dimension_numbers<[1], [0], [0], [1], [0, 0, 1, 1], [], []>} : vector<1x88xbf16>, vector<88x256xbf16>, vector<1x256xf32> -> vector<1x256xf32>
    %90 = arith.addf %85, %89 : vector<1x256xf32>
    %91 = vector.extract_strided_slice %9 {offsets = [16, 0], sizes = [1, 88], strides = [1, 1]} : vector<32x88xbf16> to vector<1x88xbf16>
    %c16 = arith.constant 16 : index
    %c0_58 = arith.constant 0 : index
    %c0_59 = arith.constant 0 : index
    %92 = vector.load %arg4[%c16, %c0_58, %c0_59] : memref<32x88x256xbf16, #tpu.memory_space<vmem>>, vector<1x88x256xbf16>
    %93 = vector.shape_cast %92 : vector<1x88x256xbf16> to vector<88x256xbf16>
    %cst_60 = arith.constant dense<0.000000e+00> : vector<1x256xf32>
    %94 = tpu.matmul %91, %93, %cst_60 {dimension_numbers = #tpu.dot_dimension_numbers<[1], [0], [0], [1], [0, 0, 1, 1], [], []>} : vector<1x88xbf16>, vector<88x256xbf16>, vector<1x256xf32> -> vector<1x256xf32>
    %95 = arith.addf %90, %94 : vector<1x256xf32>
    %96 = vector.extract_strided_slice %9 {offsets = [17, 0], sizes = [1, 88], strides = [1, 1]} : vector<32x88xbf16> to vector<1x88xbf16>
    %c17 = arith.constant 17 : index
    %c0_61 = arith.constant 0 : index
    %c0_62 = arith.constant 0 : index
    %97 = vector.load %arg4[%c17, %c0_61, %c0_62] : memref<32x88x256xbf16, #tpu.memory_space<vmem>>, vector<1x88x256xbf16>
    %98 = vector.shape_cast %97 : vector<1x88x256xbf16> to vector<88x256xbf16>
    %cst_63 = arith.constant dense<0.000000e+00> : vector<1x256xf32>
    %99 = tpu.matmul %96, %98, %cst_63 {dimension_numbers = #tpu.dot_dimension_numbers<[1], [0], [0], [1], [0, 0, 1, 1], [], []>} : vector<1x88xbf16>, vector<88x256xbf16>, vector<1x256xf32> -> vector<1x256xf32>
    %100 = arith.addf %95, %99 : vector<1x256xf32>
    %101 = vector.extract_strided_slice %9 {offsets = [18, 0], sizes = [1, 88], strides = [1, 1]} : vector<32x88xbf16> to vector<1x88xbf16>
    %c18 = arith.constant 18 : index
    %c0_64 = arith.constant 0 : index
    %c0_65 = arith.constant 0 : index
    %102 = vector.load %arg4[%c18, %c0_64, %c0_65] : memref<32x88x256xbf16, #tpu.memory_space<vmem>>, vector<1x88x256xbf16>
    %103 = vector.shape_cast %102 : vector<1x88x256xbf16> to vector<88x256xbf16>
    %cst_66 = arith.constant dense<0.000000e+00> : vector<1x256xf32>
    %104 = tpu.matmul %101, %103, %cst_66 {dimension_numbers = #tpu.dot_dimension_numbers<[1], [0], [0], [1], [0, 0, 1, 1], [], []>} : vector<1x88xbf16>, vector<88x256xbf16>, vector<1x256xf32> -> vector<1x256xf32>
    %105 = arith.addf %100, %104 : vector<1x256xf32>
    %106 = vector.extract_strided_slice %9 {offsets = [19, 0], sizes = [1, 88], strides = [1, 1]} : vector<32x88xbf16> to vector<1x88xbf16>
    %c19 = arith.constant 19 : index
    %c0_67 = arith.constant 0 : index
    %c0_68 = arith.constant 0 : index
    %107 = vector.load %arg4[%c19, %c0_67, %c0_68] : memref<32x88x256xbf16, #tpu.memory_space<vmem>>, vector<1x88x256xbf16>
    %108 = vector.shape_cast %107 : vector<1x88x256xbf16> to vector<88x256xbf16>
    %cst_69 = arith.constant dense<0.000000e+00> : vector<1x256xf32>
    %109 = tpu.matmul %106, %108, %cst_69 {dimension_numbers = #tpu.dot_dimension_numbers<[1], [0], [0], [1], [0, 0, 1, 1], [], []>} : vector<1x88xbf16>, vector<88x256xbf16>, vector<1x256xf32> -> vector<1x256xf32>
    %110 = arith.addf %105, %109 : vector<1x256xf32>
    %111 = vector.extract_strided_slice %9 {offsets = [20, 0], sizes = [1, 88], strides = [1, 1]} : vector<32x88xbf16> to vector<1x88xbf16>
    %c20 = arith.constant 20 : index
    %c0_70 = arith.constant 0 : index
    %c0_71 = arith.constant 0 : index
    %112 = vector.load %arg4[%c20, %c0_70, %c0_71] : memref<32x88x256xbf16, #tpu.memory_space<vmem>>, vector<1x88x256xbf16>
    %113 = vector.shape_cast %112 : vector<1x88x256xbf16> to vector<88x256xbf16>
    %cst_72 = arith.constant dense<0.000000e+00> : vector<1x256xf32>
    %114 = tpu.matmul %111, %113, %cst_72 {dimension_numbers = #tpu.dot_dimension_numbers<[1], [0], [0], [1], [0, 0, 1, 1], [], []>} : vector<1x88xbf16>, vector<88x256xbf16>, vector<1x256xf32> -> vector<1x256xf32>
    %115 = arith.addf %110, %114 : vector<1x256xf32>
    %116 = vector.extract_strided_slice %9 {offsets = [21, 0], sizes = [1, 88], strides = [1, 1]} : vector<32x88xbf16> to vector<1x88xbf16>
    %c21 = arith.constant 21 : index
    %c0_73 = arith.constant 0 : index
    %c0_74 = arith.constant 0 : index
    %117 = vector.load %arg4[%c21, %c0_73, %c0_74] : memref<32x88x256xbf16, #tpu.memory_space<vmem>>, vector<1x88x256xbf16>
    %118 = vector.shape_cast %117 : vector<1x88x256xbf16> to vector<88x256xbf16>
    %cst_75 = arith.constant dense<0.000000e+00> : vector<1x256xf32>
    %119 = tpu.matmul %116, %118, %cst_75 {dimension_numbers = #tpu.dot_dimension_numbers<[1], [0], [0], [1], [0, 0, 1, 1], [], []>} : vector<1x88xbf16>, vector<88x256xbf16>, vector<1x256xf32> -> vector<1x256xf32>
    %120 = arith.addf %115, %119 : vector<1x256xf32>
    %121 = vector.extract_strided_slice %9 {offsets = [22, 0], sizes = [1, 88], strides = [1, 1]} : vector<32x88xbf16> to vector<1x88xbf16>
    %c22 = arith.constant 22 : index
    %c0_76 = arith.constant 0 : index
    %c0_77 = arith.constant 0 : index
    %122 = vector.load %arg4[%c22, %c0_76, %c0_77] : memref<32x88x256xbf16, #tpu.memory_space<vmem>>, vector<1x88x256xbf16>
    %123 = vector.shape_cast %122 : vector<1x88x256xbf16> to vector<88x256xbf16>
    %cst_78 = arith.constant dense<0.000000e+00> : vector<1x256xf32>
    %124 = tpu.matmul %121, %123, %cst_78 {dimension_numbers = #tpu.dot_dimension_numbers<[1], [0], [0], [1], [0, 0, 1, 1], [], []>} : vector<1x88xbf16>, vector<88x256xbf16>, vector<1x256xf32> -> vector<1x256xf32>
    %125 = arith.addf %120, %124 : vector<1x256xf32>
    %126 = vector.extract_strided_slice %9 {offsets = [23, 0], sizes = [1, 88], strides = [1, 1]} : vector<32x88xbf16> to vector<1x88xbf16>
    %c23 = arith.constant 23 : index
    %c0_79 = arith.constant 0 : index
    %c0_80 = arith.constant 0 : index
    %127 = vector.load %arg4[%c23, %c0_79, %c0_80] : memref<32x88x256xbf16, #tpu.memory_space<vmem>>, vector<1x88x256xbf16>
    %128 = vector.shape_cast %127 : vector<1x88x256xbf16> to vector<88x256xbf16>
    %cst_81 = arith.constant dense<0.000000e+00> : vector<1x256xf32>
    %129 = tpu.matmul %126, %128, %cst_81 {dimension_numbers = #tpu.dot_dimension_numbers<[1], [0], [0], [1], [0, 0, 1, 1], [], []>} : vector<1x88xbf16>, vector<88x256xbf16>, vector<1x256xf32> -> vector<1x256xf32>
    %130 = arith.addf %125, %129 : vector<1x256xf32>
    %131 = vector.extract_strided_slice %9 {offsets = [24, 0], sizes = [1, 88], strides = [1, 1]} : vector<32x88xbf16> to vector<1x88xbf16>
    %c24 = arith.constant 24 : index
    %c0_82 = arith.constant 0 : index
    %c0_83 = arith.constant 0 : index
    %132 = vector.load %arg4[%c24, %c0_82, %c0_83] : memref<32x88x256xbf16, #tpu.memory_space<vmem>>, vector<1x88x256xbf16>
    %133 = vector.shape_cast %132 : vector<1x88x256xbf16> to vector<88x256xbf16>
    %cst_84 = arith.constant dense<0.000000e+00> : vector<1x256xf32>
    %134 = tpu.matmul %131, %133, %cst_84 {dimension_numbers = #tpu.dot_dimension_numbers<[1], [0], [0], [1], [0, 0, 1, 1], [], []>} : vector<1x88xbf16>, vector<88x256xbf16>, vector<1x256xf32> -> vector<1x256xf32>
    %135 = arith.addf %130, %134 : vector<1x256xf32>
    %136 = vector.extract_strided_slice %9 {offsets = [25, 0], sizes = [1, 88], strides = [1, 1]} : vector<32x88xbf16> to vector<1x88xbf16>
    %c25 = arith.constant 25 : index
    %c0_85 = arith.constant 0 : index
    %c0_86 = arith.constant 0 : index
    %137 = vector.load %arg4[%c25, %c0_85, %c0_86] : memref<32x88x256xbf16, #tpu.memory_space<vmem>>, vector<1x88x256xbf16>
    %138 = vector.shape_cast %137 : vector<1x88x256xbf16> to vector<88x256xbf16>
    %cst_87 = arith.constant dense<0.000000e+00> : vector<1x256xf32>
    %139 = tpu.matmul %136, %138, %cst_87 {dimension_numbers = #tpu.dot_dimension_numbers<[1], [0], [0], [1], [0, 0, 1, 1], [], []>} : vector<1x88xbf16>, vector<88x256xbf16>, vector<1x256xf32> -> vector<1x256xf32>
    %140 = arith.addf %135, %139 : vector<1x256xf32>
    %141 = vector.extract_strided_slice %9 {offsets = [26, 0], sizes = [1, 88], strides = [1, 1]} : vector<32x88xbf16> to vector<1x88xbf16>
    %c26 = arith.constant 26 : index
    %c0_88 = arith.constant 0 : index
    %c0_89 = arith.constant 0 : index
    %142 = vector.load %arg4[%c26, %c0_88, %c0_89] : memref<32x88x256xbf16, #tpu.memory_space<vmem>>, vector<1x88x256xbf16>
    %143 = vector.shape_cast %142 : vector<1x88x256xbf16> to vector<88x256xbf16>
    %cst_90 = arith.constant dense<0.000000e+00> : vector<1x256xf32>
    %144 = tpu.matmul %141, %143, %cst_90 {dimension_numbers = #tpu.dot_dimension_numbers<[1], [0], [0], [1], [0, 0, 1, 1], [], []>} : vector<1x88xbf16>, vector<88x256xbf16>, vector<1x256xf32> -> vector<1x256xf32>
    %145 = arith.addf %140, %144 : vector<1x256xf32>
    %146 = vector.extract_strided_slice %9 {offsets = [27, 0], sizes = [1, 88], strides = [1, 1]} : vector<32x88xbf16> to vector<1x88xbf16>
    %c27 = arith.constant 27 : index
    %c0_91 = arith.constant 0 : index
    %c0_92 = arith.constant 0 : index
    %147 = vector.load %arg4[%c27, %c0_91, %c0_92] : memref<32x88x256xbf16, #tpu.memory_space<vmem>>, vector<1x88x256xbf16>
    %148 = vector.shape_cast %147 : vector<1x88x256xbf16> to vector<88x256xbf16>
    %cst_93 = arith.constant dense<0.000000e+00> : vector<1x256xf32>
    %149 = tpu.matmul %146, %148, %cst_93 {dimension_numbers = #tpu.dot_dimension_numbers<[1], [0], [0], [1], [0, 0, 1, 1], [], []>} : vector<1x88xbf16>, vector<88x256xbf16>, vector<1x256xf32> -> vector<1x256xf32>
    %150 = arith.addf %145, %149 : vector<1x256xf32>
    %151 = vector.extract_strided_slice %9 {offsets = [28, 0], sizes = [1, 88], strides = [1, 1]} : vector<32x88xbf16> to vector<1x88xbf16>
    %c28 = arith.constant 28 : index
    %c0_94 = arith.constant 0 : index
    %c0_95 = arith.constant 0 : index
    %152 = vector.load %arg4[%c28, %c0_94, %c0_95] : memref<32x88x256xbf16, #tpu.memory_space<vmem>>, vector<1x88x256xbf16>
    %153 = vector.shape_cast %152 : vector<1x88x256xbf16> to vector<88x256xbf16>
    %cst_96 = arith.constant dense<0.000000e+00> : vector<1x256xf32>
    %154 = tpu.matmul %151, %153, %cst_96 {dimension_numbers = #tpu.dot_dimension_numbers<[1], [0], [0], [1], [0, 0, 1, 1], [], []>} : vector<1x88xbf16>, vector<88x256xbf16>, vector<1x256xf32> -> vector<1x256xf32>
    %155 = arith.addf %150, %154 : vector<1x256xf32>
    %156 = vector.extract_strided_slice %9 {offsets = [29, 0], sizes = [1, 88], strides = [1, 1]} : vector<32x88xbf16> to vector<1x88xbf16>
    %c29 = arith.constant 29 : index
    %c0_97 = arith.constant 0 : index
    %c0_98 = arith.constant 0 : index
    %157 = vector.load %arg4[%c29, %c0_97, %c0_98] : memref<32x88x256xbf16, #tpu.memory_space<vmem>>, vector<1x88x256xbf16>
    %158 = vector.shape_cast %157 : vector<1x88x256xbf16> to vector<88x256xbf16>
    %cst_99 = arith.constant dense<0.000000e+00> : vector<1x256xf32>
    %159 = tpu.matmul %156, %158, %cst_99 {dimension_numbers = #tpu.dot_dimension_numbers<[1], [0], [0], [1], [0, 0, 1, 1], [], []>} : vector<1x88xbf16>, vector<88x256xbf16>, vector<1x256xf32> -> vector<1x256xf32>
    %160 = arith.addf %155, %159 : vector<1x256xf32>
    %161 = vector.extract_strided_slice %9 {offsets = [30, 0], sizes = [1, 88], strides = [1, 1]} : vector<32x88xbf16> to vector<1x88xbf16>
    %c30 = arith.constant 30 : index
    %c0_100 = arith.constant 0 : index
    %c0_101 = arith.constant 0 : index
    %162 = vector.load %arg4[%c30, %c0_100, %c0_101] : memref<32x88x256xbf16, #tpu.memory_space<vmem>>, vector<1x88x256xbf16>
    %163 = vector.shape_cast %162 : vector<1x88x256xbf16> to vector<88x256xbf16>
    %cst_102 = arith.constant dense<0.000000e+00> : vector<1x256xf32>
    %164 = tpu.matmul %161, %163, %cst_102 {dimension_numbers = #tpu.dot_dimension_numbers<[1], [0], [0], [1], [0, 0, 1, 1], [], []>} : vector<1x88xbf16>, vector<88x256xbf16>, vector<1x256xf32> -> vector<1x256xf32>
    %165 = arith.addf %160, %164 : vector<1x256xf32>
    %166 = vector.extract_strided_slice %9 {offsets = [31, 0], sizes = [1, 88], strides = [1, 1]} : vector<32x88xbf16> to vector<1x88xbf16>
    %c31 = arith.constant 31 : index
    %c0_103 = arith.constant 0 : index
    %c0_104 = arith.constant 0 : index
    %167 = vector.load %arg4[%c31, %c0_103, %c0_104] : memref<32x88x256xbf16, #tpu.memory_space<vmem>>, vector<1x88x256xbf16>
    %168 = vector.shape_cast %167 : vector<1x88x256xbf16> to vector<88x256xbf16>
    %cst_105 = arith.constant dense<0.000000e+00> : vector<1x256xf32>
    %169 = tpu.matmul %166, %168, %cst_105 {dimension_numbers = #tpu.dot_dimension_numbers<[1], [0], [0], [1], [0, 0, 1, 1], [], []>} : vector<1x88xbf16>, vector<88x256xbf16>, vector<1x256xf32> -> vector<1x256xf32>
    %170 = arith.addf %165, %169 : vector<1x256xf32>
    %cst_106 = arith.constant 0.000000e+00 : f32
    %171 = vector.broadcast %cst_106 : f32 to vector<1x256xf32>
    %172 = arith.maximumf %170, %171 : vector<1x256xf32>
    %173 = arith.truncf %172 : vector<1x256xf32> to vector<1x256xbf16>
    %c0_107 = arith.constant 0 : index
    %c0_108 = arith.constant 0 : index
    %174 = vector.load %arg6[%c0_107, %c0_108] : memref<256x4xbf16, #tpu.memory_space<vmem>>, vector<256x4xbf16>
    %cst_109 = arith.constant dense<0.000000e+00> : vector<1x4xf32>
    %175 = tpu.matmul %173, %174, %cst_109 {dimension_numbers = #tpu.dot_dimension_numbers<[1], [0], [0], [1], [0, 0, 1, 1], [], []>} : vector<1x256xbf16>, vector<256x4xbf16>, vector<1x4xf32> -> vector<1x4xf32>
    %c0_110 = arith.constant 0 : index
    %c0_111 = arith.constant 0 : index
    %176 = vector.load %arg7[%c0_110, %c0_111] : memref<1x4xf32, #tpu.memory_space<vmem>>, vector<1x4xf32>
    %177 = arith.addf %175, %176 : vector<1x4xf32>
    %c0_112 = arith.constant 0 : index
    %c0_113 = arith.constant 0 : index
    %c0_114 = arith.constant 0 : index
    %178 = vector.load %arg8[%c0_112, %c0_113, %c0_114] : memref<1x1x4xf32, #tpu.memory_space<vmem>>, vector<1x1x4xf32>
    %179 = vector.shape_cast %178 : vector<1x1x4xf32> to vector<1x4xf32>
    %180 = vector.shape_cast %177 : vector<1x4xf32> to vector<1x1x4xf32>
    tpu.vector_store %arg8[%c0_112, %c0_113, %c0_114], %180 {strides = array<i32>} : memref<1x1x4xf32, #tpu.memory_space<vmem>>, vector<1x1x4xf32>,
    return
  }
  func.func @transform_0(%arg0: i32) -> (i32, i32, i32) {
    %c0_i32 = arith.constant 0 : i32
    %c0_i32_0 = arith.constant 0 : i32
    %c0_i32_1 = arith.constant 0 : i32
    return %arg0, %c0_i32, %c0_i32_0 : i32, i32, i32
  }
  func.func @transform_1(%arg0: i32) -> (i32, i32) {
    %c0_i32 = arith.constant 0 : i32
    %c0_i32_0 = arith.constant 0 : i32
    %c0_i32_1 = arith.constant 0 : i32
    return %c0_i32, %c0_i32_0 : i32, i32
  }
  func.func @transform_2(%arg0: i32) -> (i32, i32) {
    %c0_i32 = arith.constant 0 : i32
    %c0_i32_0 = arith.constant 0 : i32
    %c0_i32_1 = arith.constant 0 : i32
    return %c0_i32, %c0_i32_0 : i32, i32
  }
  func.func @transform_3(%arg0: i32) -> (i32, i32, i32) {
    %c0_i32 = arith.constant 0 : i32
    %c0_i32_0 = arith.constant 0 : i32
    %c0_i32_1 = arith.constant 0 : i32
    %c0_i32_2 = arith.constant 0 : i32
    return %c0_i32, %c0_i32_0, %c0_i32_1 : i32, i32, i32
  }
  func.func @transform_4(%arg0: i32) -> (i32, i32) {
    %c0_i32 = arith.constant 0 : i32
    %c0_i32_0 = arith.constant 0 : i32
    %c0_i32_1 = arith.constant 0 : i32
    return %c0_i32, %c0_i32_0 : i32, i32
  }
  func.func @transform_5(%arg0: i32) -> (i32, i32) {
    %c0_i32 = arith.constant 0 : i32
    %c0_i32_0 = arith.constant 0 : i32
    %c0_i32_1 = arith.constant 0 : i32
    return %c0_i32, %c0_i32_0 : i32, i32
  }
  func.func @transform_6(%arg0: i32) -> (i32, i32) {
    %c0_i32 = arith.constant 0 : i32
    %c0_i32_0 = arith.constant 0 : i32
    %c0_i32_1 = arith.constant 0 : i32
    return %c0_i32, %c0_i32_0 : i32, i32
  }
  func.func @transform_7(%arg0: i32) -> (i32, i32, i32) {
    %c0_i32 = arith.constant 0 : i32
    %c0_i32_0 = arith.constant 0 : i32
    %c0_i32_1 = arith.constant 0 : i32
    return %arg0, %c0_i32, %c0_i32_0 : i32, i32, i32
  }
}

</mosaic_0001>

<bundles_post_ra>
// kernel: deep_q_net_forward.2
= control target key start
LH: loop header
LB: loop body
LE: loop exit
PB: predicated region body
PF: predicated region fallthrough
CT: control target
= control target key end

     0   :  { %s1624_s12 = smov 0   ;;  %s1950_s0 = inlined_call_operand.vmem [shape: bf16[864,256], index: 0, kind: input, shape index: {}]   ;;  %s1951_s1 = inlined_call_operand.vmem [shape: bf16[256,16], index: 1, kind: input, shape index: {}]   ;;  %s1952_s2 = inlined_call_operand.vmem [shape: f32[1,16], index: 2, kind: input, shape index: {}]   ;;  %s1953_s3 = inlined_call_operand.vmem [shape: bf16[864,16], index: 3, kind: output, shape index: {}]  }
   0x1 LB: > { %s1267_s13 = sadd.s32 4294967295, %s1601_s12   ;;  %p1271_p0 = scmp.ge.s32.totalorder %s1601_s12, 1  ;;  %s1601_s12 = sphi %s1624_s12, %s13_s12  }
   0x2   : > { %p139_p1 = scmp.lt.s32.totalorder %s1601_s12, 3 }
   0x4   : > { %p140_p2 = pnand %p1271_p0, %p139_p1 }
   0x5   : > { %s164_s16 = smul.u32 (!%p140_p2), 54, %s1267_s13 }
   0x6   : > { %143 = sbr.rel (%p140_p2) target bundleno = 384 (0x180), region = 32 }
   0x7   : > { %p165_p3 = scmp.lt.s32.totalorder (!%p140_p2), %s164_s16, 107 }
   0xb   : > { %v1498_v0 = vld [vmem:[%s1951_s1 + $0x38] sm:$0xff]   ;;  %v1603_v1 = vmov 0   ;;  %v1499_v2 = vld [vmem:[%s1951_s1 + $0x30] sm:$0xff]   ;;  %v1500_v3 = vld [vmem:[%s1951_s1 + $0x28] sm:$0xff]   ;;  %s1955_s16 = smov (!%p165_p3, %s164_s16), 107  ;;  %vm1156_vm0 = vcmask 125952  }
   0xc   : > { %637 = vmatprep.subr.bf16.mxu0 %v1603_v1  ;;  %1457 = vmatprep.subr.bf16.mxu1 %v1603_v1  ;;  %v1501_v4 = vld [vmem:[%s1951_s1 + $0x20] sm:$0xff]   ;;  %s1402_s23 = sshll.u32 %s1955_s16, 3  ;;  %v1502_v5 = vld [vmem:[%s1951_s1 + $0x18] sm:$0xff]   ;;  %v1503_v7 = vld [vmem:[%s1951_s1 + $0x10] sm:$0xff]   ;;  %s1274_s29 = sshll.u32 %s1955_s16, 2 }
   0xd   : > { %638 = vmatpush1.bf16.msra.mxu0 %v1498_v0  ;;  %1473 = vmatpush1.bf16.msra.mxu1 %v1498_v0  ;;  %s1661_s28 = scalar_lea.vmem %s1950_s0, %s1402_s23  ;;  %v1504_v9 = vld [vmem:[%s1951_s1 + $0x8] sm:$0xff]   ;;  %v1505_v10 = vld [vmem:[%s1951_s1] sm:$0xff]   ;;  %v1506_v11 = vld [vmem:[%s1951_s1 + $0x78] sm:$0xff]  }
   0xe   : > { %639 = vmatprep.subr.bf16.mxu0 %v1603_v1  ;;  %1458 = vmatprep.subr.bf16.mxu1 %v1603_v1  ;;  %v1516_v6 = vld [vmem:[%s1661_s28 + $0x4] ss:$8 sps:$4 sm:$0xff]   ;;  %v1507_v12 = vld [vmem:[%s1951_s1 + $0x70] sm:$0xff]   ;;  %v1510_v15 = vld [vmem:[%s1951_s1 + $0x58] sm:$0xff]  }
   0xf   : > { %v1519_v8 = vld [vmem:[%s1661_s28 + $0xe4] ss:$8 sps:$4 sm:$0xff]   ;;  %669 = vmatprep.mubr.bf16.mxu0 %v1516_v6  ;;  %v1511_v16 = vld [vmem:[%s1951_s1 + $0x50] sm:$0xff]   ;;  %v1514_v19 = vld [vmem:[%s1661_s28] ss:$8 sps:$4 sm:$0xff]  }
  0x10   : > { %781 = vmatprep.mubr.bf16.mxu1 %v1519_v8  ;;  %v1508_v13 = vld [vmem:[%s1951_s1 + $0x68] sm:$0xff]   ;;  %v1509_v14 = vld [vmem:[%s1951_s1 + $0x60] sm:$0xff]   ;;  %v1520_v21 = vld [vmem:[%s1661_s28 + $0x14] ss:$8 sps:$4 sm:$0xff]  }
  0x11   : > { %640 = vmatpush1.bf16.msra.mxu0 %v1499_v2  ;;  %1474 = vmatpush1.bf16.msra.mxu1 %v1499_v2  ;;  %v1512_v17 = vld [vmem:[%s1951_s1 + $0x48] sm:$0xff]   ;;  %v1513_v18 = vld [vmem:[%s1951_s1 + $0x40] sm:$0xff]   ;;  %v1523_v22 = vld [vmem:[%s1661_s28 + $0xf4] ss:$8 sps:$4 sm:$0xff]  }
  0x12   : > { %641 = vmatprep.subr.bf16.mxu0 %v1603_v1  ;;  %1459 = vmatprep.subr.bf16.mxu1 %v1603_v1  ;;  %v1517_v20 = vld [vmem:[%s1661_s28 + $0xe0] ss:$8 sps:$4 sm:$0xff]   ;;  %v1522_v23 = vld [vmem:[%s1661_s28 + $0x10] ss:$8 sps:$4 sm:$0xff]   ;;  %v1526_v25 = vld [vmem:[%s1661_s28 + $0x24] ss:$8 sps:$4 sm:$0xff]  }
  0x13   : > { %v1525_v24 = vld [vmem:[%s1661_s28 + $0xf0] ss:$8 sps:$4 sm:$0xff]   ;;  %v1529_v26 = vld [vmem:[%s1661_s28 + $0x104] ss:$8 sps:$4 sm:$0xff]   ;;  %v1528_v27 = vld [vmem:[%s1661_s28 + $0x20] ss:$8 sps:$4 sm:$0xff]  }
  0x14   : > { %v1531_v28 = vld [vmem:[%s1661_s28 + $0x100] ss:$8 sps:$4 sm:$0xff]   ;;  %v1532_v29 = vld [vmem:[%s1661_s28 + $0x34] ss:$8 sps:$4 sm:$0xff]   ;;  %v1534_v31 = vld [vmem:[%s1661_s28 + $0x30] ss:$8 sps:$4 sm:$0xff]  }
  0x15   : > { %642 = vmatpush1.bf16.msra.mxu0 %v1500_v3  ;;  %1475 = vmatpush1.bf16.msra.mxu1 %v1500_v3  ;;  %v1535_v30 = vld [vmem:[%s1661_s28 + $0x114] ss:$8 sps:$4 sm:$0xff]   ;;  %v1537_v32 = vld [vmem:[%s1661_s28 + $0x110] ss:$8 sps:$4 sm:$0xff]   ;;  %v1538_v33 = vld [vmem:[%s1661_s28 + $0x44] ss:$8 sps:$4 sm:$0xff]  }
  0x16   : > { %643 = vmatprep.subr.bf16.mxu0 %v1603_v1  ;;  %1460 = vmatprep.subr.bf16.mxu1 %v1603_v1  ;;  %v1541_v34 = vld [vmem:[%s1661_s28 + $0x124] ss:$8 sps:$4 sm:$0xff]   ;;  %v1540_v35 = vld [vmem:[%s1661_s28 + $0x40] ss:$8 sps:$4 sm:$0xff]   ;;  %v1544_v37 = vld [vmem:[%s1661_s28 + $0x54] ss:$8 sps:$4 sm:$0xff]  }
  0x17   : > { %v1543_v36 = vld [vmem:[%s1661_s28 + $0x120] ss:$8 sps:$4 sm:$0xff]   ;;  %v1547_v38 = vld [vmem:[%s1661_s28 + $0x134] ss:$8 sps:$4 sm:$0xff]   ;;  %v1546_v39 = vld [vmem:[%s1661_s28 + $0x50] ss:$8 sps:$4 sm:$0xff]  }
  0x18   : > { %v1549_v40 = vld [vmem:[%s1661_s28 + $0x130] ss:$8 sps:$4 sm:$0xff]   ;;  %v1550_v41 = vld [vmem:[%s1661_s28 + $0x64] ss:$8 sps:$4 sm:$0xff]   ;;  %v1552_v43 = vld [vmem:[%s1661_s28 + $0x60] ss:$8 sps:$4 sm:$0xff]  }
  0x19   : > { %644 = vmatpush1.bf16.msra.mxu0 %v1501_v4  ;;  %1476 = vmatpush1.bf16.msra.mxu1 %v1501_v4  ;;  %v1553_v42 = vld [vmem:[%s1661_s28 + $0x144] ss:$8 sps:$4 sm:$0xff]   ;;  %v1555_v44 = vld [vmem:[%s1661_s28 + $0x140] ss:$8 sps:$4 sm:$0xff]   ;;  %v1556_v45 = vld [vmem:[%s1661_s28 + $0x74] ss:$8 sps:$4 sm:$0xff]  }
  0x1a   : > { %645 = vmatprep.subr.bf16.mxu0 %v1603_v1  ;;  %1461 = vmatprep.subr.bf16.mxu1 %v1603_v1  ;;  %v1559_v46 = vld [vmem:[%s1661_s28 + $0x154] ss:$8 sps:$4 sm:$0xff]   ;;  %v1558_v47 = vld [vmem:[%s1661_s28 + $0x70] ss:$8 sps:$4 sm:$0xff]   ;;  %v1562_v49 = vld [vmem:[%s1661_s28 + $0x84] ss:$8 sps:$4 sm:$0xff]  }
  0x1b   : > { %v1561_v48 = vld [vmem:[%s1661_s28 + $0x150] ss:$8 sps:$4 sm:$0xff]   ;;  %v1565_v50 = vld [vmem:[%s1661_s28 + $0x164] ss:$8 sps:$4 sm:$0xff]   ;;  %v1564_v51 = vld [vmem:[%s1661_s28 + $0x80] ss:$8 sps:$4 sm:$0xff]  }
  0x1c   : > { %v1567_v52 = vld [vmem:[%s1661_s28 + $0x160] ss:$8 sps:$4 sm:$0xff]   ;;  %v1568_v53 = vld [vmem:[%s1661_s28 + $0x94] ss:$8 sps:$4 sm:$0xff]   ;;  %v1570_v55 = vld [vmem:[%s1661_s28 + $0x90] ss:$8 sps:$4 sm:$0xff]  }
  0x1d   : > { %646 = vmatpush1.bf16.msra.mxu0 %v1502_v5  ;;  %1477 = vmatpush1.bf16.msra.mxu1 %v1502_v5  ;;  %v1571_v54 = vld [vmem:[%s1661_s28 + $0x174] ss:$8 sps:$4 sm:$0xff]   ;;  %v1573_v56 = vld [vmem:[%s1661_s28 + $0x170] ss:$8 sps:$4 sm:$0xff]   ;;  %v1574_v57 = vld [vmem:[%s1661_s28 + $0xa4] ss:$8 sps:$4 sm:$0xff]  }
  0x1e   : > { %647 = vmatprep.subr.bf16.mxu0 %v1603_v1  ;;  %1462 = vmatprep.subr.bf16.mxu1 %v1603_v1  ;;  %v1577_v58 = vld [vmem:[%s1661_s28 + $0x184] ss:$8 sps:$4 sm:$0xff]   ;;  %v1576_v59 = vld [vmem:[%s1661_s28 + $0xa0] ss:$8 sps:$4 sm:$0xff]   ;;  %v1580_v61 = vld [vmem:[%s1661_s28 + $0xb4] ss:$8 sps:$4 sm:$0xff]  }
  0x1f   : > { %v1579_v60 = vld [vmem:[%s1661_s28 + $0x180] ss:$8 sps:$4 sm:$0xff]   ;;  %v1583_v62 = vld [vmem:[%s1661_s28 + $0x194] ss:$8 sps:$4 sm:$0xff]   ;;  %v1582_v63 = vld [vmem:[%s1661_s28 + $0xb0] ss:$8 sps:$4 sm:$0xff]  }
  0x20   : > { %v1585_v0 = vld [vmem:[%s1661_s28 + $0x190] ss:$8 sps:$4 sm:$0xff]   ;;  %v1589_v2 = vld [vmem:[%s1661_s28 + $0x1a4] ss:$8 sps:$4 sm:$0xff]   ;;  %v1588_v3 = vld [vmem:[%s1661_s28 + $0xc0] ss:$8 sps:$4 sm:$0xff]  }
  0x21   : > { %648 = vmatpush1.bf16.msra.mxu0 %v1503_v7  ;;  %1478 = vmatpush1.bf16.msra.mxu1 %v1503_v7  ;;  %v1591_v4 = vld [vmem:[%s1661_s28 + $0x1a0] ss:$8 sps:$4 sm:$0xff]   ;;  %v1592_v5 = vld [vmem:[%s1661_s28 + $0xd4] ss:$8 sps:$4 sm:$0xff]   ;;  %v1594_v6 = vld [vmem:[%s1661_s28 + $0xd0] ss:$8 sps:$4 sm:$0xff]  }
  0x22   : > { %649 = vmatprep.subr.bf16.mxu0 %v1603_v1  ;;  %1463 = vmatprep.subr.bf16.mxu1 %v1603_v1  ;;  %v1777_v7 = vld [vmem:[%s1952_s2] ss:$0 sm:$0xff] }
  0x25   : > { %650 = vmatpush1.bf16.msra.mxu0 %v1504_v9  ;;  %1479 = vmatpush1.bf16.msra.mxu1 %v1504_v9 }
  0x26   : > { %651 = vmatprep.subr.bf16.mxu0 %v1603_v1  ;;  %1464 = vmatprep.subr.bf16.mxu1 %v1603_v1 }
  0x29   : > { %652 = vmatpush1.bf16.msra.mxu0 %v1505_v10  ;;  %1480 = vmatpush1.bf16.msra.mxu1 %v1505_v10 }
  0x2a   : > { %653 = vmatprep.subr.bf16.mxu0 %v1603_v1  ;;  %1465 = vmatprep.subr.bf16.mxu1 %v1603_v1 }
  0x2d   : > { %654 = vmatpush2.bf16.msra.mxu0 %v1506_v11  ;;  %1481 = vmatpush2.bf16.msra.mxu1 %v1506_v11 }
  0x2e   : > { %655 = vmatprep.subr.bf16.mxu0 %v1603_v1  ;;  %1466 = vmatprep.subr.bf16.mxu1 %v1603_v1 }
  0x31   : > { %656 = vmatpush2.bf16.msra.mxu0 %v1507_v12  ;;  %1482 = vmatpush2.bf16.msra.mxu1 %v1507_v12 }
  0x32   : > { %657 = vmatprep.subr.bf16.mxu0 %v1603_v1  ;;  %1467 = vmatprep.subr.bf16.mxu1 %v1603_v1 }
  0x35   : > { %658 = vmatpush2.bf16.msra.mxu0 %v1508_v13  ;;  %1483 = vmatpush2.bf16.msra.mxu1 %v1508_v13 }
  0x36   : > { %659 = vmatprep.subr.bf16.mxu0 %v1603_v1  ;;  %1468 = vmatprep.subr.bf16.mxu1 %v1603_v1 }
  0x39   : > { %660 = vmatpush2.bf16.msra.mxu0 %v1509_v14  ;;  %1484 = vmatpush2.bf16.msra.mxu1 %v1509_v14 }
  0x3a   : > { %661 = vmatprep.subr.bf16.mxu0 %v1603_v1  ;;  %1469 = vmatprep.subr.bf16.mxu1 %v1603_v1 }
  0x3d   : > { %662 = vmatpush2.bf16.msra.mxu0 %v1510_v15  ;;  %1485 = vmatpush2.bf16.msra.mxu1 %v1510_v15 }
  0x3e   : > { %663 = vmatprep.subr.bf16.mxu0 %v1603_v1  ;;  %1470 = vmatprep.subr.bf16.mxu1 %v1603_v1 }
  0x41   : > { %664 = vmatpush2.bf16.msra.mxu0 %v1511_v16  ;;  %1486 = vmatpush2.bf16.msra.mxu1 %v1511_v16 }
  0x42   : > { %665 = vmatprep.subr.bf16.mxu0 %v1603_v1  ;;  %1471 = vmatprep.subr.bf16.mxu1 %v1603_v1 }
  0x45   : > { %666 = vmatpush2.bf16.msra.mxu0 %v1512_v17  ;;  %1487 = vmatpush2.bf16.msra.mxu1 %v1512_v17 }
  0x46   : > { %667 = vmatprep.subr.bf16.mxu0 %v1603_v1  ;;  %1472 = vmatprep.subr.bf16.mxu1 %v1603_v1  ;;  %v1586_v1 = vld [vmem:[%s1661_s28 + $0xc4] ss:$8 sps:$4 sm:$0xff]   ;;  %s1785_s28 = scalar_lea.vmem %s1953_s3, %s1274_s29 }
  0x49   : > { %668 = vmatpush2.bf16.msra.mxu0 %v1513_v18  ;;  %1488 = vmatpush2.bf16.msra.mxu1 %v1513_v18 }
  0x4c   : > { %670 = vmatmul.mubr.bf16.vlgmr.msra.gmra.mxu0 %v1514_v19  ;;  %782 = vmatmul.mubr.bf16.vlgmr.msra.gmra.mxu1 %v1517_v20 }
  0x4d   : > { %677 = vmatprep.mubr.bf16.mxu0 %v1520_v21  ;;  %789 = vmatprep.mubr.bf16.mxu1 %v1523_v22 }
  0x54   : > { %678 = vmatmul.mubr.bf16.gmra.mxu0 %v1522_v23  ;;  %790 = vmatmul.mubr.bf16.gmra.mxu1 %v1525_v24 }
  0x55   : > { %685 = vmatprep.mubr.bf16.mxu0 %v1526_v25  ;;  %797 = vmatprep.mubr.bf16.mxu1 %v1529_v26 }
  0x5c   : > { %686 = vmatmul.mubr.bf16.gmra.mxu0 %v1528_v27  ;;  %798 = vmatmul.mubr.bf16.gmra.mxu1 %v1531_v28 }
  0x5d   : > { %693 = vmatprep.mubr.bf16.mxu0 %v1532_v29  ;;  %805 = vmatprep.mubr.bf16.mxu1 %v1535_v30 }
  0x64   : > { %694 = vmatmul.mubr.bf16.gmra.mxu0 %v1534_v31  ;;  %806 = vmatmul.mubr.bf16.gmra.mxu1 %v1537_v32 }
  0x65   : > { %701 = vmatprep.mubr.bf16.mxu0 %v1538_v33  ;;  %813 = vmatprep.mubr.bf16.mxu1 %v1541_v34 }
  0x6c   : > { %702 = vmatmul.mubr.bf16.gmra.mxu0 %v1540_v35  ;;  %814 = vmatmul.mubr.bf16.gmra.mxu1 %v1543_v36 }
  0x6d   : > { %709 = vmatprep.mubr.bf16.mxu0 %v1544_v37  ;;  %821 = vmatprep.mubr.bf16.mxu1 %v1547_v38 }
  0x74   : > { %710 = vmatmul.mubr.bf16.gmra.mxu0 %v1546_v39  ;;  %822 = vmatmul.mubr.bf16.gmra.mxu1 %v1549_v40 }
  0x75   : > { %717 = vmatprep.mubr.bf16.mxu0 %v1550_v41  ;;  %829 = vmatprep.mubr.bf16.mxu1 %v1553_v42 }
  0x7c   : > { %718 = vmatmul.mubr.bf16.gmra.mxu0 %v1552_v43  ;;  %830 = vmatmul.mubr.bf16.gmra.mxu1 %v1555_v44 }
  0x7d   : > { %725 = vmatprep.mubr.bf16.mxu0 %v1556_v45  ;;  %837 = vmatprep.mubr.bf16.mxu1 %v1559_v46 }
  0x84   : > { %726 = vmatmul.mubr.bf16.gmra.mxu0 %v1558_v47  ;;  %838 = vmatmul.mubr.bf16.gmra.mxu1 %v1561_v48 }
  0x85   : > { %733 = vmatprep.mubr.bf16.mxu0 %v1562_v49  ;;  %845 = vmatprep.mubr.bf16.mxu1 %v1565_v50 }
  0x8c   : > { %734 = vmatmul.mubr.bf16.gmra.mxu0 %v1564_v51  ;;  %846 = vmatmul.mubr.bf16.gmra.mxu1 %v1567_v52 }
  0x8d   : > { %741 = vmatprep.mubr.bf16.mxu0 %v1568_v53  ;;  %853 = vmatprep.mubr.bf16.mxu1 %v1571_v54 }
  0x94   : > { %742 = vmatmul.mubr.bf16.gmra.mxu0 %v1570_v55  ;;  %854 = vmatmul.mubr.bf16.gmra.mxu1 %v1573_v56 }
  0x95   : > { %749 = vmatprep.mubr.bf16.mxu0 %v1574_v57  ;;  %861 = vmatprep.mubr.bf16.mxu1 %v1577_v58 }
  0x9c   : > { %750 = vmatmul.mubr.bf16.gmra.mxu0 %v1576_v59  ;;  %862 = vmatmul.mubr.bf16.gmra.mxu1 %v1579_v60 }
  0x9d   : > { %757 = vmatprep.mubr.bf16.mxu0 %v1580_v61  ;;  %869 = vmatprep.mubr.bf16.mxu1 %v1583_v62 }
  0xa4   : > { %758 = vmatmul.mubr.bf16.gmra.mxu0 %v1582_v63  ;;  %870 = vmatmul.mubr.bf16.gmra.mxu1 %v1585_v0 }
  0xa5   : > { %765 = vmatprep.mubr.bf16.mxu0 %v1586_v1  ;;  %877 = vmatprep.mubr.bf16.mxu1 %v1589_v2 }
  0xac   : > { %766 = vmatmul.mubr.bf16.gmra.mxu0 %v1588_v3  ;;  %878 = vmatmul.mubr.bf16.gmra.mxu1 %v1591_v4 }
  0xad   : > { %773 = vmatprep.mubr.bf16.mxu0 %v1592_v5 }
  0xb4   : > { %774 = vmatmul.mubr.bf16.gmra.mxu0 %v1594_v6 }
 0x10c   : > { %v671_v8 = vpop.f32.mrf.mxu0  ;;  %v783_v9 = vpop.f32.mrf.mxu1 }
 0x10d   : > { %v672_v10 = vadd.f32 %v1777_v7, %v671_v8  ;;  %v784_v11 = vadd.f32 %v1777_v7, %v783_v9 }
 0x10e   : > { %v673_v12 = vpop.f32.mrf.mxu0  ;;  %v785_v13 = vpop.f32.mrf.mxu1 }
 0x10f   : > { %v886_v14 = vmax.f32 %v672_v10, 0.0  ;;  %v914_v15 = vmax.f32 %v784_v11, 0.0 }
 0x110   : > { %v674_v16 = vpop.f32.mrf.mxu0  ;;  %v786_v17 = vpop.f32.mrf.mxu1 }
 0x111   : > { %v1403_v18 = vpack.c.bf16 %v886_v14, %v886_v14  ;;  %v1431_v19 = vpack.c.bf16 %v914_v15, %v914_v15  ;;  %v675_v20 = vadd.f32 %v1777_v7, %v674_v16  ;;  %v787_v21 = vadd.f32 %v1777_v7, %v786_v17 }
 0x112   : > { %v676_v22 = vpop.f32.mrf.mxu0  ;;  %v788_v23 = vpop.f32.mrf.mxu1 }
 0x113   : > { %1157 = vst.msk [vmem:[%s1785_s28] sm:$0xf] %vm1156_vm0, %v1403_v18  ;;  %1185 = vst.msk [vmem:[%s1785_s28 + $0x70] sm:$0xf] %vm1156_vm0, %v1431_v19  ;;  %v887_v24 = vmax.f32 %v675_v20, 0.0  ;;  %v915_v25 = vmax.f32 %v787_v21, 0.0 }
 0x114   : > { %v679_v26 = vpop.f32.mrf.mxu0  ;;  %v791_v27 = vpop.f32.mrf.mxu1 }
 0x115   : > { %v1404_v28 = vpack.c.bf16 %v887_v24, %v887_v24  ;;  %v1432_v29 = vpack.c.bf16 %v915_v25, %v915_v25  ;;  %v680_v30 = vadd.f32 %v1777_v7, %v679_v26  ;;  %v792_v31 = vadd.f32 %v1777_v7, %v791_v27 }
 0x116   : > { %v681_v32 = vpop.f32.mrf.mxu0  ;;  %v793_v33 = vpop.f32.mrf.mxu1 }
 0x117   : > { %1158 = vst.msk [vmem:[%s1785_s28 + $0x4] sm:$0xf] %vm1156_vm0, %v1404_v28  ;;  %1186 = vst.msk [vmem:[%s1785_s28 + $0x74] sm:$0xf] %vm1156_vm0, %v1432_v29  ;;  %v888_v34 = vmax.f32 %v680_v30, 0.0  ;;  %v916_v35 = vmax.f32 %v792_v31, 0.0 }
 0x118   : > { %v682_v36 = vpop.f32.mrf.mxu0  ;;  %v794_v37 = vpop.f32.mrf.mxu1 }
 0x119   : > { %v1405_v38 = vpack.c.bf16 %v888_v34, %v888_v34  ;;  %v1433_v39 = vpack.c.bf16 %v916_v35, %v916_v35  ;;  %v683_v40 = vadd.f32 %v1777_v7, %v682_v36  ;;  %v795_v41 = vadd.f32 %v1777_v7, %v794_v37 }
 0x11a   : > { %v684_v42 = vpop.f32.mrf.mxu0  ;;  %v796_v43 = vpop.f32.mrf.mxu1 }
 0x11b   : > { %1159 = vst.msk [vmem:[%s1785_s28 + $0x8] sm:$0xf] %vm1156_vm0, %v1405_v38  ;;  %1187 = vst.msk [vmem:[%s1785_s28 + $0x78] sm:$0xf] %vm1156_vm0, %v1433_v39  ;;  %v889_v44 = vmax.f32 %v683_v40, 0.0  ;;  %v917_v45 = vmax.f32 %v795_v41, 0.0 }
 0x11c   : > { %v687_v46 = vpop.f32.mrf.mxu0  ;;  %v799_v47 = vpop.f32.mrf.mxu1 }
 0x11d   : > { %v1406_v48 = vpack.c.bf16 %v889_v44, %v889_v44  ;;  %v1434_v49 = vpack.c.bf16 %v917_v45, %v917_v45  ;;  %v688_v50 = vadd.f32 %v1777_v7, %v687_v46  ;;  %v800_v51 = vadd.f32 %v1777_v7, %v799_v47 }
 0x11e   : > { %v689_v52 = vpop.f32.mrf.mxu0  ;;  %v801_v53 = vpop.f32.mrf.mxu1 }
 0x11f   : > { %1160 = vst.msk [vmem:[%s1785_s28 + $0xc] sm:$0xf] %vm1156_vm0, %v1406_v48  ;;  %1188 = vst.msk [vmem:[%s1785_s28 + $0x7c] sm:$0xf] %vm1156_vm0, %v1434_v49  ;;  %v890_v54 = vmax.f32 %v688_v50, 0.0  ;;  %v918_v55 = vmax.f32 %v800_v51, 0.0 }
 0x120   : > { %v690_v56 = vpop.f32.mrf.mxu0  ;;  %v802_v57 = vpop.f32.mrf.mxu1 }
 0x121   : > { %v1407_v58 = vpack.c.bf16 %v890_v54, %v890_v54  ;;  %v1435_v59 = vpack.c.bf16 %v918_v55, %v918_v55  ;;  %v691_v60 = vadd.f32 %v1777_v7, %v690_v56  ;;  %v803_v61 = vadd.f32 %v1777_v7, %v802_v57 }
 0x122   : > { %v692_v62 = vpop.f32.mrf.mxu0  ;;  %v804_v63 = vpop.f32.mrf.mxu1 }
 0x123   : > { %1161 = vst.msk [vmem:[%s1785_s28 + $0x10] sm:$0xf] %vm1156_vm0, %v1407_v58  ;;  %1189 = vst.msk [vmem:[%s1785_s28 + $0x80] sm:$0xf] %vm1156_vm0, %v1435_v59  ;;  %v891_v0 = vmax.f32 %v691_v60, 0.0  ;;  %v919_v1 = vmax.f32 %v803_v61, 0.0 }
 0x124   : > { %v695_v2 = vpop.f32.mrf.mxu0  ;;  %v807_v3 = vpop.f32.mrf.mxu1 }
 0x125   : > { %v1408_v4 = vpack.c.bf16 %v891_v0, %v891_v0  ;;  %v1436_v5 = vpack.c.bf16 %v919_v1, %v919_v1  ;;  %v696_v6 = vadd.f32 %v1777_v7, %v695_v2  ;;  %v808_v8 = vadd.f32 %v1777_v7, %v807_v3 }
 0x126   : > { %v697_v9 = vpop.f32.mrf.mxu0  ;;  %v809_v10 = vpop.f32.mrf.mxu1 }
 0x127   : > { %1162 = vst.msk [vmem:[%s1785_s28 + $0x14] sm:$0xf] %vm1156_vm0, %v1408_v4  ;;  %1190 = vst.msk [vmem:[%s1785_s28 + $0x84] sm:$0xf] %vm1156_vm0, %v1436_v5  ;;  %v892_v11 = vmax.f32 %v696_v6, 0.0  ;;  %v920_v12 = vmax.f32 %v808_v8, 0.0 }
 0x128   : > { %v698_v13 = vpop.f32.mrf.mxu0  ;;  %v810_v14 = vpop.f32.mrf.mxu1 }
 0x129   : > { %v1409_v15 = vpack.c.bf16 %v892_v11, %v892_v11  ;;  %v1437_v16 = vpack.c.bf16 %v920_v12, %v920_v12  ;;  %v699_v17 = vadd.f32 %v1777_v7, %v698_v13  ;;  %v811_v18 = vadd.f32 %v1777_v7, %v810_v14 }
 0x12a   : > { %v700_v19 = vpop.f32.mrf.mxu0  ;;  %v812_v20 = vpop.f32.mrf.mxu1 }
 0x12b   : > { %1163 = vst.msk [vmem:[%s1785_s28 + $0x18] sm:$0xf] %vm1156_vm0, %v1409_v15  ;;  %1191 = vst.msk [vmem:[%s1785_s28 + $0x88] sm:$0xf] %vm1156_vm0, %v1437_v16  ;;  %v893_v21 = vmax.f32 %v699_v17, 0.0  ;;  %v921_v22 = vmax.f32 %v811_v18, 0.0 }
 0x12c   : > { %v703_v23 = vpop.f32.mrf.mxu0  ;;  %v815_v24 = vpop.f32.mrf.mxu1 }
 0x12d   : > { %v1410_v25 = vpack.c.bf16 %v893_v21, %v893_v21  ;;  %v1438_v26 = vpack.c.bf16 %v921_v22, %v921_v22  ;;  %v704_v27 = vadd.f32 %v1777_v7, %v703_v23  ;;  %v816_v28 = vadd.f32 %v1777_v7, %v815_v24 }
 0x12e   : > { %v705_v29 = vpop.f32.mrf.mxu0  ;;  %v817_v30 = vpop.f32.mrf.mxu1 }
 0x12f   : > { %1164 = vst.msk [vmem:[%s1785_s28 + $0x1c] sm:$0xf] %vm1156_vm0, %v1410_v25  ;;  %1192 = vst.msk [vmem:[%s1785_s28 + $0x8c] sm:$0xf] %vm1156_vm0, %v1438_v26  ;;  %v894_v31 = vmax.f32 %v704_v27, 0.0  ;;  %v922_v32 = vmax.f32 %v816_v28, 0.0 }
 0x130   : > { %v706_v33 = vpop.f32.mrf.mxu0  ;;  %v818_v34 = vpop.f32.mrf.mxu1 }
 0x131   : > { %v1411_v35 = vpack.c.bf16 %v894_v31, %v894_v31  ;;  %v1439_v36 = vpack.c.bf16 %v922_v32, %v922_v32  ;;  %v707_v37 = vadd.f32 %v1777_v7, %v706_v33  ;;  %v819_v38 = vadd.f32 %v1777_v7, %v818_v34 }
 0x132   : > { %v708_v39 = vpop.f32.mrf.mxu0  ;;  %v820_v40 = vpop.f32.mrf.mxu1 }
 0x133   : > { %1165 = vst.msk [vmem:[%s1785_s28 + $0x20] sm:$0xf] %vm1156_vm0, %v1411_v35  ;;  %1193 = vst.msk [vmem:[%s1785_s28 + $0x90] sm:$0xf] %vm1156_vm0, %v1439_v36  ;;  %v895_v41 = vmax.f32 %v707_v37, 0.0  ;;  %v923_v42 = vmax.f32 %v819_v38, 0.0 }
 0x134   : > { %v711_v43 = vpop.f32.mrf.mxu0  ;;  %v823_v44 = vpop.f32.mrf.mxu1 }
 0x135   : > { %v1412_v45 = vpack.c.bf16 %v895_v41, %v895_v41  ;;  %v1440_v46 = vpack.c.bf16 %v923_v42, %v923_v42  ;;  %v712_v47 = vadd.f32 %v1777_v7, %v711_v43  ;;  %v824_v48 = vadd.f32 %v1777_v7, %v823_v44 }
 0x136   : > { %v713_v49 = vpop.f32.mrf.mxu0  ;;  %v825_v50 = vpop.f32.mrf.mxu1 }
 0x137   : > { %1166 = vst.msk [vmem:[%s1785_s28 + $0x24] sm:$0xf] %vm1156_vm0, %v1412_v45  ;;  %1194 = vst.msk [vmem:[%s1785_s28 + $0x94] sm:$0xf] %vm1156_vm0, %v1440_v46  ;;  %v896_v51 = vmax.f32 %v712_v47, 0.0  ;;  %v924_v52 = vmax.f32 %v824_v48, 0.0 }
 0x138   : > { %v714_v53 = vpop.f32.mrf.mxu0  ;;  %v826_v54 = vpop.f32.mrf.mxu1 }
 0x139   : > { %v1413_v55 = vpack.c.bf16 %v896_v51, %v896_v51  ;;  %v1441_v56 = vpack.c.bf16 %v924_v52, %v924_v52  ;;  %v715_v57 = vadd.f32 %v1777_v7, %v714_v53  ;;  %v827_v58 = vadd.f32 %v1777_v7, %v826_v54 }
 0x13a   : > { %v716_v59 = vpop.f32.mrf.mxu0  ;;  %v828_v60 = vpop.f32.mrf.mxu1 }
 0x13b   : > { %1167 = vst.msk [vmem:[%s1785_s28 + $0x28] sm:$0xf] %vm1156_vm0, %v1413_v55  ;;  %1195 = vst.msk [vmem:[%s1785_s28 + $0x98] sm:$0xf] %vm1156_vm0, %v1441_v56  ;;  %v897_v61 = vmax.f32 %v715_v57, 0.0  ;;  %v925_v62 = vmax.f32 %v827_v58, 0.0 }
 0x13c   : > { %v719_v63 = vpop.f32.mrf.mxu0  ;;  %v831_v0 = vpop.f32.mrf.mxu1 }
 0x13d   : > { %v1414_v1 = vpack.c.bf16 %v897_v61, %v897_v61  ;;  %v1442_v2 = vpack.c.bf16 %v925_v62, %v925_v62  ;;  %v720_v3 = vadd.f32 %v1777_v7, %v719_v63  ;;  %v832_v4 = vadd.f32 %v1777_v7, %v831_v0 }
 0x13e   : > { %v721_v5 = vpop.f32.mrf.mxu0  ;;  %v833_v6 = vpop.f32.mrf.mxu1 }
 0x13f   : > { %1168 = vst.msk [vmem:[%s1785_s28 + $0x2c] sm:$0xf] %vm1156_vm0, %v1414_v1  ;;  %1196 = vst.msk [vmem:[%s1785_s28 + $0x9c] sm:$0xf] %vm1156_vm0, %v1442_v2  ;;  %v898_v8 = vmax.f32 %v720_v3, 0.0  ;;  %v926_v9 = vmax.f32 %v832_v4, 0.0 }
 0x140   : > { %v722_v10 = vpop.f32.mrf.mxu0  ;;  %v834_v11 = vpop.f32.mrf.mxu1 }
 0x141   : > { %v1415_v12 = vpack.c.bf16 %v898_v8, %v898_v8  ;;  %v1443_v13 = vpack.c.bf16 %v926_v9, %v926_v9  ;;  %v723_v14 = vadd.f32 %v1777_v7, %v722_v10  ;;  %v835_v15 = vadd.f32 %v1777_v7, %v834_v11 }
 0x142   : > { %v724_v16 = vpop.f32.mrf.mxu0  ;;  %v836_v17 = vpop.f32.mrf.mxu1 }
 0x143   : > { %1169 = vst.msk [vmem:[%s1785_s28 + $0x30] sm:$0xf] %vm1156_vm0, %v1415_v12  ;;  %1197 = vst.msk [vmem:[%s1785_s28 + $0xa0] sm:$0xf] %vm1156_vm0, %v1443_v13  ;;  %v899_v18 = vmax.f32 %v723_v14, 0.0  ;;  %v927_v19 = vmax.f32 %v835_v15, 0.0 }
 0x144   : > { %v727_v20 = vpop.f32.mrf.mxu0  ;;  %v839_v21 = vpop.f32.mrf.mxu1 }
 0x145   : > { %v1416_v22 = vpack.c.bf16 %v899_v18, %v899_v18  ;;  %v1444_v23 = vpack.c.bf16 %v927_v19, %v927_v19  ;;  %v728_v24 = vadd.f32 %v1777_v7, %v727_v20  ;;  %v840_v25 = vadd.f32 %v1777_v7, %v839_v21 }
 0x146   : > { %v729_v26 = vpop.f32.mrf.mxu0  ;;  %v841_v27 = vpop.f32.mrf.mxu1 }
 0x147   : > { %1170 = vst.msk [vmem:[%s1785_s28 + $0x34] sm:$0xf] %vm1156_vm0, %v1416_v22  ;;  %1198 = vst.msk [vmem:[%s1785_s28 + $0xa4] sm:$0xf] %vm1156_vm0, %v1444_v23  ;;  %v900_v28 = vmax.f32 %v728_v24, 0.0  ;;  %v928_v29 = vmax.f32 %v840_v25, 0.0 }
 0x148   : > { %v730_v30 = vpop.f32.mrf.mxu0  ;;  %v842_v31 = vpop.f32.mrf.mxu1 }
 0x149   : > { %v1417_v32 = vpack.c.bf16 %v900_v28, %v900_v28  ;;  %v1445_v33 = vpack.c.bf16 %v928_v29, %v928_v29  ;;  %v731_v34 = vadd.f32 %v1777_v7, %v730_v30  ;;  %v843_v35 = vadd.f32 %v1777_v7, %v842_v31 }
 0x14a   : > { %v732_v36 = vpop.f32.mrf.mxu0  ;;  %v844_v37 = vpop.f32.mrf.mxu1 }
 0x14b   : > { %1171 = vst.msk [vmem:[%s1785_s28 + $0x38] sm:$0xf] %vm1156_vm0, %v1417_v32  ;;  %1199 = vst.msk [vmem:[%s1785_s28 + $0xa8] sm:$0xf] %vm1156_vm0, %v1445_v33  ;;  %v901_v38 = vmax.f32 %v731_v34, 0.0  ;;  %v929_v39 = vmax.f32 %v843_v35, 0.0 }
 0x14c   : > { %v735_v40 = vpop.f32.mrf.mxu0  ;;  %v847_v41 = vpop.f32.mrf.mxu1 }
 0x14d   : > { %v1418_v42 = vpack.c.bf16 %v901_v38, %v901_v38  ;;  %v1446_v43 = vpack.c.bf16 %v929_v39, %v929_v39  ;;  %v736_v44 = vadd.f32 %v1777_v7, %v735_v40  ;;  %v848_v45 = vadd.f32 %v1777_v7, %v847_v41 }
 0x14e   : > { %v737_v46 = vpop.f32.mrf.mxu0  ;;  %v849_v47 = vpop.f32.mrf.mxu1 }
 0x14f   : > { %1172 = vst.msk [vmem:[%s1785_s28 + $0x3c] sm:$0xf] %vm1156_vm0, %v1418_v42  ;;  %1200 = vst.msk [vmem:[%s1785_s28 + $0xac] sm:$0xf] %vm1156_vm0, %v1446_v43  ;;  %v902_v48 = vmax.f32 %v736_v44, 0.0  ;;  %v930_v49 = vmax.f32 %v848_v45, 0.0 }
 0x150   : > { %v738_v50 = vpop.f32.mrf.mxu0  ;;  %v850_v51 = vpop.f32.mrf.mxu1 }
 0x151   : > { %v1419_v52 = vpack.c.bf16 %v902_v48, %v902_v48  ;;  %v1447_v53 = vpack.c.bf16 %v930_v49, %v930_v49  ;;  %v739_v54 = vadd.f32 %v1777_v7, %v738_v50  ;;  %v851_v55 = vadd.f32 %v1777_v7, %v850_v51 }
 0x152   : > { %v740_v56 = vpop.f32.mrf.mxu0  ;;  %v852_v57 = vpop.f32.mrf.mxu1 }
 0x153   : > { %1173 = vst.msk [vmem:[%s1785_s28 + $0x40] sm:$0xf] %vm1156_vm0, %v1419_v52  ;;  %1201 = vst.msk [vmem:[%s1785_s28 + $0xb0] sm:$0xf] %vm1156_vm0, %v1447_v53  ;;  %v903_v58 = vmax.f32 %v739_v54, 0.0  ;;  %v931_v59 = vmax.f32 %v851_v55, 0.0 }
 0x154   : > { %v743_v60 = vpop.f32.mrf.mxu0  ;;  %v855_v61 = vpop.f32.mrf.mxu1 }
 0x155   : > { %v1420_v62 = vpack.c.bf16 %v903_v58, %v903_v58  ;;  %v1448_v63 = vpack.c.bf16 %v931_v59, %v931_v59  ;;  %v744_v0 = vadd.f32 %v1777_v7, %v743_v60  ;;  %v856_v1 = vadd.f32 %v1777_v7, %v855_v61 }
 0x156   : > { %v745_v2 = vpop.f32.mrf.mxu0  ;;  %v857_v3 = vpop.f32.mrf.mxu1 }
 0x157   : > { %1174 = vst.msk [vmem:[%s1785_s28 + $0x44] sm:$0xf] %vm1156_vm0, %v1420_v62  ;;  %1202 = vst.msk [vmem:[%s1785_s28 + $0xb4] sm:$0xf] %vm1156_vm0, %v1448_v63  ;;  %v904_v4 = vmax.f32 %v744_v0, 0.0  ;;  %v932_v5 = vmax.f32 %v856_v1, 0.0 }
 0x158   : > { %v746_v6 = vpop.f32.mrf.mxu0  ;;  %v858_v8 = vpop.f32.mrf.mxu1 }
 0x159   : > { %v1421_v9 = vpack.c.bf16 %v904_v4, %v904_v4  ;;  %v1449_v10 = vpack.c.bf16 %v932_v5, %v932_v5  ;;  %v747_v11 = vadd.f32 %v1777_v7, %v746_v6  ;;  %v859_v12 = vadd.f32 %v1777_v7, %v858_v8 }
 0x15a   : > { %v748_v13 = vpop.f32.mrf.mxu0  ;;  %v860_v14 = vpop.f32.mrf.mxu1 }
 0x15b   : > { %1175 = vst.msk [vmem:[%s1785_s28 + $0x48] sm:$0xf] %vm1156_vm0, %v1421_v9  ;;  %1203 = vst.msk [vmem:[%s1785_s28 + $0xb8] sm:$0xf] %vm1156_vm0, %v1449_v10  ;;  %v905_v15 = vmax.f32 %v747_v11, 0.0  ;;  %v933_v16 = vmax.f32 %v859_v12, 0.0 }
 0x15c   : > { %v751_v17 = vpop.f32.mrf.mxu0  ;;  %v863_v18 = vpop.f32.mrf.mxu1 }
 0x15d   : > { %v1422_v19 = vpack.c.bf16 %v905_v15, %v905_v15  ;;  %v1450_v20 = vpack.c.bf16 %v933_v16, %v933_v16  ;;  %v752_v21 = vadd.f32 %v1777_v7, %v751_v17  ;;  %v864_v22 = vadd.f32 %v1777_v7, %v863_v18 }
 0x15e   : > { %v753_v23 = vpop.f32.mrf.mxu0  ;;  %v865_v24 = vpop.f32.mrf.mxu1 }
 0x15f   : > { %1176 = vst.msk [vmem:[%s1785_s28 + $0x4c] sm:$0xf] %vm1156_vm0, %v1422_v19  ;;  %1204 = vst.msk [vmem:[%s1785_s28 + $0xbc] sm:$0xf] %vm1156_vm0, %v1450_v20  ;;  %v906_v25 = vmax.f32 %v752_v21, 0.0  ;;  %v934_v26 = vmax.f32 %v864_v22, 0.0 }
 0x160   : > { %v754_v27 = vpop.f32.mrf.mxu0  ;;  %v866_v28 = vpop.f32.mrf.mxu1 }
 0x161   : > { %v1423_v29 = vpack.c.bf16 %v906_v25, %v906_v25  ;;  %v1451_v30 = vpack.c.bf16 %v934_v26, %v934_v26  ;;  %v755_v31 = vadd.f32 %v1777_v7, %v754_v27  ;;  %v867_v32 = vadd.f32 %v1777_v7, %v866_v28 }
 0x162   : > { %v756_v33 = vpop.f32.mrf.mxu0  ;;  %v868_v34 = vpop.f32.mrf.mxu1 }
 0x163   : > { %1177 = vst.msk [vmem:[%s1785_s28 + $0x50] sm:$0xf] %vm1156_vm0, %v1423_v29  ;;  %1205 = vst.msk [vmem:[%s1785_s28 + $0xc0] sm:$0xf] %vm1156_vm0, %v1451_v30  ;;  %v907_v35 = vmax.f32 %v755_v31, 0.0  ;;  %v935_v36 = vmax.f32 %v867_v32, 0.0 }
 0x164   : > { %v759_v37 = vpop.f32.mrf.mxu0  ;;  %v871_v38 = vpop.f32.mrf.mxu1 }
 0x165   : > { %v1424_v39 = vpack.c.bf16 %v907_v35, %v907_v35  ;;  %v1452_v40 = vpack.c.bf16 %v935_v36, %v935_v36  ;;  %v760_v41 = vadd.f32 %v1777_v7, %v759_v37  ;;  %v872_v42 = vadd.f32 %v1777_v7, %v871_v38 }
 0x166   : > { %v761_v43 = vpop.f32.mrf.mxu0  ;;  %v873_v44 = vpop.f32.mrf.mxu1 }
 0x167   : > { %1178 = vst.msk [vmem:[%s1785_s28 + $0x54] sm:$0xf] %vm1156_vm0, %v1424_v39  ;;  %1206 = vst.msk [vmem:[%s1785_s28 + $0xc4] sm:$0xf] %vm1156_vm0, %v1452_v40  ;;  %v908_v45 = vmax.f32 %v760_v41, 0.0  ;;  %v936_v46 = vmax.f32 %v872_v42, 0.0 }
 0x168   : > { %v762_v47 = vpop.f32.mrf.mxu0  ;;  %v874_v48 = vpop.f32.mrf.mxu1 }
 0x169   : > { %v1425_v49 = vpack.c.bf16 %v908_v45, %v908_v45  ;;  %v1453_v50 = vpack.c.bf16 %v936_v46, %v936_v46  ;;  %v763_v51 = vadd.f32 %v1777_v7, %v762_v47  ;;  %v875_v52 = vadd.f32 %v1777_v7, %v874_v48 }
 0x16a   : > { %v764_v53 = vpop.f32.mrf.mxu0  ;;  %v876_v54 = vpop.f32.mrf.mxu1 }
 0x16b   : > { %1179 = vst.msk [vmem:[%s1785_s28 + $0x58] sm:$0xf] %vm1156_vm0, %v1425_v49  ;;  %1207 = vst.msk [vmem:[%s1785_s28 + $0xc8] sm:$0xf] %vm1156_vm0, %v1453_v50  ;;  %v909_v55 = vmax.f32 %v763_v51, 0.0  ;;  %v937_v56 = vmax.f32 %v875_v52, 0.0 }
 0x16c   : > { %v767_v57 = vpop.f32.mrf.mxu0  ;;  %v879_v58 = vpop.f32.mrf.mxu1 }
 0x16d   : > { %v1426_v59 = vpack.c.bf16 %v909_v55, %v909_v55  ;;  %v1454_v60 = vpack.c.bf16 %v937_v56, %v937_v56  ;;  %v768_v61 = vadd.f32 %v1777_v7, %v767_v57  ;;  %v880_v62 = vadd.f32 %v1777_v7, %v879_v58 }
 0x16e   : > { %v769_v63 = vpop.f32.mrf.mxu0  ;;  %v881_v0 = vpop.f32.mrf.mxu1 }
 0x16f   : > { %1180 = vst.msk [vmem:[%s1785_s28 + $0x5c] sm:$0xf] %vm1156_vm0, %v1426_v59  ;;  %1208 = vst.msk [vmem:[%s1785_s28 + $0xcc] sm:$0xf] %vm1156_vm0, %v1454_v60  ;;  %v910_v1 = vmax.f32 %v768_v61, 0.0  ;;  %v938_v2 = vmax.f32 %v880_v62, 0.0 }
 0x170   : > { %v770_v3 = vpop.f32.mrf.mxu0  ;;  %v882_v4 = vpop.f32.mrf.mxu1 }
 0x171   : > { %v1427_v5 = vpack.c.bf16 %v910_v1, %v910_v1  ;;  %v1455_v6 = vpack.c.bf16 %v938_v2, %v938_v2  ;;  %v771_v8 = vadd.f32 %v1777_v7, %v770_v3  ;;  %v883_v9 = vadd.f32 %v1777_v7, %v882_v4 }
 0x172   : > { %v772_v10 = vpop.f32.mrf.mxu0  ;;  %v884_v11 = vpop.f32.mrf.mxu1 }
 0x173   : > { %1181 = vst.msk [vmem:[%s1785_s28 + $0x60] sm:$0xf] %vm1156_vm0, %v1427_v5  ;;  %1209 = vst.msk [vmem:[%s1785_s28 + $0xd0] sm:$0xf] %vm1156_vm0, %v1455_v6  ;;  %v911_v12 = vmax.f32 %v771_v8, 0.0  ;;  %v939_v13 = vmax.f32 %v883_v9, 0.0 }
 0x174   : > { %v775_v14 = vpop.f32.mrf.mxu0 }
 0x175   : > { %v1428_v15 = vpack.c.bf16 %v911_v12, %v911_v12  ;;  %v1456_v16 = vpack.c.bf16 %v939_v13, %v939_v13  ;;  %v776_v17 = vadd.f32 %v1777_v7, %v775_v14 }
 0x176   : > { %v777_v18 = vpop.f32.mrf.mxu0 }
 0x177   : > { %1182 = vst.msk [vmem:[%s1785_s28 + $0x64] sm:$0xf] %vm1156_vm0, %v1428_v15  ;;  %1210 = vst.msk [vmem:[%s1785_s28 + $0xd4] sm:$0xf] %vm1156_vm0, %v1456_v16  ;;  %v912_v19 = vmax.f32 %v776_v17, 0.0 }
 0x178   : > { %v778_v20 = vpop.f32.mrf.mxu0 }
 0x179   : > { %v1429_v21 = vpack.c.bf16 %v912_v19, %v912_v19  ;;  %v779_v22 = vadd.f32 %v1777_v7, %v778_v20 }
 0x17a   : > { %v780_v23 = vpop.f32.mrf.mxu0 }
 0x17b   : > { %1183 = vst.msk [vmem:[%s1785_s28 + $0x68] sm:$0xf] %vm1156_vm0, %v1429_v21  ;;  %v913_v24 = vmax.f32 %v779_v22, 0.0 }
 0x17d   : > { %v1430_v25 = vpack.c.bf16 %v913_v24, %v913_v24 }
 0x17f   : > { %1184 = vst.msk [vmem:[%s1785_s28 + $0x6c] sm:$0xf] %vm1156_vm0, %v1430_v25 }
 0x180 PF: > { %s13_s12 = sadd.s32 1, %s1601_s12  }
 0x181   : > { %p10_p4 = scmp.ge.s32.totalorder %s13_s12, 4  }
 0x183   :  { %12 = sbr.rel (!%p10_p4) target bundleno = 1 (0x1), region = 62 }

// kernel: deep_q_net_forward.3
= control target key start
LH: loop header
LB: loop body
LE: loop exit
PB: predicated region body
PF: predicated region fallthrough
CT: control target
= control target key end

     0   :  { %12 = vsyncpa [#allocation3], 0  ;;  %s8321_s0 = inlined_call_operand.vmem [shape: bf16[2,256,88], index: 0, kind: input, shape index: {}]   ;;  %s8322_s1 = inlined_call_operand.vmem [shape: bf16[32,256], index: 1, kind: input, shape index: {}]   ;;  %s8323_s2 = inlined_call_operand.vmem [shape: f32[32,1], index: 2, kind: input, shape index: {}]   ;;  %s8324_s3 = inlined_call_operand.vmem [shape: bf16[32,88,256], index: 3, kind: input, shape index: {}]   ;;  %s8325_s4 = inlined_call_operand.vmem [shape: f32[1,256], index: 4, kind: input, shape index: {}]   ;;  %s8326_s5 = inlined_call_operand.vmem [shape: bf16[256,4], index: 5, kind: input, shape index: {}]   ;;  %s8327_s6 = inlined_call_operand.vmem [shape: f32[1,4], index: 6, kind: input, shape index: {}]   ;;  %s8328_s7 = inlined_call_operand.hbm [shape: f32[2,1,4], index: 7, kind: output, shape index: {}]  }
   0x1   :  { %14 = vsyncpa [#allocation3 + $0x1], 0  ;;  %s6764_s24 = smov 0   ;;  %s6766_s25 = smov 0  }
   0x2   :  { %s6768_s26 = smov 0   ;;  %s6770_s27 = smov 0  }
   0x3 LB: > { %s6785_s28 = sadd.s32 4294967295, %s6719_s27   ;;  %s5149_s29 = sadd.s32 4294967294, %s6719_s27   ;;  %s6719_s27 = sphi %s6770_s27, %s8334_s27   ;;  %s6715_s26 = sphi %s6768_s26, %s8333_s26   ;;  %s6711_s25 = sphi %s6766_s25, %s8332_s25   ;;  %s6707_s24 = sphi %s6764_s24, %s8331_s24  }
   0x4   : > { %s6789_s30 = sadd.s32 1, %s6719_s27   ;;  %s179_s8 = sadd.s32 1, %s6715_s26 }
   0x5   : > { %s176_s9 = ssub.s32 %s6719_s27, %s6789_s30  ;;  %p189_p0 = scmp.ne.s32.totalorder %s6715_s26, %s6711_s25 }
   0x6   : > { %p177_p1 = scmp.eq.s32.totalorder %s176_s9, 0  ;;  %p190_p2 = scmp.eq.s32.totalorder %s6785_s28, 1 }
   0x7   : > { %p195_p3 = scmp.ne.s32.totalorder %s6711_s25, %s6707_s24  ;;  %p196_p4 = scmp.eq.s32.totalorder %s5149_s29, 1 }
   0x8   : > { %s6800_s10 = scalar_select %p177_p1, %s6715_s26, %s179_s8  }
   0x9   : > { %p6802_p5 = por %p190_p2, %p189_p0  ;;  %p6806_p6 = por %p196_p4, %p195_p3 }
   0xa   : > { %p5152_p7 = scmp.ge.s32.totalorder %s6719_s27, 1  ;;  %p240_p8 = scmp.lt.s32.totalorder %s6719_s27, 3 }
   0xc   : > { %p241_p9 = pnand %p5152_p7, %p240_p8 }
   0xd   : > { %p271_p10 = scmp.lt.s32.totalorder (!%p241_p9), %s6785_s28, 1  ;;  %s269_s16 = sand.u32 (!%p241_p9), 1, %s6711_s25  }
   0xe   : > { %244 = sbr.rel (%p241_p9) target bundleno = 1069 (0x42d), region = 48  ;;  %s5980_s19 = sshll.u32 (!%p241_p9), %s6785_s28, 4 }
   0xf   : > { %s270_s20 = scalar_lea.vmem (!%p241_p9), [#allocation2], %s269_s16  ;;  %s8286_s29 = scalar_lea.hbm (!%p241_p9), %s8328_s7, %s5980_s19 }
  0x10   : > { %s5094_s21 = sshll.u32 (!%p241_p9), %s270_s20, 4  ;;  %s5082_s8 = scalar_lea.sflag (!%p241_p9), [#allocation3], %s269_s16  ;;  %s5095_s21 = int_to_ptr.vmem [resolvable:$true] %s5094_s21 }
  0x11   : > { %s6659_s9 = scalar_lea.vmem (!%p241_p9), %s5095_s21, 16 }
  0x12   : > { %p6660_p11 = scmp.ne.s32.totalorder (!%p241_p9), %s5095_s21, %s6659_s9 }
  0x13   : > { %v6095_v0 = vld [vmem:[%s8322_s1 + $0x4] ss:$8 sps:$4 sm:$0xff]   ;;  %v6721_v1 = vmov 0   ;;  %s272_s17 = scalar_select %p271_p10, %s6785_s28, 1  ;;  %v519_v4 = vld [vmem:[%s8324_s3 + $0x50] sm:$0xff]  ;;  %vm579_vm0 = vcmask 1043456  }
  0x14   : > { %6075 = vset.pattern.permute.xlu0 %v6721_v1  ;;  %v313_v2 = vld [vmem:[%s8323_s2] sm:$0xff]  ;;  %618 = vmatprep.mubr.bf16.mxu1 %v6721_v1  ;;  %v314_v3 = vld [vmem:[%s8323_s2 + $0x8] sm:$0xff]  ;;  %v5186_v5 = vcombine.high %v519_v4, %v519_v4  ;;  %v5185_v6 = vcombine.low %v519_v4, %v519_v4  ;;  %v6109_v22 = vld [vmem:[%s8324_s3 + $0x34] ss:$8 sps:$4 sm:$0xff]   ;;  %vm575_vm1 = vcmask 719872   ;;  %vm5079_vm2 = vcmask 24576   ;;  %p6661_p12 = pnand %p6660_p11, %p6802_p5 }
  0x15   : > { %319 = vperm.xlu0 %6075, %v313_v2   ;;  %6076 = vset.pattern.permute.xlu1 %v6721_v1  ;;  %s5983_s22 = sshll.u32 %s272_s17, 7  ;;  %v6103_v7 = vld [vmem:[%s8324_s3 + $0x44] ss:$8 sps:$4 sm:$0xff]   ;;  %v6105_v8 = vld [vmem:[%s8324_s3 + $0x40] ss:$8 sps:$4 sm:$0xff]   ;;  %v5274_v53 = vld [vmem:[%s8324_s3 + $0x1b0] sm:$0xff] }
  0x16   : > { %485 = vmatprep.mubr.bf16.mxu0 %v6095_v0  ;;  %s6835_s13 = scalar_lea.vmem %s8321_s0, %s5983_s22  ;;  %5187 = vmatprep.subr.msk.bf16.mxu1 %vm579_vm0, %v5186_v5  ;;  %v581_v10 = vsel %vm579_vm0, %v5185_v6, 0  ;;  %v6111_v23 = vld [vmem:[%s8324_s3 + $0x30] ss:$8 sps:$4 sm:$0xff]   ;;  %v5224_v27 = vld [vmem:[%s8324_s3 + $0x100] sm:$0xff]  ;;  %v6096_v32 = vld [vmem:[%s8322_s1 + $0x14] ss:$8 sps:$4 sm:$0xff]   ;;  %v5286_v54 = vcombine.high %v5274_v53, %v5274_v53  ;;  %p6662_p13 = pneg %p6661_p12 }
  0x17   : > { %v6077_v9 = vld [vmem:[%s6835_s13 + $0x78] sm:$0xff]   ;;  %591 = vmatpush1.bf16.msra.mxu1 %v581_v10  ;;  %v6079_v12 = vld [vmem:[%s6835_s13 + $0x70] sm:$0xff]   ;;  %v6081_v14 = vld [vmem:[%s6835_s13 + $0x68] sm:$0xff]   ;;  %v5236_v30 = vcombine.high %v5224_v27, %v5224_v27  ;;  %v5235_v31 = vcombine.low %v5224_v27, %v5224_v27  ;;  %s6723_s28 = smov [#allocation2]  }
  0x18   : > { %v6078_v11 = vld [vmem:[%s6835_s13 + $0x38] sm:$0xff]   ;;  %5984 = vmatprep.subr.bf16.mxu0 %v6077_v9  ;;  %592 = vmatprep.subr.bf16.mxu1 %v6103_v7  ;;  %v6080_v13 = vld [vmem:[%s6835_s13 + $0x30] sm:$0xff]   ;;  %v6082_v15 = vld [vmem:[%s6835_s13 + $0x28] sm:$0xff]   ;;  %v5285_v7 = vcombine.low %v5274_v53, %v5274_v53  ;;  %s6663_s14 = sshll.u32 %s6723_s28, 4  ;;  %s6664_s14 = int_to_ptr.vmem [resolvable:$false] %s6663_s14 }
  0x19   : > { %324 = vperm.xlu0 %6075, %v314_v3   ;;  %5985 = vmatpush3.bf16.msra.mxu0 %v6078_v11  ;;  %v6083_v16 = vld [vmem:[%s6835_s13 + $0x60] sm:$0xff]   ;;  %v6085_v18 = vld [vmem:[%s6835_s13 + $0x58] sm:$0xff]   ;;  %v6087_v20 = vld [vmem:[%s6835_s13 + $0x50] sm:$0xff]   ;;  %v857_v34 = vsel %vm579_vm0, %v5235_v31, 0  ;;  %p6666_p0 = scmp.lt.s32.totalorder %s5095_s21, %s6664_s14 }
  0x1a   : > { %5986 = vmatprep.subr.bf16.mxu0 %v6079_v12  ;;  %v6084_v17 = vld [vmem:[%s6835_s13 + $0x20] sm:$0xff]   ;;  %v6086_v19 = vld [vmem:[%s6835_s13 + $0x18] sm:$0xff]   ;;  %v6088_v21 = vld [vmem:[%s6835_s13 + $0x10] sm:$0xff]   ;;  %v1131_v12 = vsel %vm579_vm0, %v5285_v7, 0 }
  0x1b   : > { %593 = vmatpush1.bf16.msra.mxu1 %v6105_v8  ;;  %v6089_v24 = vld [vmem:[%s6835_s13 + $0x48] sm:$0xff]   ;;  %v6091_v26 = vld [vmem:[%s6835_s13 + $0x40] sm:$0xff]   ;;  %v6108_v33 = vld [vmem:[%s8324_s3 + $0xf4] ss:$8 sps:$4 sm:$0xff]  }
  0x1c   : > { %594 = vmatprep.subr.bf16.mxu1 %v6109_v22  ;;  %v6090_v25 = vld [vmem:[%s6835_s13 + $0x8] sm:$0xff]   ;;  %v6092_v28 = vld [vmem:[%s6835_s13] sm:$0xff]   ;;  %v6106_v35 = vld [vmem:[%s8324_s3 + $0xf0] ss:$8 sps:$4 sm:$0xff]   ;;  %s6665_s13 = scalar_lea.vmem %s6664_s14, 32 }
  0x1d   : > { %5987 = vmatpush3.bf16.msra.mxu0 %v6080_v13  ;;  %v6093_v29 = vld [vmem:[%s8322_s1] ss:$8 sps:$4 sm:$0xff]   ;;  %v6098_v36 = vld [vmem:[%s8322_s1 + $0x10] ss:$8 sps:$4 sm:$0xff]   ;;  %v6114_v37 = vld [vmem:[%s8324_s3 + $0xe4] ss:$8 sps:$4 sm:$0xff]   ;;  %p6667_p1 = scmp.lt.s32.totalorder %s6665_s13, %s6659_s9 }
  0x1e   : > { %5988 = vmatprep.subr.bf16.mxu0 %v6081_v14  ;;  %v6112_v38 = vld [vmem:[%s8324_s3 + $0xe0] ss:$8 sps:$4 sm:$0xff]   ;;  %v6115_v39 = vld [vmem:[%s8324_s3 + $0x24] ss:$8 sps:$4 sm:$0xff]   ;;  %v6120_v41 = vld [vmem:[%s8324_s3 + $0xd4] ss:$8 sps:$4 sm:$0xff]  }
  0x1f   : > { %595 = vmatpush1.bf16.msra.mxu1 %v6111_v23  ;;  %v6117_v40 = vld [vmem:[%s8324_s3 + $0x20] ss:$8 sps:$4 sm:$0xff]   ;;  %v6118_v42 = vld [vmem:[%s8324_s3 + $0xd0] ss:$8 sps:$4 sm:$0xff]   ;;  %v6121_v43 = vld [vmem:[%s8324_s3 + $0x14] ss:$8 sps:$4 sm:$0xff]   ;;  %p6668_p2 = por %p6667_p1, %p6666_p0 }
  0x20   : > { %596 = vmatprep.subr.bf16.mxu1 %v6115_v39  ;;  %v6123_v44 = vld [vmem:[%s8324_s3 + $0x10] ss:$8 sps:$4 sm:$0xff]   ;;  %v6126_v45 = vld [vmem:[%s8324_s3 + $0xc4] ss:$8 sps:$4 sm:$0xff]   ;;  %v6124_v46 = vld [vmem:[%s8324_s3 + $0xc0] ss:$8 sps:$4 sm:$0xff]  }
  0x21   : > { %5989 = vmatpush3.bf16.msra.mxu0 %v6082_v15  ;;  %v6127_v47 = vld [vmem:[%s8324_s3 + $0x4] ss:$8 sps:$4 sm:$0xff]   ;;  %v6129_v48 = vld [vmem:[%s8324_s3] ss:$8 sps:$4 sm:$0xff]   ;;  %v6132_v49 = vld [vmem:[%s8324_s3 + $0xb4] ss:$8 sps:$4 sm:$0xff]   ;;  %p6669_p3 = pnand %p6668_p2, %p6662_p13 }
  0x22   : > { %5990 = vmatprep.subr.bf16.mxu0 %v6083_v16  ;;  %v6130_v50 = vld [vmem:[%s8324_s3 + $0xb0] ss:$8 sps:$4 sm:$0xff]   ;;  %v5199_v51 = vld [vmem:[%s8324_s3 + $0xa8] sm:$0xff]  ;;  %v6139_v10 = vld [vmem:[%s8324_s3 + $0x9c] ss:$8 sps:$4 sm:$0xff]  }
  0x23   : > { %597 = vmatpush1.bf16.msra.mxu1 %v6117_v40  ;;  %v5211_v52 = vcombine.high %v5199_v51, %v5199_v51  ;;  %v315_v55 = vld [vmem:[%s8323_s2 + $0x10] sm:$0xff]  ;;  %v316_v56 = vld [vmem:[%s8323_s2 + $0x18] sm:$0xff]  ;;  %v5210_v4 = vcombine.low %v5199_v51, %v5199_v51  ;;  %v6142_v13 = vld [vmem:[%s8324_s3 + $0x1a4] ss:$8 sps:$4 sm:$0xff]  }
  0x24   : > { %598 = vmatprep.subr.bf16.mxu1 %v6121_v43  ;;  %329 = vperm.xlu1 %6076, %v315_v55   ;;  %v6137_v14 = vld [vmem:[%s8324_s3 + $0x98] ss:$8 sps:$4 sm:$0xff]   ;;  %v6145_v15 = vld [vmem:[%s8324_s3 + $0x8c] ss:$8 sps:$4 sm:$0xff]   ;;  %v6163_v27 = vld [vmem:[%s8324_s3 + $0x5c] ss:$8 sps:$4 sm:$0xff]  }
  0x25   : > { %5991 = vmatpush3.bf16.msra.mxu0 %v6084_v17  ;;  %v719_v9 = vsel %vm579_vm0, %v5210_v4, 0  ;;  %v6140_v16 = vld [vmem:[%s8324_s3 + $0x1a0] ss:$8 sps:$4 sm:$0xff]   ;;  %v6148_v17 = vld [vmem:[%s8324_s3 + $0x194] ss:$8 sps:$4 sm:$0xff]  }
  0x26   : > { %5992 = vmatprep.subr.bf16.mxu0 %v6085_v18  ;;  %v6143_v18 = vld [vmem:[%s8324_s3 + $0x88] ss:$8 sps:$4 sm:$0xff]   ;;  %v6149_v22 = vld [vmem:[%s8324_s3 + $0x78] ss:$8 sps:$4 sm:$0xff]   ;;  %v6157_v23 = vld [vmem:[%s8324_s3 + $0x6c] ss:$8 sps:$4 sm:$0xff]  }
  0x27   : > { %599 = vmatpush1.bf16.msra.mxu1 %v6123_v44  ;;  %v6161_v31 = vld [vmem:[%s8324_s3 + $0x58] ss:$8 sps:$4 sm:$0xff]   ;;  %v6173_v40 = vld [vmem:[%s8324_s3 + $0x14c] ss:$8 sps:$4 sm:$0xff]   ;;  %v6171_v44 = vld [vmem:[%s8324_s3 + $0x148] ss:$8 sps:$4 sm:$0xff]  }
  0x28   : > { %600 = vmatprep.subr.bf16.mxu1 %v6127_v47  ;;  %334 = vperm.xlu1 %6076, %v316_v56   ;;  %v6176_v43 = vld [vmem:[%s8324_s3 + $0x254] ss:$8 sps:$4 sm:$0xff]   ;;  %v6182_v47 = vld [vmem:[%s8324_s3 + $0x244] ss:$8 sps:$4 sm:$0xff]   ;;  %v6189_v56 = vld [vmem:[%s8324_s3 + $0x118] ss:$8 sps:$4 sm:$0xff]  }
  0x29   : > { %5993 = vmatpush3.bf16.msra.mxu0 %v6086_v19  ;;  %v6151_v19 = vld [vmem:[%s8324_s3 + $0x7c] ss:$8 sps:$4 sm:$0xff]  }
  0x2a   : > { %5994 = vmatprep.subr.bf16.mxu0 %v6087_v20  ;;  %v6146_v20 = vld [vmem:[%s8324_s3 + $0x190] ss:$8 sps:$4 sm:$0xff]   ;;  %v6188_v51 = vld [vmem:[%s8324_s3 + $0x234] ss:$8 sps:$4 sm:$0xff]   ;;  %v6194_v55 = vld [vmem:[%s8324_s3 + $0x224] ss:$8 sps:$4 sm:$0xff]  }
  0x2b   : > { %601 = vmatpush1.bf16.msra.mxu1 %v6129_v48  ;;  %v6177_v48 = vld [vmem:[%s8324_s3 + $0x138] ss:$8 sps:$4 sm:$0xff]   ;;  %v6191_v53 = vld [vmem:[%s8324_s3 + $0x11c] ss:$8 sps:$4 sm:$0xff]  }
  0x2c   : > { %5212 = vmatprep.subr.msk.bf16.mxu1 %vm579_vm0, %v5211_v52  ;;  %v6183_v52 = vld [vmem:[%s8324_s3 + $0x128] ss:$8 sps:$4 sm:$0xff]   ;;  %v6207_v7 = vld [vmem:[%s8324_s3 + $0x1fc] ss:$8 sps:$4 sm:$0xff]  }
  0x2d   : > { %5995 = vmatpush3.bf16.msra.mxu0 %v6088_v21  ;;  %v6154_v21 = vld [vmem:[%s8324_s3 + $0x184] ss:$8 sps:$4 sm:$0xff]  }
  0x2e   : > { %5996 = vmatprep.subr.bf16.mxu0 %v6089_v24  ;;  %v6152_v24 = vld [vmem:[%s8324_s3 + $0x180] ss:$8 sps:$4 sm:$0xff]  }
  0x31   : > { %5997 = vmatpush3.bf16.msra.mxu0 %v6090_v25  ;;  %v6160_v25 = vld [vmem:[%s8324_s3 + $0x174] ss:$8 sps:$4 sm:$0xff]  }
  0x32   : > { %5998 = vmatprep.subr.bf16.mxu0 %v6091_v26  ;;  %v6155_v26 = vld [vmem:[%s8324_s3 + $0x68] ss:$8 sps:$4 sm:$0xff]  }
  0x35   : > { %5999 = vmatpush3.bf16.msra.mxu0 %v6092_v28  ;;  %v6158_v28 = vld [vmem:[%s8324_s3 + $0x170] ss:$8 sps:$4 sm:$0xff]  }
  0x36   : > { %5237 = vmatprep.subr.msk.bf16.mxu0 %vm579_vm0, %v5236_v30  ;;  %v6166_v30 = vld [vmem:[%s8324_s3 + $0x164] ss:$8 sps:$4 sm:$0xff]  }
  0x38   : > { %486 = vmatmul.mubr.bf16.vlgmr.msra.gmra.mxu0 %v6093_v29  ;;  %v5249_v29 = vld [vmem:[%s8324_s3 + $0x158] sm:$0xff] }
  0x39   : > { %493 = vmatprep.mubr.bf16.mxu0 %v6096_v32  ;;  %867 = vmatpush1.bf16.msra.mxu0 %v857_v34  ;;  %v5324_v32 = vld [vmem:[%s8324_s3 + $0x260] sm:$0xff]  ;;  %v5260_v34 = vcombine.low %v5249_v29, %v5249_v29 }
  0x3a   : > { %868 = vmatprep.subr.bf16.mxu0 %v6108_v33  ;;  %v5261_v33 = vcombine.high %v5249_v29, %v5249_v29  ;;  %v6229_v29 = vld [vmem:[%s8324_s3 + $0x1b8] ss:$8 sps:$4 sm:$0xff]  }
  0x3b   : > { %v994_v39 = vsel %vm579_vm0, %v5260_v34, 0 }
  0x3d   : > { %869 = vmatpush1.bf16.msra.mxu0 %v6106_v35  ;;  %v6164_v35 = vld [vmem:[%s8324_s3 + $0x160] ss:$8 sps:$4 sm:$0xff]  }
  0x3e   : > { %870 = vmatprep.subr.bf16.mxu0 %v6114_v37  ;;  %v5335_v37 = vcombine.low %v5324_v32, %v5324_v32 }
  0x40   : > { %494 = vmatmul.mubr.bf16.gmra.mxu0 %v6098_v36  ;;  %v5336_v36 = vcombine.high %v5324_v32, %v5324_v32 }
  0x41   : > { %894 = vmatprep.mubr.bf16.mxu0 %v6721_v1  ;;  %871 = vmatpush1.bf16.msra.mxu0 %v6112_v38 }
  0x42   : > { %872 = vmatprep.subr.bf16.mxu0 %v6120_v41 }
  0x45   : > { %873 = vmatpush1.bf16.msra.mxu0 %v6118_v42  ;;  %v1405_v42 = vsel %vm579_vm0, %v5335_v37, 0 }
  0x46   : > { %874 = vmatprep.subr.bf16.mxu0 %v6126_v45  ;;  %v6179_v45 = vld [vmem:[%s8324_s3 + $0x13c] ss:$8 sps:$4 sm:$0xff]  }
  0x49   : > { %875 = vmatpush1.bf16.msra.mxu0 %v6124_v46  ;;  %v6174_v46 = vld [vmem:[%s8324_s3 + $0x250] ss:$8 sps:$4 sm:$0xff]  }
  0x4a   : > { %876 = vmatprep.subr.bf16.mxu0 %v6132_v49  ;;  %v6185_v49 = vld [vmem:[%s8324_s3 + $0x12c] ss:$8 sps:$4 sm:$0xff]  }
  0x4d   : > { %877 = vmatpush1.bf16.msra.mxu0 %v6130_v50  ;;  %v6180_v50 = vld [vmem:[%s8324_s3 + $0x240] ss:$8 sps:$4 sm:$0xff]  }
  0x4e   : > { %5287 = vmatprep.subr.msk.bf16.mxu0 %vm579_vm0, %v5286_v54  ;;  %v6186_v54 = vld [vmem:[%s8324_s3 + $0x230] ss:$8 sps:$4 sm:$0xff]  }
  0x90   : > { %v320_v58 = vpop.permute.xlu0 %319 }
  0x94   : > { %v325_v2 = vpop.permute.xlu0 %324 }
  0xf8   : > { %v6000_v57 = vpop.f32.mrf.mxu0 }
  0xfa   : > { %v6001_v59 = vpop.f32.mrf.mxu0 }
  0xfb   : > { %v6002_v60 = vadd.f32 %v6001_v59, %v6000_v57  ;;  %v6197_v57 = vld [vmem:[%s8324_s3 + $0x10c] ss:$8 sps:$4 sm:$0xff]  }
  0xfc   : > { %v6003_v61 = vpop.f32.mrf.mxu0  ;;  %v5299_v59 = vld [vmem:[%s8324_s3 + $0x208] sm:$0xff] }
  0xfd   : > { %v488_v63 = vadd.f32 %v6002_v60, %v320_v58  ;;  %v6192_v58 = vld [vmem:[%s8324_s3 + $0x220] ss:$8 sps:$4 sm:$0xff]   ;;  %v6200_v60 = vld [vmem:[%s8324_s3 + $0x214] ss:$8 sps:$4 sm:$0xff]  }
  0xfe   : > { %v6004_v62 = vpop.f32.mrf.mxu0 }
  0xff   : > { %v6005_v0 = vadd.f32 %v6004_v62, %v6003_v61  ;;  %v502_v5 = vmax.f32 %v488_v63, 0.0  ;;  %v6195_v61 = vld [vmem:[%s8324_s3 + $0x108] ss:$8 sps:$4 sm:$0xff]   ;;  %v5311_v63 = vcombine.high %v5299_v59, %v5299_v59 }
 0x100   : > { %v5374_v62 = vld [vmem:[%s8324_s3 + $0x310] sm:$0xff] }
 0x101   : > { %v491_v3 = vadd.f32 %v6005_v0, %v325_v2  ;;  %v5310_v0 = vcombine.low %v5299_v59, %v5299_v59  ;;  %v6198_v2 = vld [vmem:[%s8324_s3 + $0x210] ss:$8 sps:$4 sm:$0xff]   ;;  %v5385_v4 = vcombine.low %v5374_v62, %v5374_v62  ;;  %v6268_v59 = vld [vmem:[%s8324_s3 + $0x374] ss:$8 sps:$4 sm:$0xff]  }
 0x103   : > { %v503_v6 = vmax.f32 %v491_v3, 0.0  ;;  %v5386_v3 = vcombine.high %v5374_v62, %v5374_v62 }
 0x105   : > { %v6941_v8 = vpack.c.bf16 %v503_v6, %v502_v5  ;;  %v1268_v6 = vsel %vm579_vm0, %v5310_v0, 0  ;;  %v6266_v0 = vld [vmem:[%s8324_s3 + $0x370] ss:$8 sps:$4 sm:$0xff]  }
 0x107   : > { %5188 = vmatmul.mubr.msk.bf16.vlgmr.msra.gmra.mxu1 %vm575_vm1, %v6941_v8  ;;  %v797_v11 = vrot.slane %v6941_v8, 1  ;;  %v7018_v38 = vshrl.u32 %v6941_v8, 16  ;;  %v1071_v41 = vrot.slane %v6941_v8, 2 }
 0x108   : > { %729 = vmatpush1.bf16.msra.mxu1 %v719_v9  ;;  %756 = vmatprep.mubr.bf16.mxu1 %v6721_v1  ;;  %v1345_v9 = vrot.slane %v6941_v8, 3 }
 0x109   : > { %5238 = vmatmul.mubr.msk.bf16.vlgmr.msra.gmra.mxu0 %vm575_vm1, %v797_v11  ;;  %730 = vmatprep.subr.bf16.mxu1 %v6139_v10  ;;  %v934_v5 = vrot.slane %v7018_v38, 1  ;;  %v1679_v10 = vsel %vm579_vm0, %v5385_v4, 0  ;;  %v6210_v11 = vld [vmem:[%s8324_s3 + $0x304] ss:$8 sps:$4 sm:$0xff]   ;;  %v1482_v4 = vrot.slane %v7018_v38, 3 }
 0x10a   : > { %1141 = vmatpush1.bf16.msra.mxu0 %v1131_v12  ;;  %1168 = vmatprep.mubr.bf16.mxu0 %v6721_v1  ;;  %v6205_v12 = vld [vmem:[%s8324_s3 + $0x1f8] ss:$8 sps:$4 sm:$0xff]  }
 0x10b   : > { %1142 = vmatprep.subr.bf16.mxu0 %v6142_v13  ;;  %v6213_v13 = vld [vmem:[%s8324_s3 + $0x1ec] ss:$8 sps:$4 sm:$0xff]  }
 0x10c   : > { %731 = vmatpush1.bf16.msra.mxu1 %v6137_v14  ;;  %v6208_v14 = vld [vmem:[%s8324_s3 + $0x300] ss:$8 sps:$4 sm:$0xff]  }
 0x10d   : > { %732 = vmatprep.subr.bf16.mxu1 %v6145_v15  ;;  %v6216_v15 = vld [vmem:[%s8324_s3 + $0x2f4] ss:$8 sps:$4 sm:$0xff]  }
 0x10e   : > { %1143 = vmatpush1.bf16.msra.mxu0 %v6140_v16  ;;  %v6211_v16 = vld [vmem:[%s8324_s3 + $0x1e8] ss:$8 sps:$4 sm:$0xff]  }
 0x10f   : > { %1144 = vmatprep.subr.bf16.mxu0 %v6148_v17  ;;  %v6219_v17 = vld [vmem:[%s8324_s3 + $0x1dc] ss:$8 sps:$4 sm:$0xff]  }
 0x110   : > { %733 = vmatpush1.bf16.msra.mxu1 %v6143_v18  ;;  %v6214_v18 = vld [vmem:[%s8324_s3 + $0x2f0] ss:$8 sps:$4 sm:$0xff]  }
 0x111   : > { %734 = vmatprep.subr.bf16.mxu1 %v6151_v19  ;;  %v6222_v19 = vld [vmem:[%s8324_s3 + $0x2e4] ss:$8 sps:$4 sm:$0xff]  }
 0x112   : > { %1145 = vmatpush1.bf16.msra.mxu0 %v6146_v20  ;;  %v6217_v20 = vld [vmem:[%s8324_s3 + $0x1d8] ss:$8 sps:$4 sm:$0xff]  }
 0x113   : > { %1146 = vmatprep.subr.bf16.mxu0 %v6154_v21  ;;  %v6225_v21 = vld [vmem:[%s8324_s3 + $0x1cc] ss:$8 sps:$4 sm:$0xff]  }
 0x114   : > { %735 = vmatpush1.bf16.msra.mxu1 %v6149_v22  ;;  %v6220_v22 = vld [vmem:[%s8324_s3 + $0x2e0] ss:$8 sps:$4 sm:$0xff]  }
 0x115   : > { %736 = vmatprep.subr.bf16.mxu1 %v6157_v23  ;;  %v6228_v23 = vld [vmem:[%s8324_s3 + $0x2d4] ss:$8 sps:$4 sm:$0xff]  }
 0x116   : > { %1147 = vmatpush1.bf16.msra.mxu0 %v6152_v24  ;;  %v6223_v24 = vld [vmem:[%s8324_s3 + $0x1c8] ss:$8 sps:$4 sm:$0xff]  }
 0x117   : > { %1148 = vmatprep.subr.bf16.mxu0 %v6160_v25  ;;  %v6231_v25 = vld [vmem:[%s8324_s3 + $0x1bc] ss:$8 sps:$4 sm:$0xff]  }
 0x118   : > { %737 = vmatpush1.bf16.msra.mxu1 %v6155_v26  ;;  %v6226_v26 = vld [vmem:[%s8324_s3 + $0x2d0] ss:$8 sps:$4 sm:$0xff]  }
 0x119   : > { %738 = vmatprep.subr.bf16.mxu1 %v6163_v27  ;;  %v5349_v27 = vld [vmem:[%s8324_s3 + $0x2b8] sm:$0xff] }
 0x11a   : > { %1149 = vmatpush1.bf16.msra.mxu0 %v6158_v28  ;;  %v6234_v28 = vld [vmem:[%s8324_s3 + $0x2c4] ss:$8 sps:$4 sm:$0xff]   ;;  %v5360_v32 = vcombine.low %v5349_v27, %v5349_v27 }
 0x11b   : > { %1150 = vmatprep.subr.bf16.mxu0 %v6166_v30  ;;  %v5424_v30 = vld [vmem:[%s8324_s3 + $0x3c0] sm:$0xff] }
 0x11c   : > { %739 = vmatpush1.bf16.msra.mxu1 %v6161_v31  ;;  %v5361_v31 = vcombine.high %v5349_v27, %v5349_v27  ;;  %v5436_v34 = vcombine.high %v5424_v30, %v5424_v30  ;;  %v1542_v37 = vsel %vm579_vm0, %v5360_v32, 0  ;;  %v6302_v27 = vld [vmem:[%s8324_s3 + $0x424] ss:$8 sps:$4 sm:$0xff]   ;;  %v6300_v32 = vld [vmem:[%s8324_s3 + $0x420] ss:$8 sps:$4 sm:$0xff]  }
 0x11d   : > { %5262 = vmatprep.subr.msk.bf16.mxu1 %vm579_vm0, %v5261_v33  ;;  %v6232_v33 = vld [vmem:[%s8324_s3 + $0x2c0] ss:$8 sps:$4 sm:$0xff]  }
 0x11e   : > { %1151 = vmatpush1.bf16.msra.mxu0 %v6164_v35  ;;  %v5435_v35 = vcombine.low %v5424_v30, %v5424_v30 }
 0x11f   : > { %5213 = vmatmul.mubr.msk.bf16.vlgmr.msra.gmra.mxu1 %vm575_vm1, %v7018_v38  ;;  %5337 = vmatprep.subr.msk.bf16.mxu0 %vm579_vm0, %v5336_v36  ;;  %v1208_v36 = vrot.slane %v7018_v38, 2 }
 0x120   : > { %1004 = vmatpush1.bf16.msra.mxu1 %v994_v39  ;;  %1031 = vmatprep.mubr.bf16.mxu1 %v6721_v1  ;;  %v6241_v39 = vld [vmem:[%s8324_s3 + $0x2ac] ss:$8 sps:$4 sm:$0xff]  }
 0x121   : > { %5288 = vmatmul.mubr.msk.bf16.vlgmr.msra.gmra.mxu0 %vm575_vm1, %v1071_v41  ;;  %1005 = vmatprep.subr.bf16.mxu1 %v6173_v40  ;;  %v1619_v40 = vrot.slane %v6941_v8, 4  ;;  %v1953_v41 = vsel %vm579_vm0, %v5435_v35, 0  ;;  %v1756_v35 = vrot.slane %v7018_v38, 4 }
 0x122   : > { %1415 = vmatpush1.bf16.msra.mxu0 %v1405_v42  ;;  %1442 = vmatprep.mubr.bf16.mxu0 %v6721_v1  ;;  %v6244_v42 = vld [vmem:[%s8324_s3 + $0x3b4] ss:$8 sps:$4 sm:$0xff]  }
 0x123   : > { %1416 = vmatprep.subr.bf16.mxu0 %v6176_v43  ;;  %v6239_v43 = vld [vmem:[%s8324_s3 + $0x2a8] ss:$8 sps:$4 sm:$0xff]  }
 0x124   : > { %1006 = vmatpush1.bf16.msra.mxu1 %v6171_v44  ;;  %v6247_v44 = vld [vmem:[%s8324_s3 + $0x29c] ss:$8 sps:$4 sm:$0xff]  }
 0x125   : > { %1007 = vmatprep.subr.bf16.mxu1 %v6179_v45  ;;  %v6242_v45 = vld [vmem:[%s8324_s3 + $0x3b0] ss:$8 sps:$4 sm:$0xff]  }
 0x126   : > { %1417 = vmatpush1.bf16.msra.mxu0 %v6174_v46  ;;  %v6250_v46 = vld [vmem:[%s8324_s3 + $0x3a4] ss:$8 sps:$4 sm:$0xff]  }
 0x127   : > { %1418 = vmatprep.subr.bf16.mxu0 %v6182_v47  ;;  %v6245_v47 = vld [vmem:[%s8324_s3 + $0x298] ss:$8 sps:$4 sm:$0xff]  }
 0x128   : > { %1008 = vmatpush1.bf16.msra.mxu1 %v6177_v48  ;;  %v6253_v48 = vld [vmem:[%s8324_s3 + $0x28c] ss:$8 sps:$4 sm:$0xff]  }
 0x129   : > { %1009 = vmatprep.subr.bf16.mxu1 %v6185_v49  ;;  %v6248_v49 = vld [vmem:[%s8324_s3 + $0x3a0] ss:$8 sps:$4 sm:$0xff]  }
 0x12a   : > { %1419 = vmatpush1.bf16.msra.mxu0 %v6180_v50  ;;  %v6256_v50 = vld [vmem:[%s8324_s3 + $0x394] ss:$8 sps:$4 sm:$0xff]  }
 0x12b   : > { %1420 = vmatprep.subr.bf16.mxu0 %v6188_v51  ;;  %v6251_v51 = vld [vmem:[%s8324_s3 + $0x288] ss:$8 sps:$4 sm:$0xff]  }
 0x12c   : > { %1010 = vmatpush1.bf16.msra.mxu1 %v6183_v52  ;;  %v6259_v52 = vld [vmem:[%s8324_s3 + $0x27c] ss:$8 sps:$4 sm:$0xff]  }
 0x12d   : > { %1011 = vmatprep.subr.bf16.mxu1 %v6191_v53  ;;  %v6254_v53 = vld [vmem:[%s8324_s3 + $0x390] ss:$8 sps:$4 sm:$0xff]  }
 0x12e   : > { %1421 = vmatpush1.bf16.msra.mxu0 %v6186_v54  ;;  %v6262_v54 = vld [vmem:[%s8324_s3 + $0x384] ss:$8 sps:$4 sm:$0xff]  }
 0x12f   : > { %1422 = vmatprep.subr.bf16.mxu0 %v6194_v55  ;;  %v6257_v55 = vld [vmem:[%s8324_s3 + $0x278] ss:$8 sps:$4 sm:$0xff]  }
 0x130   : > { %1012 = vmatpush1.bf16.msra.mxu1 %v6189_v56  ;;  %v6265_v56 = vld [vmem:[%s8324_s3 + $0x26c] ss:$8 sps:$4 sm:$0xff]  }
 0x131   : > { %1013 = vmatprep.subr.bf16.mxu1 %v6197_v57  ;;  %v6260_v57 = vld [vmem:[%s8324_s3 + $0x380] ss:$8 sps:$4 sm:$0xff]  }
 0x132   : > { %1423 = vmatpush1.bf16.msra.mxu0 %v6192_v58  ;;  %v5399_v58 = vld [vmem:[%s8324_s3 + $0x368] sm:$0xff] }
 0x133   : > { %1424 = vmatprep.subr.bf16.mxu0 %v6200_v60  ;;  %v6263_v60 = vld [vmem:[%s8324_s3 + $0x268] ss:$8 sps:$4 sm:$0xff]   ;;  %v5411_v62 = vcombine.high %v5399_v58, %v5399_v58 }
 0x134   : > { %1014 = vmatpush1.bf16.msra.mxu1 %v6195_v61  ;;  %v5474_v61 = vld [vmem:[%s8324_s3 + $0x470] sm:$0xff] }
 0x135   : > { %5312 = vmatprep.subr.msk.bf16.mxu1 %vm579_vm0, %v5311_v63  ;;  %v5410_v63 = vcombine.low %v5399_v58, %v5399_v58  ;;  %v6336_v58 = vld [vmem:[%s8324_s3 + $0x4d4] ss:$8 sps:$4 sm:$0xff]  }
 0x136   : > { %1425 = vmatpush1.bf16.msra.mxu0 %v6198_v2  ;;  %v5486_v2 = vcombine.high %v5474_v61, %v5474_v61 }
 0x137   : > { %5263 = vmatmul.mubr.msk.bf16.vlgmr.msra.gmra.mxu1 %vm575_vm1, %v934_v5  ;;  %5387 = vmatprep.subr.msk.bf16.mxu0 %vm579_vm0, %v5386_v3  ;;  %v5485_v3 = vcombine.low %v5474_v61, %v5474_v61  ;;  %v1816_v5 = vsel %vm579_vm0, %v5410_v63, 0  ;;  %v6334_v63 = vld [vmem:[%s8324_s3 + $0x4d0] ss:$8 sps:$4 sm:$0xff]  }
 0x138   : > { %1278 = vmatpush1.bf16.msra.mxu1 %v1268_v6  ;;  %1305 = vmatprep.mubr.bf16.mxu1 %v6721_v1  ;;  %v6275_v6 = vld [vmem:[%s8324_s3 + $0x35c] ss:$8 sps:$4 sm:$0xff]  }
 0x139   : > { %5338 = vmatmul.mubr.msk.bf16.vlgmr.msra.gmra.mxu0 %vm575_vm1, %v1345_v9  ;;  %1279 = vmatprep.subr.bf16.mxu1 %v6207_v7  ;;  %v1893_v7 = vrot.slane %v6941_v8, 5  ;;  %v2227_v9 = vsel %vm579_vm0, %v5485_v3, 0 }
 0x13a   : > { %1689 = vmatpush1.bf16.msra.mxu0 %v1679_v10  ;;  %1716 = vmatprep.mubr.bf16.mxu0 %v6721_v1  ;;  %v6278_v10 = vld [vmem:[%s8324_s3 + $0x464] ss:$8 sps:$4 sm:$0xff]  }
 0x13b   : > { %1690 = vmatprep.subr.bf16.mxu0 %v6210_v11  ;;  %v6273_v11 = vld [vmem:[%s8324_s3 + $0x358] ss:$8 sps:$4 sm:$0xff]  }
 0x13c   : > { %1280 = vmatpush1.bf16.msra.mxu1 %v6205_v12  ;;  %v6281_v12 = vld [vmem:[%s8324_s3 + $0x34c] ss:$8 sps:$4 sm:$0xff]  }
 0x13d   : > { %1281 = vmatprep.subr.bf16.mxu1 %v6213_v13  ;;  %v6276_v13 = vld [vmem:[%s8324_s3 + $0x460] ss:$8 sps:$4 sm:$0xff]  }
 0x13e   : > { %1691 = vmatpush1.bf16.msra.mxu0 %v6208_v14  ;;  %v6284_v14 = vld [vmem:[%s8324_s3 + $0x454] ss:$8 sps:$4 sm:$0xff]  }
 0x13f   : > { %1692 = vmatprep.subr.bf16.mxu0 %v6216_v15  ;;  %v6279_v15 = vld [vmem:[%s8324_s3 + $0x348] ss:$8 sps:$4 sm:$0xff]  }
 0x140   : > { %1282 = vmatpush1.bf16.msra.mxu1 %v6211_v16  ;;  %v6287_v16 = vld [vmem:[%s8324_s3 + $0x33c] ss:$8 sps:$4 sm:$0xff]  }
 0x141   : > { %1283 = vmatprep.subr.bf16.mxu1 %v6219_v17  ;;  %v6282_v17 = vld [vmem:[%s8324_s3 + $0x450] ss:$8 sps:$4 sm:$0xff]  }
 0x142   : > { %1693 = vmatpush1.bf16.msra.mxu0 %v6214_v18  ;;  %v6290_v18 = vld [vmem:[%s8324_s3 + $0x444] ss:$8 sps:$4 sm:$0xff]  }
 0x143   : > { %1694 = vmatprep.subr.bf16.mxu0 %v6222_v19  ;;  %v6285_v19 = vld [vmem:[%s8324_s3 + $0x338] ss:$8 sps:$4 sm:$0xff]  }
 0x144   : > { %1284 = vmatpush1.bf16.msra.mxu1 %v6217_v20  ;;  %v6293_v20 = vld [vmem:[%s8324_s3 + $0x32c] ss:$8 sps:$4 sm:$0xff]  }
 0x145   : > { %1285 = vmatprep.subr.bf16.mxu1 %v6225_v21  ;;  %v6288_v21 = vld [vmem:[%s8324_s3 + $0x440] ss:$8 sps:$4 sm:$0xff]  }
 0x146   : > { %1695 = vmatpush1.bf16.msra.mxu0 %v6220_v22  ;;  %v6296_v22 = vld [vmem:[%s8324_s3 + $0x434] ss:$8 sps:$4 sm:$0xff]  }
 0x147   : > { %1696 = vmatprep.subr.bf16.mxu0 %v6228_v23  ;;  %v6291_v23 = vld [vmem:[%s8324_s3 + $0x328] ss:$8 sps:$4 sm:$0xff]  }
 0x148   : > { %1286 = vmatpush1.bf16.msra.mxu1 %v6223_v24  ;;  %v6299_v24 = vld [vmem:[%s8324_s3 + $0x31c] ss:$8 sps:$4 sm:$0xff]  }
 0x149   : > { %1287 = vmatprep.subr.bf16.mxu1 %v6231_v25  ;;  %v6294_v25 = vld [vmem:[%s8324_s3 + $0x430] ss:$8 sps:$4 sm:$0xff]  }
 0x14a   : > { %1697 = vmatpush1.bf16.msra.mxu0 %v6226_v26  ;;  %v5449_v26 = vld [vmem:[%s8324_s3 + $0x418] sm:$0xff] }
 0x14b   : > { %1698 = vmatprep.subr.bf16.mxu0 %v6234_v28  ;;  %v6297_v28 = vld [vmem:[%s8324_s3 + $0x318] ss:$8 sps:$4 sm:$0xff]   ;;  %v5461_v30 = vcombine.high %v5449_v26, %v5449_v26 }
 0x14c   : > { %1288 = vmatpush1.bf16.msra.mxu1 %v6229_v29  ;;  %v5524_v29 = vld [vmem:[%s8324_s3 + $0x520] sm:$0xff] }
 0x14d   : > { %5362 = vmatprep.subr.msk.bf16.mxu1 %vm579_vm0, %v5361_v31  ;;  %v5460_v31 = vcombine.low %v5449_v26, %v5449_v26  ;;  %v6356_v26 = vld [vmem:[%s8324_s3 + $0x5a0] ss:$8 sps:$4 sm:$0xff]  }
 0x14e   : > { %1699 = vmatpush1.bf16.msra.mxu0 %v6232_v33  ;;  %v5536_v33 = vcombine.high %v5524_v29, %v5524_v29 }
 0x14f   : > { %5313 = vmatmul.mubr.msk.bf16.vlgmr.msra.gmra.mxu1 %vm575_vm1, %v1208_v36  ;;  %5437 = vmatprep.subr.msk.bf16.mxu0 %vm579_vm0, %v5436_v34  ;;  %v5535_v34 = vcombine.low %v5524_v29, %v5524_v29  ;;  %v2090_v36 = vsel %vm579_vm0, %v5460_v31, 0  ;;  %v6359_v29 = vld [vmem:[%s8324_s3 + $0x488] ss:$8 sps:$4 sm:$0xff]  }
 0x150   : > { %1552 = vmatpush1.bf16.msra.mxu1 %v1542_v37  ;;  %1579 = vmatprep.mubr.bf16.mxu1 %v6721_v1  ;;  %v6309_v37 = vld [vmem:[%s8324_s3 + $0x40c] ss:$8 sps:$4 sm:$0xff]  }
 0x151   : > { %5388 = vmatmul.mubr.msk.bf16.vlgmr.msra.gmra.mxu0 %vm575_vm1, %v1619_v40  ;;  %1553 = vmatprep.subr.bf16.mxu1 %v6241_v39  ;;  %v2167_v39 = vrot.slane %v6941_v8, 6  ;;  %v2501_v40 = vsel %vm579_vm0, %v5535_v34, 0  ;;  %v5549_v34 = vld [vmem:[%s8324_s3 + $0x578] sm:$0xff] }
 0x152   : > { %1963 = vmatpush1.bf16.msra.mxu0 %v1953_v41  ;;  %1990 = vmatprep.mubr.bf16.mxu0 %v6721_v1  ;;  %v6312_v41 = vld [vmem:[%s8324_s3 + $0x514] ss:$8 sps:$4 sm:$0xff]  }
 0x153   : > { %1964 = vmatprep.subr.bf16.mxu0 %v6244_v42  ;;  %v6307_v42 = vld [vmem:[%s8324_s3 + $0x408] ss:$8 sps:$4 sm:$0xff]  }
 0x154   : > { %1554 = vmatpush1.bf16.msra.mxu1 %v6239_v43  ;;  %v6315_v43 = vld [vmem:[%s8324_s3 + $0x3fc] ss:$8 sps:$4 sm:$0xff]  }
 0x155   : > { %1555 = vmatprep.subr.bf16.mxu1 %v6247_v44  ;;  %v6310_v44 = vld [vmem:[%s8324_s3 + $0x510] ss:$8 sps:$4 sm:$0xff]  }
 0x156   : > { %1965 = vmatpush1.bf16.msra.mxu0 %v6242_v45  ;;  %v6318_v45 = vld [vmem:[%s8324_s3 + $0x504] ss:$8 sps:$4 sm:$0xff]  }
 0x157   : > { %1966 = vmatprep.subr.bf16.mxu0 %v6250_v46  ;;  %v6313_v46 = vld [vmem:[%s8324_s3 + $0x3f8] ss:$8 sps:$4 sm:$0xff]  }
 0x158   : > { %1556 = vmatpush1.bf16.msra.mxu1 %v6245_v47  ;;  %v6321_v47 = vld [vmem:[%s8324_s3 + $0x3ec] ss:$8 sps:$4 sm:$0xff]  }
 0x159   : > { %1557 = vmatprep.subr.bf16.mxu1 %v6253_v48  ;;  %v6316_v48 = vld [vmem:[%s8324_s3 + $0x500] ss:$8 sps:$4 sm:$0xff]  }
 0x15a   : > { %1967 = vmatpush1.bf16.msra.mxu0 %v6248_v49  ;;  %v6324_v49 = vld [vmem:[%s8324_s3 + $0x4f4] ss:$8 sps:$4 sm:$0xff]  }
 0x15b   : > { %1968 = vmatprep.subr.bf16.mxu0 %v6256_v50  ;;  %v6319_v50 = vld [vmem:[%s8324_s3 + $0x3e8] ss:$8 sps:$4 sm:$0xff]  }
 0x15c   : > { %1558 = vmatpush1.bf16.msra.mxu1 %v6251_v51  ;;  %v6327_v51 = vld [vmem:[%s8324_s3 + $0x3dc] ss:$8 sps:$4 sm:$0xff]  }
 0x15d   : > { %1559 = vmatprep.subr.bf16.mxu1 %v6259_v52  ;;  %v6322_v52 = vld [vmem:[%s8324_s3 + $0x4f0] ss:$8 sps:$4 sm:$0xff]  }
 0x15e   : > { %1969 = vmatpush1.bf16.msra.mxu0 %v6254_v53  ;;  %v6330_v53 = vld [vmem:[%s8324_s3 + $0x4e4] ss:$8 sps:$4 sm:$0xff]  }
 0x15f   : > { %1970 = vmatprep.subr.bf16.mxu0 %v6262_v54  ;;  %v6325_v54 = vld [vmem:[%s8324_s3 + $0x3d8] ss:$8 sps:$4 sm:$0xff]  }
 0x160   : > { %1560 = vmatpush1.bf16.msra.mxu1 %v6257_v55  ;;  %v6333_v55 = vld [vmem:[%s8324_s3 + $0x3cc] ss:$8 sps:$4 sm:$0xff]  }
 0x161   : > { %1561 = vmatprep.subr.bf16.mxu1 %v6265_v56  ;;  %v6328_v56 = vld [vmem:[%s8324_s3 + $0x4e0] ss:$8 sps:$4 sm:$0xff]  }
 0x162   : > { %1971 = vmatpush1.bf16.msra.mxu0 %v6260_v57  ;;  %v5499_v57 = vld [vmem:[%s8324_s3 + $0x4c8] sm:$0xff] }
 0x163   : > { %1972 = vmatprep.subr.bf16.mxu0 %v6268_v59  ;;  %v6331_v59 = vld [vmem:[%s8324_s3 + $0x3c8] ss:$8 sps:$4 sm:$0xff]   ;;  %v5511_v61 = vcombine.high %v5499_v57, %v5499_v57 }
 0x164   : > { %1562 = vmatpush1.bf16.msra.mxu1 %v6263_v60  ;;  %v5574_v60 = vld [vmem:[%s8324_s3 + $0x5d0] sm:$0xff] }
 0x165   : > { %5412 = vmatprep.subr.msk.bf16.mxu1 %vm579_vm0, %v5411_v62  ;;  %v5510_v62 = vcombine.low %v5499_v57, %v5499_v57  ;;  %v5585_v3 = vcombine.low %v5574_v60, %v5574_v60  ;;  %v6389_v57 = vld [vmem:[%s8324_s3 + $0x54c] ss:$8 sps:$4 sm:$0xff]  }
 0x166   : > { %1973 = vmatpush1.bf16.msra.mxu0 %v6266_v0  ;;  %v6006_v0 = vpop.f32.mrf.mxu0 }
 0x167   : > { %5363 = vmatmul.mubr.msk.bf16.vlgmr.msra.gmra.mxu1 %vm575_vm1, %v1482_v4  ;;  %5487 = vmatprep.subr.msk.bf16.mxu0 %vm579_vm0, %v5486_v2  ;;  %v5586_v2 = vcombine.high %v5574_v60, %v5574_v60  ;;  %v2030_v4 = vrot.slane %v7018_v38, 5  ;;  %v6387_v60 = vld [vmem:[%s8324_s3 + $0x548] ss:$8 sps:$4 sm:$0xff]  }
 0x168   : > { %1826 = vmatpush1.bf16.msra.mxu1 %v1816_v5  ;;  %1853 = vmatprep.mubr.bf16.mxu1 %v6721_v1  ;;  %v2364_v5 = vsel %vm579_vm0, %v5510_v62, 0  ;;  %v6390_v62 = vld [vmem:[%s8324_s3 + $0x650] ss:$8 sps:$4 sm:$0xff]  }
 0x169   : > { %5438 = vmatmul.mubr.msk.bf16.vlgmr.msra.gmra.mxu0 %vm575_vm1, %v1893_v7  ;;  %1827 = vmatprep.subr.bf16.mxu1 %v6275_v6  ;;  %v6343_v6 = vld [vmem:[%s8324_s3 + $0x4bc] ss:$8 sps:$4 sm:$0xff]   ;;  %v6007_v7 = vpop.f32.mrf.mxu0 }
 0x16a   : > { %2237 = vmatpush1.bf16.msra.mxu0 %v2227_v9  ;;  %2264 = vmatprep.mubr.bf16.mxu0 %v6721_v1  ;;  %v2441_v9 = vrot.slane %v6941_v8, 7  ;;  %v6349_v8 = vld [vmem:[%s8324_s3 + $0x4ac] ss:$8 sps:$4 sm:$0xff]  }
 0x16b   : > { %2238 = vmatprep.subr.bf16.mxu0 %v6278_v10  ;;  %v2774_v10 = vsel %vm579_vm0, %v5585_v3, 0  ;;  %v6396_v3 = vld [vmem:[%s8324_s3 + $0x640] ss:$8 sps:$4 sm:$0xff]  }
 0x16c   : > { %1828 = vmatpush1.bf16.msra.mxu1 %v6273_v11  ;;  %v6346_v11 = vld [vmem:[%s8324_s3 + $0x5c4] ss:$8 sps:$4 sm:$0xff]  }
 0x16d   : > { %1829 = vmatprep.subr.bf16.mxu1 %v6281_v12  ;;  %v6341_v12 = vld [vmem:[%s8324_s3 + $0x4b8] ss:$8 sps:$4 sm:$0xff]  }
 0x16e   : > { %2239 = vmatpush1.bf16.msra.mxu0 %v6276_v13  ;;  %v6344_v13 = vld [vmem:[%s8324_s3 + $0x5c0] ss:$8 sps:$4 sm:$0xff]  }
 0x16f   : > { %2240 = vmatprep.subr.bf16.mxu0 %v6284_v14  ;;  %v6009_v14 = vpop.f32.mrf.mxu0 }
 0x170   : > { %1830 = vmatpush1.bf16.msra.mxu1 %v6279_v15  ;;  %v6352_v15 = vld [vmem:[%s8324_s3 + $0x5b4] ss:$8 sps:$4 sm:$0xff]  }
 0x171   : > { %1831 = vmatprep.subr.bf16.mxu1 %v6287_v16  ;;  %v6347_v16 = vld [vmem:[%s8324_s3 + $0x4a8] ss:$8 sps:$4 sm:$0xff]  }
 0x172   : > { %2241 = vmatpush1.bf16.msra.mxu0 %v6282_v17  ;;  %v330_v17 = vpop.permute.xlu1 %329 }
 0x173   : > { %2242 = vmatprep.subr.bf16.mxu0 %v6290_v18  ;;  %v6355_v18 = vld [vmem:[%s8324_s3 + $0x49c] ss:$8 sps:$4 sm:$0xff]  }
 0x174   : > { %1832 = vmatpush1.bf16.msra.mxu1 %v6285_v19  ;;  %v6350_v19 = vld [vmem:[%s8324_s3 + $0x5b0] ss:$8 sps:$4 sm:$0xff]  }
 0x175   : > { %1833 = vmatprep.subr.bf16.mxu1 %v6293_v20  ;;  %v6010_v20 = vpop.f32.mrf.mxu0 }
 0x176   : > { %2243 = vmatpush1.bf16.msra.mxu0 %v6288_v21  ;;  %v6358_v21 = vld [vmem:[%s8324_s3 + $0x5a4] ss:$8 sps:$4 sm:$0xff]  }
 0x177   : > { %2244 = vmatprep.subr.bf16.mxu0 %v6296_v22  ;;  %v6353_v22 = vld [vmem:[%s8324_s3 + $0x498] ss:$8 sps:$4 sm:$0xff]  }
 0x178   : > { %1834 = vmatpush1.bf16.msra.mxu1 %v6291_v23  ;;  %v6008_v23 = vadd.f32 %v6007_v7, %v6006_v0  ;;  %v6393_v0 = vld [vmem:[%s8324_s3 + $0x538] ss:$8 sps:$4 sm:$0xff]   ;;  %v5674_v7 = vld [vmem:[%s8324_s3 + $0x730] sm:$0xff] }
 0x179   : > { %1835 = vmatprep.subr.bf16.mxu1 %v6299_v24  ;;  %v6361_v24 = vld [vmem:[%s8324_s3 + $0x48c] ss:$8 sps:$4 sm:$0xff]  }
 0x17a   : > { %2245 = vmatpush1.bf16.msra.mxu0 %v6294_v25  ;;  %v6011_v25 = vadd.f32 %v6010_v20, %v6009_v14 }
 0x17b   : > { %2246 = vmatprep.subr.bf16.mxu0 %v6302_v27  ;;  %v335_v27 = vpop.permute.xlu1 %334 }
 0x17c   : > { %1836 = vmatpush1.bf16.msra.mxu1 %v6297_v28  ;;  %v6364_v28 = vld [vmem:[%s8324_s3 + $0x594] ss:$8 sps:$4 sm:$0xff]   ;;  %v499_v31 = vadd.f32 %v6011_v25, %v335_v27 }
 0x17d   : > { %5462 = vmatprep.subr.msk.bf16.mxu1 %vm579_vm0, %v5461_v30  ;;  %v496_v30 = vadd.f32 %v6008_v23, %v330_v17  ;;  %v6420_v27 = vld [vmem:[%s8324_s3 + $0x714] ss:$8 sps:$4 sm:$0xff]  }
 0x17e   : > { %2247 = vmatpush1.bf16.msra.mxu0 %v6300_v32  ;;  %v6367_v32 = vld [vmem:[%s8324_s3 + $0x47c] ss:$8 sps:$4 sm:$0xff]  }
 0x17f   : > { %5413 = vmatmul.mubr.msk.bf16.vlgmr.msra.gmra.mxu1 %vm575_vm1, %v1756_v35  ;;  %5537 = vmatprep.subr.msk.bf16.mxu0 %vm579_vm0, %v5536_v33  ;;  %v6362_v33 = vld [vmem:[%s8324_s3 + $0x590] ss:$8 sps:$4 sm:$0xff]   ;;  %v6370_v35 = vld [vmem:[%s8324_s3 + $0x584] ss:$8 sps:$4 sm:$0xff]  }
 0x180   : > { %2100 = vmatpush1.bf16.msra.mxu1 %v2090_v36  ;;  %2127 = vmatprep.mubr.bf16.mxu1 %v6721_v1  ;;  %v6365_v36 = vld [vmem:[%s8324_s3 + $0x478] ss:$8 sps:$4 sm:$0xff]  }
 0x181   : > { %5488 = vmatmul.mubr.msk.bf16.vlgmr.msra.gmra.mxu0 %vm575_vm1, %v2167_v39  ;;  %2101 = vmatprep.subr.bf16.mxu1 %v6309_v37  ;;  %v5624_v37 = vld [vmem:[%s8324_s3 + $0x680] sm:$0xff]  ;;  %v504_v39 = vmax.f32 %v496_v30, 0.0 }
 0x182   : > { %2511 = vmatpush1.bf16.msra.mxu0 %v2501_v40  ;;  %2538 = vmatprep.mubr.bf16.mxu0 %v6721_v1  ;;  %v505_v40 = vmax.f32 %v499_v31, 0.0 }
 0x183   : > { %2512 = vmatprep.subr.bf16.mxu0 %v6312_v41  ;;  %v5561_v41 = vcombine.high %v5549_v34, %v5549_v34 }
 0x184   : > { %2102 = vmatpush1.bf16.msra.mxu1 %v6307_v42  ;;  %v5560_v42 = vcombine.low %v5549_v34, %v5549_v34 }
 0x185   : > { %2103 = vmatprep.subr.bf16.mxu1 %v6315_v43  ;;  %v6368_v43 = vld [vmem:[%s8324_s3 + $0x580] ss:$8 sps:$4 sm:$0xff]  }
 0x186   : > { %2513 = vmatpush1.bf16.msra.mxu0 %v6310_v44  ;;  %v5636_v44 = vcombine.high %v5624_v37, %v5624_v37 }
 0x187   : > { %2514 = vmatprep.subr.bf16.mxu0 %v6318_v45  ;;  %v5635_v45 = vcombine.low %v5624_v37, %v5624_v37  ;;  %v6429_v37 = vld [vmem:[%s8324_s3 + $0x5ec] ss:$8 sps:$4 sm:$0xff]  }
 0x188   : > { %2104 = vmatpush1.bf16.msra.mxu1 %v6313_v46  ;;  %v7476_v46 = vpack.c.bf16 %v505_v40, %v504_v39  ;;  %v6722_v39 = vmov 1966171168  }
 0x189   : > { %2105 = vmatprep.subr.bf16.mxu1 %v6321_v47  ;;  %v2304_v47 = vrot.slane %v7018_v38, 6  ;;  %v631_v40 = vunpack.c.l.s4 %v6722_v39  ;;  %v6472_v39 = vld [vmem:[%s8324_s3 + $0x794] ss:$8 sps:$4 sm:$0xff]  }
 0x18a   : > { %2515 = vmatpush1.bf16.msra.mxu0 %v6316_v48  ;;  %v2638_v48 = vsel %vm579_vm0, %v5560_v42, 0  ;;  %v6424_v42 = vld [vmem:[%s8324_s3 + $0x700] ss:$8 sps:$4 sm:$0xff]  }
 0x18b   : > { %2516 = vmatprep.subr.bf16.mxu0 %v6324_v49  ;;  %v6377_v49 = vld [vmem:[%s8324_s3 + $0x56c] ss:$8 sps:$4 sm:$0xff]  }
 0x18c   : > { %2106 = vmatpush1.bf16.msra.mxu1 %v6319_v50  ;;  %v3050_v50 = vsel %vm579_vm0, %v5635_v45, 0  ;;  %v6435_v45 = vld [vmem:[%s8324_s3 + $0x5dc] ss:$8 sps:$4 sm:$0xff]  }
 0x18d   : > { %2107 = vmatprep.subr.bf16.mxu1 %v6327_v51  ;;  %v6380_v51 = vld [vmem:[%s8324_s3 + $0x674] ss:$8 sps:$4 sm:$0xff]  }
 0x18e   : > { %2517 = vmatpush1.bf16.msra.mxu0 %v6322_v52  ;;  %v6375_v52 = vld [vmem:[%s8324_s3 + $0x568] ss:$8 sps:$4 sm:$0xff]  }
 0x18f   : > { %2518 = vmatprep.subr.bf16.mxu0 %v6330_v53  ;;  %v6383_v53 = vld [vmem:[%s8324_s3 + $0x55c] ss:$8 sps:$4 sm:$0xff]  }
 0x190   : > { %2108 = vmatpush1.bf16.msra.mxu1 %v6325_v54  ;;  %v6378_v54 = vld [vmem:[%s8324_s3 + $0x670] ss:$8 sps:$4 sm:$0xff]  }
 0x191   : > { %2109 = vmatprep.subr.bf16.mxu1 %v6333_v55  ;;  %v6386_v55 = vld [vmem:[%s8324_s3 + $0x664] ss:$8 sps:$4 sm:$0xff]  }
 0x192   : > { %2519 = vmatpush1.bf16.msra.mxu0 %v6328_v56  ;;  %v6381_v56 = vld [vmem:[%s8324_s3 + $0x558] ss:$8 sps:$4 sm:$0xff]  }
 0x193   : > { %2520 = vmatprep.subr.bf16.mxu0 %v6336_v58  ;;  %v6384_v58 = vld [vmem:[%s8324_s3 + $0x660] ss:$8 sps:$4 sm:$0xff]  }
 0x194   : > { %2110 = vmatpush1.bf16.msra.mxu1 %v6331_v59  ;;  %v6392_v59 = vld [vmem:[%s8324_s3 + $0x654] ss:$8 sps:$4 sm:$0xff]  }
 0x195   : > { %5512 = vmatprep.subr.msk.bf16.mxu1 %vm579_vm0, %v5511_v61  ;;  %v6395_v61 = vld [vmem:[%s8324_s3 + $0x53c] ss:$8 sps:$4 sm:$0xff]  }
 0x196   : > { %2521 = vmatpush1.bf16.msra.mxu0 %v6334_v63  ;;  %v6398_v63 = vld [vmem:[%s8324_s3 + $0x644] ss:$8 sps:$4 sm:$0xff]  }
 0x197   : > { %5463 = vmatmul.mubr.msk.bf16.vlgmr.msra.gmra.mxu1 %vm575_vm1, %v2030_v4  ;;  %5587 = vmatprep.subr.msk.bf16.mxu0 %vm579_vm0, %v5586_v2  ;;  %v6401_v2 = vld [vmem:[%s8324_s3 + $0x52c] ss:$8 sps:$4 sm:$0xff]  }
 0x198   : > { %2374 = vmatpush1.bf16.msra.mxu1 %v2364_v5  ;;  %2401 = vmatprep.mubr.bf16.mxu1 %v6721_v1  ;;  %v5599_v4 = vld [vmem:[%s8324_s3 + $0x628] sm:$0xff]  ;;  %v6404_v5 = vld [vmem:[%s8324_s3 + $0x634] ss:$8 sps:$4 sm:$0xff]  }
 0x199   : > { %5538 = vmatmul.mubr.msk.bf16.vlgmr.msra.gmra.mxu0 %vm575_vm1, %v2441_v9  ;;  %2375 = vmatprep.subr.bf16.mxu1 %v6343_v6  ;;  %v6399_v6 = vld [vmem:[%s8324_s3 + $0x528] ss:$8 sps:$4 sm:$0xff]   ;;  %v5611_v9 = vcombine.high %v5599_v4, %v5599_v4 }
 0x19a   : > { %2784 = vmatpush1.bf16.msra.mxu0 %v2774_v10  ;;  %2811 = vmatprep.mubr.bf16.mxu0 %v6721_v1  ;;  %v5610_v10 = vcombine.low %v5599_v4, %v5599_v4  ;;  %v6448_v4 = vld [vmem:[%s8324_s3 + $0x7d4] ss:$8 sps:$4 sm:$0xff]  }
 0x19b   : > { %2785 = vmatprep.subr.bf16.mxu0 %v6346_v11  ;;  %v6402_v11 = vld [vmem:[%s8324_s3 + $0x630] ss:$8 sps:$4 sm:$0xff]  }
 0x19c   : > { %2376 = vmatpush1.bf16.msra.mxu1 %v6341_v12  ;;  %v5686_v12 = vcombine.high %v5674_v7, %v5674_v7  ;;  %v2912_v14 = vsel %vm579_vm0, %v5610_v10, 0 }
 0x19d   : > { %2377 = vmatprep.subr.bf16.mxu1 %v6349_v8  ;;  %v5685_v8 = vcombine.low %v5674_v7, %v5674_v7 }
 0x19e   : > { %2786 = vmatpush1.bf16.msra.mxu0 %v6344_v13  ;;  %v2578_v13 = vrot.slane %v7018_v38, 7  ;;  %v6414_v38 = vld [vmem:[%s8324_s3 + $0x724] ss:$8 sps:$4 sm:$0xff]  }
 0x19f   : > { %2787 = vmatprep.subr.bf16.mxu0 %v6352_v15  ;;  %v2990_v15 = vrot.slane %v7476_v46, 1 }
 0x1a0   : > { %2378 = vmatpush1.bf16.msra.mxu1 %v6347_v16  ;;  %v6411_v16 = vld [vmem:[%s8324_s3 + $0x61c] ss:$8 sps:$4 sm:$0xff]  }
 0x1a1   : > { %2379 = vmatprep.subr.bf16.mxu1 %v6355_v18  ;;  %v3324_v18 = vsel %vm579_vm0, %v5685_v8, 0  ;;  %v508_v8 = vld [vmem:[%s8325_s4] sm:$0x3] }
 0x1a2   : > { %2788 = vmatpush1.bf16.msra.mxu0 %v6350_v19  ;;  %v6409_v19 = vld [vmem:[%s8324_s3 + $0x618] ss:$8 sps:$4 sm:$0xff]  }
 0x1a3   : > { %2789 = vmatprep.subr.bf16.mxu0 %v6358_v21 }
 0x1a4   : > { %2380 = vmatpush1.bf16.msra.mxu1 %v6353_v22  ;;  %v6417_v22 = vld [vmem:[%s8324_s3 + $0x60c] ss:$8 sps:$4 sm:$0xff]  }
 0x1a5   : > { %2381 = vmatprep.subr.bf16.mxu1 %v6361_v24  ;;  %v6412_v24 = vld [vmem:[%s8324_s3 + $0x720] ss:$8 sps:$4 sm:$0xff]  }
 0x1a6   : > { %2790 = vmatpush1.bf16.msra.mxu0 %v6356_v26 }
 0x1a7   : > { %2791 = vmatprep.subr.bf16.mxu0 %v6364_v28 }
 0x1a8   : > { %2382 = vmatpush1.bf16.msra.mxu1 %v6359_v29  ;;  %v6415_v29 = vld [vmem:[%s8324_s3 + $0x608] ss:$8 sps:$4 sm:$0xff]  }
 0x1a9   : > { %2383 = vmatprep.subr.bf16.mxu1 %v6367_v32  ;;  %v6423_v32 = vld [vmem:[%s8324_s3 + $0x5fc] ss:$8 sps:$4 sm:$0xff]  }
 0x1aa   : > { %2792 = vmatpush1.bf16.msra.mxu0 %v6362_v33  ;;  %v6418_v33 = vld [vmem:[%s8324_s3 + $0x710] ss:$8 sps:$4 sm:$0xff]  }
 0x1ab   : > { %2793 = vmatprep.subr.bf16.mxu0 %v6370_v35  ;;  %v6426_v35 = vld [vmem:[%s8324_s3 + $0x704] ss:$8 sps:$4 sm:$0xff]  }
 0x1ac   : > { %2384 = vmatpush1.bf16.msra.mxu1 %v6365_v36  ;;  %v6421_v36 = vld [vmem:[%s8324_s3 + $0x5f8] ss:$8 sps:$4 sm:$0xff]  }
 0x1ad   : > { %5562 = vmatprep.subr.msk.bf16.mxu1 %vm579_vm0, %v5561_v41  ;;  %v633_v41 = vlaneseq }
 0x1ae   : > { %2794 = vmatpush1.bf16.msra.mxu0 %v6368_v43  ;;  %v6432_v43 = vld [vmem:[%s8324_s3 + $0x6f4] ss:$8 sps:$4 sm:$0xff]  }
 0x1af   : > { %5513 = vmatmul.mubr.msk.bf16.vlgmr.msra.gmra.mxu1 %vm575_vm1, %v2304_v47  ;;  %5637 = vmatprep.subr.msk.bf16.mxu0 %vm579_vm0, %v5636_v44  ;;  %v6427_v44 = vld [vmem:[%s8324_s3 + $0x5e8] ss:$8 sps:$4 sm:$0xff]   ;;  %v632_v47 = vunpack.c.0.s8 %v631_v40 }
 0x1b0   : > { %2648 = vmatpush1.bf16.msra.mxu1 %v2638_v48  ;;  %2675 = vmatprep.mubr.bf16.mxu1 %v6721_v1  ;;  %v7624_v48 = vshrl.u32 %v633_v41, 7  ;;  %v6467_v40 = vld [vmem:[%s8324_s3 + $0x688] ss:$8 sps:$4 sm:$0xff]  }
 0x1b1   : > { %5588 = vmatmul.mubr.msk.bf16.vlgmr.msra.gmra.mxu0 %vm575_vm1, %v7476_v46  ;;  %2649 = vmatprep.subr.bf16.mxu1 %v6377_v49  ;;  %v6430_v49 = vld [vmem:[%s8324_s3 + $0x6f0] ss:$8 sps:$4 sm:$0xff]  }
 0x1b2   : > { %3060 = vmatpush1.bf16.msra.mxu0 %v3050_v50  ;;  %3087 = vmatprep.mubr.bf16.mxu0 %v6721_v1  ;;  %v5649_v50 = vld [vmem:[%s8324_s3 + $0x6d8] sm:$0xff]  ;;  %v5774_v41 = vld [vmem:[%s8324_s3 + $0x890] sm:$0xff] }
 0x1b3   : > { %3061 = vmatprep.subr.bf16.mxu0 %v6380_v51  ;;  %v6438_v51 = vld [vmem:[%s8324_s3 + $0x6e4] ss:$8 sps:$4 sm:$0xff]  }
 0x1b4   : > { %2650 = vmatpush1.bf16.msra.mxu1 %v6375_v52  ;;  %v6433_v52 = vld [vmem:[%s8324_s3 + $0x5d8] ss:$8 sps:$4 sm:$0xff]  }
 0x1b5   : > { %2651 = vmatprep.subr.bf16.mxu1 %v6383_v53  ;;  %v5724_v53 = vld [vmem:[%s8324_s3 + $0x7e0] sm:$0xff] }
 0x1b6   : > { %3062 = vmatpush1.bf16.msra.mxu0 %v6378_v54  ;;  %v5661_v54 = vcombine.high %v5649_v50, %v5649_v50 }
 0x1b7   : > { %3063 = vmatprep.subr.bf16.mxu0 %v6386_v55  ;;  %v5660_v55 = vcombine.low %v5649_v50, %v5649_v50 }
 0x1b8   : > { %2652 = vmatpush1.bf16.msra.mxu1 %v6381_v56  ;;  %v7642_v56 = vsub.s32 %v632_v47, %v7624_v48  ;;  %v5785_v47 = vcombine.low %v5774_v41, %v5774_v41 }
 0x1b9   : > { %2653 = vmatprep.subr.bf16.mxu1 %v6389_v57  ;;  %v6436_v57 = vld [vmem:[%s8324_s3 + $0x6e0] ss:$8 sps:$4 sm:$0xff]  }
 0x1ba   : > { %3064 = vmatpush1.bf16.msra.mxu0 %v6384_v58  ;;  %v5736_v58 = vcombine.high %v5724_v53, %v5724_v53 }
 0x1bb   : > { %3065 = vmatprep.subr.bf16.mxu0 %v6392_v59  ;;  %v5735_v59 = vcombine.low %v5724_v53, %v5724_v53  ;;  %v3538_v53 = vrot.slane %v7476_v46, 3 }
 0x1bc   : > { %2654 = vmatpush1.bf16.msra.mxu1 %v6387_v60  ;;  %v7648_v60 = vshrl.u32 %v7476_v46, 16 }
 0x1bd   : > { %2655 = vmatprep.subr.bf16.mxu1 %v6395_v61  ;;  %v3187_v61 = vsel %vm579_vm0, %v5660_v55, 0  ;;  %v6482_v55 = vld [vmem:[%s8324_s3 + $0x884] ss:$8 sps:$4 sm:$0xff]  }
 0x1be   : > { %3066 = vmatpush1.bf16.msra.mxu0 %v6390_v62  ;;  %v6445_v62 = vld [vmem:[%s8324_s3 + $0x6cc] ss:$8 sps:$4 sm:$0xff]  }
 0x1bf   : > { %3067 = vmatprep.subr.bf16.mxu0 %v6398_v63 }
 0x1c0   : > { %2656 = vmatpush1.bf16.msra.mxu1 %v6393_v0 }
 0x1c1   : > { %2657 = vmatprep.subr.bf16.mxu1 %v6401_v2  ;;  %v3264_v2 = vrot.slane %v7476_v46, 2 }
 0x1c2   : > { %3068 = vmatpush1.bf16.msra.mxu0 %v6396_v3  ;;  %v3598_v3 = vsel %vm579_vm0, %v5735_v59, 0 }
 0x1c3   : > { %3069 = vmatprep.subr.bf16.mxu0 %v6404_v5  ;;  %v6443_v5 = vld [vmem:[%s8324_s3 + $0x6c8] ss:$8 sps:$4 sm:$0xff]  }
 0x1c4   : > { %2658 = vmatpush1.bf16.msra.mxu1 %v6399_v6 }
 0x1c5   : > { %5612 = vmatprep.subr.msk.bf16.mxu1 %vm579_vm0, %v5611_v9  ;;  %v6451_v9 = vld [vmem:[%s8324_s3 + $0x6bc] ss:$8 sps:$4 sm:$0xff]  }
 0x1c6   : > { %3070 = vmatpush1.bf16.msra.mxu0 %v6402_v11 }
 0x1c7   : > { %5563 = vmatmul.mubr.msk.bf16.vlgmr.msra.gmra.mxu1 %vm575_vm1, %v2578_v13  ;;  %v7562_v17 = vpop.f32.mrf.mxu1  ;;  %5687 = vmatprep.subr.msk.bf16.mxu0 %vm579_vm0, %v5686_v12  ;;  %v6446_v12 = vld [vmem:[%s8324_s3 + $0x7d0] ss:$8 sps:$4 sm:$0xff]  }
 0x1c8   : > { %2922 = vmatpush1.bf16.msra.mxu1 %v2912_v14  ;;  %2949 = vmatprep.mubr.bf16.mxu1 %v6721_v1 }
 0x1c9   : > { %v7573_v20 = vpop.f32.mrf.mxu1  ;;  %v7575_v21 = vpop.f32.mrf.mxu0  ;;  %5638 = vmatmul.mubr.msk.bf16.vlgmr.msra.gmra.mxu0 %vm575_vm1, %v2990_v15  ;;  %2923 = vmatprep.subr.bf16.mxu1 %v6411_v16  ;;  %v6454_v15 = vld [vmem:[%s8324_s3 + $0x7c4] ss:$8 sps:$4 sm:$0xff]  }
 0x1ca   : > { %v629_v23 = vcombine.low %v7562_v17, %v7573_v20  ;;  %3334 = vmatpush1.bf16.msra.mxu0 %v3324_v18  ;;  %3361 = vmatprep.mubr.bf16.mxu0 %v6721_v1 }
 0x1cb   : > { %v624_v25 = vpop.f32.mrf.mxu1  ;;  %v7587_v26 = vpop.f32.mrf.mxu0  ;;  %3335 = vmatprep.subr.bf16.mxu0 %v6414_v38  ;;  %v6449_v38 = vld [vmem:[%s8324_s3 + $0x6b8] ss:$8 sps:$4 sm:$0xff]  }
 0x1cc   : > { %v905_v28 = vcombine.low %v7575_v21, %v7587_v26  ;;  %2924 = vmatpush1.bf16.msra.mxu1 %v6409_v19  ;;  %v636_v63 = vrot.slane %v629_v23, %v7642_v56  ;;  %v6460_v26 = vld [vmem:[%s8324_s3 + $0x7b4] ss:$8 sps:$4 sm:$0xff]  }
 0x1cd   : > { %v625_v30 = vpop.f32.mrf.mxu1  ;;  %v900_v31 = vpop.f32.mrf.mxu0  ;;  %2925 = vmatprep.subr.bf16.mxu1 %v6417_v22  ;;  %v6457_v22 = vld [vmem:[%s8324_s3 + $0x6ac] ss:$8 sps:$4 sm:$0xff]  }
 0x1ce   : > { %3336 = vmatpush1.bf16.msra.mxu0 %v6412_v24  ;;  %v643_v10 = vrot.slane %v636_v63, %v7642_v56  ;;  %v912_v16 = vrot.slane %v905_v28, %v7642_v56  ;;  %v6452_v24 = vld [vmem:[%s8324_s3 + $0x7c0] ss:$8 sps:$4 sm:$0xff]   ;;  %v6463_v30 = vld [vmem:[%s8324_s3 + $0x69c] ss:$8 sps:$4 sm:$0xff]   ;;  %v6458_v31 = vld [vmem:[%s8324_s3 + $0x7b0] ss:$8 sps:$4 sm:$0xff]  }
 0x1cf   : > { %v901_v34 = vpop.f32.mrf.mxu0  ;;  %3337 = vmatprep.subr.bf16.mxu0 %v6420_v27  ;;  %v6480_v63 = vld [vmem:[%s8324_s3 + $0x880] ss:$8 sps:$4 sm:$0xff]  }
 0x1d0   : > { %2926 = vmatpush1.bf16.msra.mxu1 %v6415_v29  ;;  %v645_v23 = vadd.f32 %v643_v10, %v508_v8  ;;  %v919_v27 = vrot.slane %v912_v16, %v7642_v56  ;;  %v6455_v29 = vld [vmem:[%s8324_s3 + $0x6a8] ss:$8 sps:$4 sm:$0xff]   ;;  %v6461_v34 = vld [vmem:[%s8324_s3 + $0x698] ss:$8 sps:$4 sm:$0xff]  }
 0x1d1   : > { %2927 = vmatprep.subr.bf16.mxu1 %v6423_v32  ;;  %v6486_v8 = vld [vmem:[%s8324_s3 + $0x870] ss:$8 sps:$4 sm:$0xff]  }
 0x1d2   : > { %3338 = vmatpush1.bf16.msra.mxu0 %v6418_v33  ;;  %v6466_v33 = vld [vmem:[%s8324_s3 + $0x7a4] ss:$8 sps:$4 sm:$0xff]  }
 0x1d3   : > { %3339 = vmatprep.subr.bf16.mxu0 %v6426_v35  ;;  %v6469_v35 = vld [vmem:[%s8324_s3 + $0x68c] ss:$8 sps:$4 sm:$0xff]  }
 0x1d4   : > { %2928 = vmatpush1.bf16.msra.mxu1 %v6421_v36  ;;  %v6464_v36 = vld [vmem:[%s8324_s3 + $0x7a0] ss:$8 sps:$4 sm:$0xff]  }
 0x1d5   : > { %2929 = vmatprep.subr.bf16.mxu1 %v6429_v37  ;;  %v5699_v37 = vld [vmem:[%s8324_s3 + $0x788] sm:$0xff] }
 0x1d6   : > { %3340 = vmatpush1.bf16.msra.mxu0 %v6424_v42  ;;  %v5711_v42 = vcombine.high %v5699_v37, %v5699_v37 }
 0x1d7   : > { %3341 = vmatprep.subr.bf16.mxu0 %v6432_v43  ;;  %v5710_v43 = vcombine.low %v5699_v37, %v5699_v37  ;;  %v3812_v37 = vrot.slane %v7476_v46, 4 }
 0x1d8   : > { %2930 = vmatpush1.bf16.msra.mxu1 %v6427_v44  ;;  %v6470_v44 = vld [vmem:[%s8324_s3 + $0x790] ss:$8 sps:$4 sm:$0xff]  }
 0x1d9   : > { %2931 = vmatprep.subr.bf16.mxu1 %v6435_v45  ;;  %v5786_v45 = vcombine.high %v5774_v41, %v5774_v41  ;;  %v3461_v50 = vsel %vm579_vm0, %v5710_v43, 0  ;;  %v6511_v41 = vld [vmem:[%s8324_s3 + $0x828] ss:$8 sps:$4 sm:$0xff]  }
 0x1da   : > { %3342 = vmatpush1.bf16.msra.mxu0 %v6430_v49  ;;  %v3127_v49 = vrot.slane %v7648_v60, 1 }
 0x1db   : > { %3343 = vmatprep.subr.bf16.mxu0 %v6438_v51  ;;  %v6479_v51 = vld [vmem:[%s8324_s3 + $0x77c] ss:$8 sps:$4 sm:$0xff]  }
 0x1dc   : > { %2932 = vmatpush1.bf16.msra.mxu1 %v6433_v52 }
 0x1dd   : > { %5662 = vmatprep.subr.msk.bf16.mxu1 %vm579_vm0, %v5661_v54  ;;  %v3872_v54 = vsel %vm579_vm0, %v5785_v47, 0  ;;  %v6514_v47 = vld [vmem:[%s8324_s3 + $0x930] ss:$8 sps:$4 sm:$0xff]  }
 0x1de   : > { %3344 = vmatpush1.bf16.msra.mxu0 %v6436_v57  ;;  %v6477_v57 = vld [vmem:[%s8324_s3 + $0x778] ss:$8 sps:$4 sm:$0xff]  }
 0x1df   : > { %v758_v0 = vpop.f32.mrf.mxu1  ;;  %5613 = vmatmul.mubr.msk.bf16.vlgmr.msra.gmra.mxu1 %vm575_vm1, %v7648_v60  ;;  %5737 = vmatprep.subr.msk.bf16.mxu0 %vm579_vm0, %v5736_v58 }
 0x1e0   : > { %3197 = vmatpush1.bf16.msra.mxu1 %v3187_v61  ;;  %3224 = vmatprep.mubr.bf16.mxu1 %v6721_v1  ;;  %v6485_v61 = vld [vmem:[%s8324_s3 + $0x76c] ss:$8 sps:$4 sm:$0xff]  }
 0x1e1   : > { %v760_v6 = vpop.f32.mrf.mxu1  ;;  %v7668_v7 = vpop.f32.mrf.mxu0  ;;  %5688 = vmatmul.mubr.msk.bf16.vlgmr.msra.gmra.mxu0 %vm575_vm1, %v3264_v2  ;;  %3198 = vmatprep.subr.bf16.mxu1 %v6445_v62 }
 0x1e2   : > { %v767_v11 = vcombine.low %v758_v0, %v760_v6  ;;  %3608 = vmatpush1.bf16.msra.mxu0 %v3598_v3  ;;  %3635 = vmatprep.mubr.bf16.mxu0 %v6721_v1  ;;  %v6488_v3 = vld [vmem:[%s8324_s3 + $0x874] ss:$8 sps:$4 sm:$0xff]  }
 0x1e3   : > { %v762_v13 = vpop.f32.mrf.mxu1  ;;  %v7682_v14 = vpop.f32.mrf.mxu0  ;;  %3609 = vmatprep.subr.bf16.mxu0 %v6448_v4 }
 0x1e4   : > { %v774_v17 = vrot.slane %v767_v11, %v7642_v56  ;;  %v1179_v18 = vcombine.low %v7668_v7, %v7682_v14  ;;  %3199 = vmatpush1.bf16.msra.mxu1 %v6443_v5  ;;  %v6494_v14 = vld [vmem:[%s8324_s3 + $0x864] ss:$8 sps:$4 sm:$0xff]  }
 0x1e5   : > { %v763_v19 = vpop.f32.mrf.mxu1  ;;  %v1174_v20 = vpop.f32.mrf.mxu0  ;;  %3200 = vmatprep.subr.bf16.mxu1 %v6451_v9  ;;  %v6483_v9 = vld [vmem:[%s8324_s3 + $0x768] ss:$8 sps:$4 sm:$0xff]  }
 0x1e6   : > { %v781_v21 = vrot.slane %v774_v17, %v7642_v56  ;;  %3610 = vmatpush1.bf16.msra.mxu0 %v6446_v12  ;;  %v1186_v4 = vrot.slane %v1179_v18, %v7642_v56  ;;  %v6491_v12 = vld [vmem:[%s8324_s3 + $0x75c] ss:$8 sps:$4 sm:$0xff]   ;;  %v6489_v17 = vld [vmem:[%s8324_s3 + $0x758] ss:$8 sps:$4 sm:$0xff]   ;;  %v6497_v18 = vld [vmem:[%s8324_s3 + $0x74c] ss:$8 sps:$4 sm:$0xff]  }
 0x1e7   : > { %v1175_v25 = vpop.f32.mrf.mxu0  ;;  %3611 = vmatprep.subr.bf16.mxu0 %v6454_v15  ;;  %v6500_v20 = vld [vmem:[%s8324_s3 + $0x854] ss:$8 sps:$4 sm:$0xff]  }
 0x1e8   : > { %v783_v28 = vadd.f32 %v781_v21, %v645_v23  ;;  %3201 = vmatpush1.bf16.msra.mxu1 %v6449_v38  ;;  %v1193_v15 = vrot.slane %v1186_v4, %v7642_v56  ;;  %v6492_v38 = vld [vmem:[%s8324_s3 + $0x860] ss:$8 sps:$4 sm:$0xff]   ;;  %v6503_v23 = vld [vmem:[%s8324_s3 + $0x73c] ss:$8 sps:$4 sm:$0xff]   ;;  %v6498_v21 = vld [vmem:[%s8324_s3 + $0x850] ss:$8 sps:$4 sm:$0xff]  }
 0x1e9   : > { %3202 = vmatprep.subr.bf16.mxu1 %v6457_v22  ;;  %v6495_v22 = vld [vmem:[%s8324_s3 + $0x748] ss:$8 sps:$4 sm:$0xff]   ;;  %v6506_v25 = vld [vmem:[%s8324_s3 + $0x844] ss:$8 sps:$4 sm:$0xff]  }
 0x1ea   : > { %3612 = vmatpush1.bf16.msra.mxu0 %v6452_v24  ;;  %v7717_v32 = vadd.f32 %v919_v27, %v783_v28  ;;  %v5749_v24 = vld [vmem:[%s8324_s3 + $0x838] sm:$0xff]  ;;  %v5824_v27 = vld [vmem:[%s8324_s3 + $0x940] sm:$0xff]  ;;  %v6523_v4 = vld [vmem:[%s8324_s3 + $0x808] ss:$8 sps:$4 sm:$0xff]  }
 0x1eb   : > { %3613 = vmatprep.subr.bf16.mxu0 %v6460_v26  ;;  %v6501_v26 = vld [vmem:[%s8324_s3 + $0x738] ss:$8 sps:$4 sm:$0xff]   ;;  %v5761_v28 = vcombine.high %v5749_v24, %v5749_v24 }
 0x1ec   : > { %3203 = vmatpush1.bf16.msra.mxu1 %v6455_v29  ;;  %v5760_v29 = vcombine.low %v5749_v24, %v5749_v24  ;;  %v4086_v24 = vrot.slane %v7476_v46, 5 }
 0x1ed   : > { %3204 = vmatprep.subr.bf16.mxu1 %v6463_v30  ;;  %v6504_v30 = vld [vmem:[%s8324_s3 + $0x840] ss:$8 sps:$4 sm:$0xff]  }
 0x1ee   : > { %3614 = vmatpush1.bf16.msra.mxu0 %v6458_v31  ;;  %v5836_v31 = vcombine.high %v5824_v27, %v5824_v27 }
 0x1ef   : > { %3615 = vmatprep.subr.bf16.mxu0 %v6466_v33  ;;  %v3401_v33 = vrot.slane %v7648_v60, 2 }
 0x1f0   : > { %3205 = vmatpush1.bf16.msra.mxu1 %v6461_v34  ;;  %v3735_v34 = vsel %vm579_vm0, %v5760_v29, 0 }
 0x1f1   : > { %3206 = vmatprep.subr.bf16.mxu1 %v6469_v35  ;;  %v6513_v35 = vld [vmem:[%s8324_s3 + $0x82c] ss:$8 sps:$4 sm:$0xff]  }
 0x1f2   : > { %3616 = vmatpush1.bf16.msra.mxu0 %v6464_v36 }
 0x1f3   : > { %3617 = vmatprep.subr.bf16.mxu0 %v6472_v39 }
 0x1f4   : > { %3207 = vmatpush1.bf16.msra.mxu1 %v6467_v40  ;;  %v6516_v40 = vld [vmem:[%s8324_s3 + $0x934] ss:$8 sps:$4 sm:$0xff]  }
 0x1f5   : > { %5712 = vmatprep.subr.msk.bf16.mxu1 %vm579_vm0, %v5711_v42 }
 0x1f6   : > { %3618 = vmatpush1.bf16.msra.mxu0 %v6470_v44  ;;  %v6519_v44 = vld [vmem:[%s8324_s3 + $0x81c] ss:$8 sps:$4 sm:$0xff]  }
 0x1f7   : > { %v1033_v52 = vpop.f32.mrf.mxu1  ;;  %5663 = vmatmul.mubr.msk.bf16.vlgmr.msra.gmra.mxu1 %vm575_vm1, %v3127_v49  ;;  %5787 = vmatprep.subr.msk.bf16.mxu0 %vm579_vm0, %v5786_v45 }
 0x1f8   : > { %3471 = vmatpush1.bf16.msra.mxu1 %v3461_v50  ;;  %3498 = vmatprep.mubr.bf16.mxu1 %v6721_v1 }
 0x1f9   : > { %v1035_v58 = vpop.f32.mrf.mxu1  ;;  %v7763_v59 = vpop.f32.mrf.mxu0  ;;  %5738 = vmatmul.mubr.msk.bf16.vlgmr.msra.gmra.mxu0 %vm575_vm1, %v3538_v53  ;;  %3472 = vmatprep.subr.bf16.mxu1 %v6479_v51  ;;  %v6522_v51 = vld [vmem:[%s8324_s3 + $0x924] ss:$8 sps:$4 sm:$0xff]  }
 0x1fa   : > { %v1042_v62 = vcombine.low %v1033_v52, %v1035_v58  ;;  %3882 = vmatpush1.bf16.msra.mxu0 %v3872_v54  ;;  %3909 = vmatprep.mubr.bf16.mxu0 %v6721_v1 }
 0x1fb   : > { %v1037_v0 = vpop.f32.mrf.mxu1  ;;  %v7773_v2 = vpop.f32.mrf.mxu0  ;;  %3883 = vmatprep.subr.bf16.mxu0 %v6482_v55  ;;  %v6517_v55 = vld [vmem:[%s8324_s3 + $0x818] ss:$8 sps:$4 sm:$0xff]  }
 0x1fc   : > { %v1049_v5 = vrot.slane %v1042_v62, %v7642_v56  ;;  %v1453_v6 = vcombine.low %v7763_v59, %v7773_v2  ;;  %3473 = vmatpush1.bf16.msra.mxu1 %v6477_v57  ;;  %v6520_v62 = vld [vmem:[%s8324_s3 + $0x920] ss:$8 sps:$4 sm:$0xff]   ;;  %v6528_v0 = vld [vmem:[%s8324_s3 + $0x914] ss:$8 sps:$4 sm:$0xff]  }
 0x1fd   : > { %v1038_v10 = vpop.f32.mrf.mxu1  ;;  %v1448_v11 = vpop.f32.mrf.mxu0  ;;  %3474 = vmatprep.subr.bf16.mxu1 %v6485_v61  ;;  %v6525_v61 = vld [vmem:[%s8324_s3 + $0x80c] ss:$8 sps:$4 sm:$0xff]  }
 0x1fe   : > { %v1056_v7 = vrot.slane %v1049_v5, %v7642_v56  ;;  %3884 = vmatpush1.bf16.msra.mxu0 %v6480_v63  ;;  %v1460_v52 = vrot.slane %v1453_v6, %v7642_v56  ;;  %v6531_v5 = vld [vmem:[%s8324_s3 + $0x7fc] ss:$8 sps:$4 sm:$0xff]   ;;  %v6526_v6 = vld [vmem:[%s8324_s3 + $0x910] ss:$8 sps:$4 sm:$0xff]  }
 0x1ff   : > { %v1449_v13 = vpop.f32.mrf.mxu0  ;;  %3885 = vmatprep.subr.bf16.mxu0 %v6488_v3  ;;  %v6534_v10 = vld [vmem:[%s8324_s3 + $0x904] ss:$8 sps:$4 sm:$0xff]   ;;  %v6529_v11 = vld [vmem:[%s8324_s3 + $0x7f8] ss:$8 sps:$4 sm:$0xff]  }
 0x200   : > { %v1058_v16 = vadd.f32 %v1056_v7, %v7717_v32  ;;  %3475 = vmatpush1.bf16.msra.mxu1 %v6483_v9  ;;  %v5835_v32 = vcombine.low %v5824_v27, %v5824_v27  ;;  %v1467_v2 = vrot.slane %v1460_v52, %v7642_v56  ;;  %v6532_v7 = vld [vmem:[%s8324_s3 + $0x900] ss:$8 sps:$4 sm:$0xff]   ;;  %v6540_v13 = vld [vmem:[%s8324_s3 + $0x8f4] ss:$8 sps:$4 sm:$0xff]  }
 0x201   : > { %3476 = vmatprep.subr.bf16.mxu1 %v6491_v12  ;;  %v6537_v12 = vld [vmem:[%s8324_s3 + $0x7ec] ss:$8 sps:$4 sm:$0xff]   ;;  %v6545_v27 = vld [vmem:[%s8324_s3 + $0x8d8] ss:$8 sps:$4 sm:$0xff]  }
 0x202   : > { %3886 = vmatpush1.bf16.msra.mxu0 %v6486_v8  ;;  %v7809_v19 = vadd.f32 %v1193_v15, %v1058_v16  ;;  %v4146_v39 = vsel %vm579_vm0, %v5835_v32, 0  ;;  %v5799_v8 = vld [vmem:[%s8324_s3 + $0x8e8] sm:$0xff]  ;;  %v5874_v15 = vld [vmem:[%s8324_s3 + $0x9f0] sm:$0xff]  ;;  %v6557_v52 = vld [vmem:[%s8324_s3 + $0x8b8] ss:$8 sps:$4 sm:$0xff]  }
 0x203   : > { %3887 = vmatprep.subr.bf16.mxu0 %v6494_v14  ;;  %v6535_v14 = vld [vmem:[%s8324_s3 + $0x7e8] ss:$8 sps:$4 sm:$0xff]   ;;  %v5811_v16 = vcombine.high %v5799_v8, %v5799_v8 }
 0x204   : > { %3477 = vmatpush1.bf16.msra.mxu1 %v6489_v17  ;;  %v5810_v17 = vcombine.low %v5799_v8, %v5799_v8  ;;  %v6548_v32 = vld [vmem:[%s8324_s3 + $0x9e0] ss:$8 sps:$4 sm:$0xff]   ;;  %v4360_v8 = vrot.slane %v7476_v46, 6 }
 0x205   : > { %3478 = vmatprep.subr.bf16.mxu1 %v6497_v18  ;;  %v6538_v18 = vld [vmem:[%s8324_s3 + $0x8f0] ss:$8 sps:$4 sm:$0xff]  }
 0x206   : > { %3888 = vmatpush1.bf16.msra.mxu0 %v6492_v38  ;;  %v5886_v38 = vcombine.high %v5874_v15, %v5874_v15 }
 0x207   : > { %3889 = vmatprep.subr.bf16.mxu0 %v6500_v20  ;;  %v3675_v20 = vrot.slane %v7648_v60, 3 }
 0x208   : > { %3479 = vmatpush1.bf16.msra.mxu1 %v6495_v22  ;;  %v4009_v22 = vsel %vm579_vm0, %v5810_v17, 0 }
 0x209   : > { %3480 = vmatprep.subr.bf16.mxu1 %v6503_v23  ;;  %v6547_v23 = vld [vmem:[%s8324_s3 + $0x8dc] ss:$8 sps:$4 sm:$0xff]  }
 0x20a   : > { %3890 = vmatpush1.bf16.msra.mxu0 %v6498_v21 }
 0x20b   : > { %3891 = vmatprep.subr.bf16.mxu0 %v6506_v25 }
 0x20c   : > { %3481 = vmatpush1.bf16.msra.mxu1 %v6501_v26  ;;  %v6550_v26 = vld [vmem:[%s8324_s3 + $0x9e4] ss:$8 sps:$4 sm:$0xff]  }
 0x20d   : > { %5762 = vmatprep.subr.msk.bf16.mxu1 %vm579_vm0, %v5761_v28 }
 0x20e   : > { %3892 = vmatpush1.bf16.msra.mxu0 %v6504_v30  ;;  %v6553_v30 = vld [vmem:[%s8324_s3 + $0x8cc] ss:$8 sps:$4 sm:$0xff]  }
 0x20f   : > { %v1307_v36 = vpop.f32.mrf.mxu1  ;;  %5713 = vmatmul.mubr.msk.bf16.vlgmr.msra.gmra.mxu1 %vm575_vm1, %v3401_v33  ;;  %5837 = vmatprep.subr.msk.bf16.mxu0 %vm579_vm0, %v5836_v31 }
 0x210   : > { %3745 = vmatpush1.bf16.msra.mxu1 %v3735_v34  ;;  %3772 = vmatprep.mubr.bf16.mxu1 %v6721_v1 }
 0x211   : > { %v1309_v42 = vpop.f32.mrf.mxu1  ;;  %v7855_v43 = vpop.f32.mrf.mxu0  ;;  %5788 = vmatmul.mubr.msk.bf16.vlgmr.msra.gmra.mxu0 %vm575_vm1, %v3812_v37  ;;  %3746 = vmatprep.subr.bf16.mxu1 %v6513_v35  ;;  %v6556_v35 = vld [vmem:[%s8324_s3 + $0x9d4] ss:$8 sps:$4 sm:$0xff]  }
 0x212   : > { %v1316_v45 = vcombine.low %v1307_v36, %v1309_v42  ;;  %4156 = vmatpush1.bf16.msra.mxu0 %v4146_v39  ;;  %4183 = vmatprep.mubr.bf16.mxu0 %v6721_v1 }
 0x213   : > { %v1311_v49 = vpop.f32.mrf.mxu1  ;;  %v7865_v50 = vpop.f32.mrf.mxu0  ;;  %4157 = vmatprep.subr.bf16.mxu0 %v6516_v40  ;;  %v6551_v40 = vld [vmem:[%s8324_s3 + $0x8c8] ss:$8 sps:$4 sm:$0xff]  }
 0x214   : > { %v1323_v53 = vrot.slane %v1316_v45, %v7642_v56  ;;  %v1727_v54 = vcombine.low %v7855_v43, %v7865_v50  ;;  %3747 = vmatpush1.bf16.msra.mxu1 %v6511_v41  ;;  %v6554_v45 = vld [vmem:[%s8324_s3 + $0x9d0] ss:$8 sps:$4 sm:$0xff]   ;;  %v6562_v49 = vld [vmem:[%s8324_s3 + $0x9c4] ss:$8 sps:$4 sm:$0xff]  }
 0x215   : > { %v1312_v57 = vpop.f32.mrf.mxu1  ;;  %v1722_v58 = vpop.f32.mrf.mxu0  ;;  %3748 = vmatprep.subr.bf16.mxu1 %v6519_v44  ;;  %v6559_v44 = vld [vmem:[%s8324_s3 + $0x8bc] ss:$8 sps:$4 sm:$0xff]  }
 0x216   : > { %v1330_v59 = vrot.slane %v1323_v53, %v7642_v56  ;;  %4158 = vmatpush1.bf16.msra.mxu0 %v6514_v47  ;;  %v1734_v36 = vrot.slane %v1727_v54, %v7642_v56  ;;  %v6565_v53 = vld [vmem:[%s8324_s3 + $0x8ac] ss:$8 sps:$4 sm:$0xff]   ;;  %v6560_v54 = vld [vmem:[%s8324_s3 + $0x9c0] ss:$8 sps:$4 sm:$0xff]  }
 0x217   : > { %v1723_v63 = vpop.f32.mrf.mxu0  ;;  %4159 = vmatprep.subr.bf16.mxu0 %v6522_v51  ;;  %v6568_v57 = vld [vmem:[%s8324_s3 + $0x9b4] ss:$8 sps:$4 sm:$0xff]   ;;  %v6563_v58 = vld [vmem:[%s8324_s3 + $0x8a8] ss:$8 sps:$4 sm:$0xff]  }
 0x218   : > { %v1332_v3 = vadd.f32 %v1330_v59, %v7809_v19  ;;  %3749 = vmatpush1.bf16.msra.mxu1 %v6517_v55  ;;  %v5885_v19 = vcombine.low %v5874_v15, %v5874_v15  ;;  %v1741_v50 = vrot.slane %v1734_v36, %v7642_v56  ;;  %v6566_v59 = vld [vmem:[%s8324_s3 + $0x9b0] ss:$8 sps:$4 sm:$0xff]   ;;  %v6574_v63 = vld [vmem:[%s8324_s3 + $0x9a4] ss:$8 sps:$4 sm:$0xff]  }
 0x219   : > { %3750 = vmatprep.subr.bf16.mxu1 %v6525_v61  ;;  %v6571_v61 = vld [vmem:[%s8324_s3 + $0x89c] ss:$8 sps:$4 sm:$0xff]   ;;  %v6579_v15 = vld [vmem:[%s8324_s3 + $0x988] ss:$8 sps:$4 sm:$0xff]  }
 0x21a   : > { %4160 = vmatpush1.bf16.msra.mxu0 %v6520_v62  ;;  %v7901_v9 = vadd.f32 %v1467_v2, %v1332_v3  ;;  %v4420_v25 = vsel %vm579_vm0, %v5885_v19, 0  ;;  %v5849_v62 = vld [vmem:[%s8324_s3 + $0x998] sm:$0xff]  ;;  %v5924_v2 = vld [vmem:[%s8324_s3 + $0xaa0] sm:$0xff]  ;;  %v6591_v36 = vld [vmem:[%s8324_s3 + $0x968] ss:$8 sps:$4 sm:$0xff]  }
 0x21b   : > { %4161 = vmatprep.subr.bf16.mxu0 %v6528_v0  ;;  %v6569_v0 = vld [vmem:[%s8324_s3 + $0x898] ss:$8 sps:$4 sm:$0xff]   ;;  %v5861_v3 = vcombine.high %v5849_v62, %v5849_v62 }
 0x21c   : > { %3751 = vmatpush1.bf16.msra.mxu1 %v6523_v4  ;;  %v5860_v4 = vcombine.low %v5849_v62, %v5849_v62  ;;  %v6582_v19 = vld [vmem:[%s8324_s3 + $0xa90] ss:$8 sps:$4 sm:$0xff]  }
 0x21d   : > { %3752 = vmatprep.subr.bf16.mxu1 %v6531_v5  ;;  %v6572_v5 = vld [vmem:[%s8324_s3 + $0x9a0] ss:$8 sps:$4 sm:$0xff]  }
 0x21e   : > { %4162 = vmatpush1.bf16.msra.mxu0 %v6526_v6  ;;  %v5936_v6 = vcombine.high %v5924_v2, %v5924_v2 }
 0x21f   : > { %4163 = vmatprep.subr.bf16.mxu0 %v6534_v10  ;;  %v3949_v10 = vrot.slane %v7648_v60, 4 }
 0x220   : > { %3753 = vmatpush1.bf16.msra.mxu1 %v6529_v11  ;;  %v4283_v11 = vsel %vm579_vm0, %v5860_v4, 0 }
 0x221   : > { %3754 = vmatprep.subr.bf16.mxu1 %v6537_v12  ;;  %v6581_v12 = vld [vmem:[%s8324_s3 + $0x98c] ss:$8 sps:$4 sm:$0xff]  }
 0x222   : > { %4164 = vmatpush1.bf16.msra.mxu0 %v6532_v7 }
 0x223   : > { %4165 = vmatprep.subr.bf16.mxu0 %v6540_v13 }
 0x224   : > { %3755 = vmatpush1.bf16.msra.mxu1 %v6535_v14  ;;  %v6584_v14 = vld [vmem:[%s8324_s3 + $0xa94] ss:$8 sps:$4 sm:$0xff]  }
 0x225   : > { %5812 = vmatprep.subr.msk.bf16.mxu1 %vm579_vm0, %v5811_v16 }
 0x226   : > { %4166 = vmatpush1.bf16.msra.mxu0 %v6538_v18  ;;  %v6587_v18 = vld [vmem:[%s8324_s3 + $0x97c] ss:$8 sps:$4 sm:$0xff]  }
 0x227   : > { %v1581_v21 = vpop.f32.mrf.mxu1  ;;  %5763 = vmatmul.mubr.msk.bf16.vlgmr.msra.gmra.mxu1 %vm575_vm1, %v3675_v20  ;;  %5887 = vmatprep.subr.msk.bf16.mxu0 %vm579_vm0, %v5886_v38 }
 0x228   : > { %4019 = vmatpush1.bf16.msra.mxu1 %v4009_v22  ;;  %4046 = vmatprep.mubr.bf16.mxu1 %v6721_v1 }
 0x229   : > { %v1583_v28 = vpop.f32.mrf.mxu1  ;;  %v7947_v29 = vpop.f32.mrf.mxu0  ;;  %5838 = vmatmul.mubr.msk.bf16.vlgmr.msra.gmra.mxu0 %vm575_vm1, %v4086_v24  ;;  %4020 = vmatprep.subr.bf16.mxu1 %v6547_v23  ;;  %v6590_v23 = vld [vmem:[%s8324_s3 + $0xa84] ss:$8 sps:$4 sm:$0xff]  }
 0x22a   : > { %v1590_v31 = vcombine.low %v1581_v21, %v1583_v28  ;;  %4430 = vmatpush1.bf16.msra.mxu0 %v4420_v25  ;;  %4457 = vmatprep.mubr.bf16.mxu0 %v6721_v1 }
 0x22b   : > { %v1585_v33 = vpop.f32.mrf.mxu1  ;;  %v7957_v34 = vpop.f32.mrf.mxu0  ;;  %4431 = vmatprep.subr.bf16.mxu0 %v6550_v26  ;;  %v6585_v26 = vld [vmem:[%s8324_s3 + $0x978] ss:$8 sps:$4 sm:$0xff]  }
 0x22c   : > { %v1597_v37 = vrot.slane %v1590_v31, %v7642_v56  ;;  %v2001_v39 = vcombine.low %v7947_v29, %v7957_v34  ;;  %4021 = vmatpush1.bf16.msra.mxu1 %v6545_v27  ;;  %v6588_v31 = vld [vmem:[%s8324_s3 + $0xa80] ss:$8 sps:$4 sm:$0xff]   ;;  %v6596_v33 = vld [vmem:[%s8324_s3 + $0xa74] ss:$8 sps:$4 sm:$0xff]  }
 0x22d   : > { %v1586_v41 = vpop.f32.mrf.mxu1  ;;  %v1996_v42 = vpop.f32.mrf.mxu0  ;;  %4022 = vmatprep.subr.bf16.mxu1 %v6553_v30  ;;  %v6593_v30 = vld [vmem:[%s8324_s3 + $0x96c] ss:$8 sps:$4 sm:$0xff]  }
 0x22e   : > { %v1604_v43 = vrot.slane %v1597_v37, %v7642_v56  ;;  %4432 = vmatpush1.bf16.msra.mxu0 %v6548_v32  ;;  %v2008_v21 = vrot.slane %v2001_v39, %v7642_v56  ;;  %v6599_v37 = vld [vmem:[%s8324_s3 + $0x95c] ss:$8 sps:$4 sm:$0xff]   ;;  %v6594_v39 = vld [vmem:[%s8324_s3 + $0xa70] ss:$8 sps:$4 sm:$0xff]  }
 0x22f   : > { %v1997_v47 = vpop.f32.mrf.mxu0  ;;  %4433 = vmatprep.subr.bf16.mxu0 %v6556_v35  ;;  %v6602_v41 = vld [vmem:[%s8324_s3 + $0xa64] ss:$8 sps:$4 sm:$0xff]   ;;  %v6597_v42 = vld [vmem:[%s8324_s3 + $0x958] ss:$8 sps:$4 sm:$0xff]  }
 0x230   : > { %v1606_v51 = vadd.f32 %v1604_v43, %v7901_v9  ;;  %4023 = vmatpush1.bf16.msra.mxu1 %v6551_v40  ;;  %v5935_v9 = vcombine.low %v5924_v2, %v5924_v2  ;;  %v2015_v34 = vrot.slane %v2008_v21, %v7642_v56  ;;  %v6600_v43 = vld [vmem:[%s8324_s3 + $0xa60] ss:$8 sps:$4 sm:$0xff]   ;;  %v6608_v47 = vld [vmem:[%s8324_s3 + $0xa54] ss:$8 sps:$4 sm:$0xff]  }
 0x231   : > { %4024 = vmatprep.subr.bf16.mxu1 %v6559_v44  ;;  %v6605_v44 = vld [vmem:[%s8324_s3 + $0x94c] ss:$8 sps:$4 sm:$0xff]  }
 0x232   : > { %4434 = vmatpush1.bf16.msra.mxu0 %v6554_v45  ;;  %v7993_v55 = vadd.f32 %v1741_v50, %v1606_v51  ;;  %v4694_v13 = vsel %vm579_vm0, %v5935_v9, 0  ;;  %v5899_v45 = vld [vmem:[%s8324_s3 + $0xa48] sm:$0xff] }
 0x233   : > { %4435 = vmatprep.subr.bf16.mxu0 %v6562_v49  ;;  %v6603_v49 = vld [vmem:[%s8324_s3 + $0x948] ss:$8 sps:$4 sm:$0xff]   ;;  %v5911_v50 = vcombine.high %v5899_v45, %v5899_v45  ;;  %v5910_v51 = vcombine.low %v5899_v45, %v5899_v45  ;;  %v6639_v45 = vld [vmem:[%s8324_s3 + $0xabc] ss:$8 sps:$4 sm:$0xff]  }
 0x234   : > { %4025 = vmatpush1.bf16.msra.mxu1 %v6557_v52  ;;  %v6606_v52 = vld [vmem:[%s8324_s3 + $0xa50] ss:$8 sps:$4 sm:$0xff]  }
 0x235   : > { %4026 = vmatprep.subr.bf16.mxu1 %v6565_v53  ;;  %v4223_v53 = vrot.slane %v7648_v60, 5 }
 0x236   : > { %4436 = vmatpush1.bf16.msra.mxu0 %v6560_v54  ;;  %v4557_v54 = vsel %vm579_vm0, %v5910_v51, 0  ;;  %v6640_v51 = vld [vmem:[%s8324_s3 + $0xaa8] ss:$8 sps:$4 sm:$0xff]  }
 0x237   : > { %4437 = vmatprep.subr.bf16.mxu0 %v6568_v57 }
 0x238   : > { %4027 = vmatpush1.bf16.msra.mxu1 %v6563_v58  ;;  %v4634_v58 = vrot.slane %v7476_v46, 7 }
 0x239   : > { %4028 = vmatprep.subr.bf16.mxu1 %v6571_v61  ;;  %v6611_v61 = vld [vmem:[%s8324_s3 + $0xa38] ss:$8 sps:$4 sm:$0xff]  }
 0x23a   : > { %4438 = vmatpush1.bf16.msra.mxu0 %v6566_v59 }
 0x23b   : > { %4439 = vmatprep.subr.bf16.mxu0 %v6574_v63  ;;  %v6616_v63 = vld [vmem:[%s8324_s3 + $0xa2c] ss:$8 sps:$4 sm:$0xff]  }
 0x23c   : > { %4029 = vmatpush1.bf16.msra.mxu1 %v6569_v0 }
 0x23d   : > { %5862 = vmatprep.subr.msk.bf16.mxu1 %vm579_vm0, %v5861_v3 }
 0x23e   : > { %4440 = vmatpush1.bf16.msra.mxu0 %v6572_v5 }
 0x23f   : > { %v1855_v7 = vpop.f32.mrf.mxu1  ;;  %5813 = vmatmul.mubr.msk.bf16.vlgmr.msra.gmra.mxu1 %vm575_vm1, %v3949_v10  ;;  %5937 = vmatprep.subr.msk.bf16.mxu0 %vm579_vm0, %v5936_v6  ;;  %v6614_v6 = vld [vmem:[%s8324_s3 + $0xa28] ss:$8 sps:$4 sm:$0xff]  }
 0x240   : > { %4293 = vmatpush1.bf16.msra.mxu1 %v4283_v11  ;;  %4320 = vmatprep.mubr.bf16.mxu1 %v6721_v1  ;;  %v6619_v11 = vld [vmem:[%s8324_s3 + $0xa1c] ss:$8 sps:$4 sm:$0xff]  }
 0x241   : > { %v1857_v16 = vpop.f32.mrf.mxu1  ;;  %v8039_v17 = vpop.f32.mrf.mxu0  ;;  %5888 = vmatmul.mubr.msk.bf16.vlgmr.msra.gmra.mxu0 %vm575_vm1, %v4360_v8  ;;  %4294 = vmatprep.subr.bf16.mxu1 %v6581_v12 }
 0x242   : > { %v1864_v38 = vcombine.low %v1855_v7, %v1857_v16  ;;  %4704 = vmatpush1.bf16.msra.mxu0 %v4694_v13  ;;  %4731 = vmatprep.mubr.bf16.mxu0 %v6721_v1 }
 0x243   : > { %v1859_v20 = vpop.f32.mrf.mxu1  ;;  %v8049_v22 = vpop.f32.mrf.mxu0  ;;  %4705 = vmatprep.subr.bf16.mxu0 %v6584_v14  ;;  %v6617_v14 = vld [vmem:[%s8324_s3 + $0xa18] ss:$8 sps:$4 sm:$0xff]  }
 0x244   : > { %v1871_v24 = vrot.slane %v1864_v38, %v7642_v56  ;;  %v2275_v25 = vcombine.low %v8039_v17, %v8049_v22  ;;  %4295 = vmatpush1.bf16.msra.mxu1 %v6579_v15  ;;  %v6622_v15 = vld [vmem:[%s8324_s3 + $0xa0c] ss:$8 sps:$4 sm:$0xff]   ;;  %v6620_v17 = vld [vmem:[%s8324_s3 + $0xa08] ss:$8 sps:$4 sm:$0xff]   ;;  %v5949_v38 = vld [vmem:[%s8324_s3 + $0xaf8] sm:$0xff] }
 0x245   : > { %v1860_v27 = vpop.f32.mrf.mxu1  ;;  %v2270_v28 = vpop.f32.mrf.mxu0  ;;  %4296 = vmatprep.subr.bf16.mxu1 %v6587_v18  ;;  %v6625_v18 = vld [vmem:[%s8324_s3 + $0x9fc] ss:$8 sps:$4 sm:$0xff]   ;;  %v5961_v20 = vcombine.high %v5949_v38, %v5949_v38  ;;  %v5960_v22 = vcombine.low %v5949_v38, %v5949_v38 }
 0x246   : > { %v1878_v29 = vrot.slane %v1871_v24, %v7642_v56  ;;  %4706 = vmatpush1.bf16.msra.mxu0 %v6582_v19  ;;  %v2282_v46 = vrot.slane %v2275_v25, %v7642_v56  ;;  %v6623_v19 = vld [vmem:[%s8324_s3 + $0x9f8] ss:$8 sps:$4 sm:$0xff]   ;;  %v6630_v24 = vld [vmem:[%s8324_s3 + $0xaec] ss:$8 sps:$4 sm:$0xff]   ;;  %v6633_v28 = vld [vmem:[%s8324_s3 + $0xadc] ss:$8 sps:$4 sm:$0xff]  }
 0x247   : > { %v2271_v32 = vpop.f32.mrf.mxu0  ;;  %4707 = vmatprep.subr.bf16.mxu0 %v6590_v23  ;;  %v4497_v23 = vrot.slane %v7648_v60, 6  ;;  %v4831_v21 = vsel %vm579_vm0, %v5960_v22, 0 }
 0x248   : > { %v1880_v35 = vadd.f32 %v1878_v29, %v7993_v55  ;;  %4297 = vmatpush1.bf16.msra.mxu1 %v6585_v26  ;;  %v6613_v55 = vld [vmem:[%s8324_s3 + $0xa3c] ss:$8 sps:$4 sm:$0xff]   ;;  %v2289_v8 = vrot.slane %v2282_v46, %v7642_v56  ;;  %v6628_v26 = vld [vmem:[%s8324_s3 + $0xae8] ss:$8 sps:$4 sm:$0xff]  }
 0x249   : > { %4298 = vmatprep.subr.bf16.mxu1 %v6593_v30 }
 0x24a   : > { %4708 = vmatpush1.bf16.msra.mxu0 %v6588_v31  ;;  %v2017_v40 = vadd.f32 %v2015_v34, %v1880_v35  ;;  %v6631_v35 = vld [vmem:[%s8324_s3 + $0xad8] ss:$8 sps:$4 sm:$0xff]  }
 0x24b   : > { %4709 = vmatprep.subr.bf16.mxu0 %v6596_v33 }
 0x24c   : > { %4299 = vmatpush1.bf16.msra.mxu1 %v6591_v36 }
 0x24d   : > { %4300 = vmatprep.subr.bf16.mxu1 %v6599_v37  ;;  %v6636_v37 = vld [vmem:[%s8324_s3 + $0xacc] ss:$8 sps:$4 sm:$0xff]  }
 0x24e   : > { %4710 = vmatpush1.bf16.msra.mxu0 %v6594_v39 }
 0x24f   : > { %4711 = vmatprep.subr.bf16.mxu0 %v6602_v41 }
 0x250   : > { %4301 = vmatpush1.bf16.msra.mxu1 %v6597_v42 }
 0x251   : > { %4302 = vmatprep.subr.bf16.mxu1 %v6605_v44 }
 0x252   : > { %4712 = vmatpush1.bf16.msra.mxu0 %v6600_v43  ;;  %v6634_v43 = vld [vmem:[%s8324_s3 + $0xac8] ss:$8 sps:$4 sm:$0xff]  }
 0x253   : > { %4713 = vmatprep.subr.bf16.mxu0 %v6608_v47 }
 0x254   : > { %4303 = vmatpush1.bf16.msra.mxu1 %v6603_v49  ;;  %v6637_v49 = vld [vmem:[%s8324_s3 + $0xab8] ss:$8 sps:$4 sm:$0xff]  }
 0x255   : > { %5912 = vmatprep.subr.msk.bf16.mxu1 %vm579_vm0, %v5911_v50  ;;  %v6642_v50 = vld [vmem:[%s8324_s3 + $0xaac] ss:$8 sps:$4 sm:$0xff]  }
 0x256   : > { %4714 = vmatpush1.bf16.msra.mxu0 %v6606_v52  ;;  %v4771_v52 = vrot.slane %v7648_v60, 7 }
 0x257   : > { %v2129_v57 = vpop.f32.mrf.mxu1  ;;  %5863 = vmatmul.mubr.msk.bf16.vlgmr.msra.gmra.mxu1 %vm575_vm1, %v4223_v53 }
 0x258   : > { %4567 = vmatpush1.bf16.msra.mxu1 %v4557_v54  ;;  %4594 = vmatprep.mubr.bf16.mxu1 %v6721_v1 }
 0x259   : > { %v2131_v59 = vpop.f32.mrf.mxu1  ;;  %v2540_v62 = vpop.f32.mrf.mxu0  ;;  %5938 = vmatmul.mubr.msk.bf16.vlgmr.msra.gmra.mxu0 %vm575_vm1, %v4634_v58  ;;  %4568 = vmatprep.subr.bf16.mxu1 %v6613_v55 }
 0x25a   : > { %v2138_v0 = vcombine.low %v2129_v57, %v2131_v59 }
 0x25b   : > { %v2133_v2 = vpop.f32.mrf.mxu1  ;;  %v2542_v3 = vpop.f32.mrf.mxu0 }
 0x25c   : > { %v2145_v4 = vrot.slane %v2138_v0, %v7642_v56  ;;  %v2549_v5 = vcombine.low %v2540_v62, %v2542_v3  ;;  %4569 = vmatpush1.bf16.msra.mxu1 %v6611_v61 }
 0x25d   : > { %v2134_v9 = vpop.f32.mrf.mxu1  ;;  %v2544_v10 = vpop.f32.mrf.mxu0  ;;  %4570 = vmatprep.subr.bf16.mxu1 %v6616_v63 }
 0x25e   : > { %v2152_v12 = vrot.slane %v2145_v4, %v7642_v56  ;;  %v2556_v33 = vrot.slane %v2549_v5, %v7642_v56 }
 0x25f   : > { %v2545_v7 = vpop.f32.mrf.mxu0 }
 0x260   : > { %v2154_v13 = vadd.f32 %v2152_v12, %v2017_v40  ;;  %4571 = vmatpush1.bf16.msra.mxu1 %v6614_v6  ;;  %v2563_v42 = vrot.slane %v2556_v33, %v7642_v56 }
 0x261   : > { %4572 = vmatprep.subr.bf16.mxu1 %v6619_v11 }
 0x262   : > { %v2291_v16 = vadd.f32 %v2289_v8, %v2154_v13 }
 0x264   : > { %4573 = vmatpush1.bf16.msra.mxu1 %v6617_v14 }
 0x265   : > { %4574 = vmatprep.subr.bf16.mxu1 %v6622_v15 }
 0x268   : > { %4575 = vmatpush1.bf16.msra.mxu1 %v6620_v17 }
 0x269   : > { %4576 = vmatprep.subr.bf16.mxu1 %v6625_v18 }
 0x26c   : > { %4577 = vmatpush1.bf16.msra.mxu1 %v6623_v19 }
 0x26d   : > { %5962 = vmatprep.subr.msk.bf16.mxu1 %vm579_vm0, %v5961_v20 }
 0x26f   : > { %v2403_v25 = vpop.f32.mrf.mxu1  ;;  %5913 = vmatmul.mubr.msk.bf16.vlgmr.msra.gmra.mxu1 %vm575_vm1, %v4497_v23  ;;  %v6643_v23 = vld [vmem:[%s8326_s5 + $0x78] sm:$0xff]  }
 0x270   : > { %4841 = vmatpush1.bf16.msra.mxu1 %v4831_v21  ;;  %4868 = vmatprep.mubr.bf16.mxu1 %v6721_v1  ;;  %v6644_v21 = vld [vmem:[%s8326_s5 + $0x38] sm:$0xff]  }
 0x271   : > { %v2405_v27 = vpop.f32.mrf.mxu1  ;;  %4842 = vmatprep.subr.bf16.mxu1 %v6630_v24  ;;  %v2813_v30 = vpop.f32.mrf.mxu0  ;;  %v6645_v24 = vld [vmem:[%s8326_s5 + $0x70] sm:$0xff]   ;;  %6012 = vmatprep.subr.bf16.mxu0 %v6643_v23 }
 0x272   : > { %v2412_v29 = vcombine.low %v2403_v25, %v2405_v27  ;;  %6013 = vmatpush3.bf16.msra.mxu0 %v6644_v21 }
 0x273   : > { %v2407_v31 = vpop.f32.mrf.mxu1  ;;  %v2815_v32 = vpop.f32.mrf.mxu0  ;;  %6014 = vmatprep.subr.bf16.mxu0 %v6645_v24 }
 0x274   : > { %v2419_v34 = vrot.slane %v2412_v29, %v7642_v56  ;;  %4843 = vmatpush1.bf16.msra.mxu1 %v6628_v26  ;;  %v2822_v1 = vcombine.low %v2813_v30, %v2815_v32  ;;  %v6647_v31 = vld [vmem:[%s8326_s5 + $0x68] sm:$0xff]  }
 0x275   : > { %v2408_v36 = vpop.f32.mrf.mxu1  ;;  %4844 = vmatprep.subr.bf16.mxu1 %v6633_v28  ;;  %v2817_v39 = vpop.f32.mrf.mxu0  ;;  %v6646_v28 = vld [vmem:[%s8326_s5 + $0x30] sm:$0xff]  }
 0x276   : > { %v2426_v40 = vrot.slane %v2419_v34, %v7642_v56  ;;  %v2829_v58 = vrot.slane %v2822_v1, %v7642_v56  ;;  %6015 = vmatpush3.bf16.msra.mxu0 %v6646_v28 }
 0x277   : > { %v2818_v41 = vpop.f32.mrf.mxu0  ;;  %6016 = vmatprep.subr.bf16.mxu0 %v6647_v31 }
 0x278   : > { %v2428_v44 = vadd.f32 %v2426_v40, %v2291_v16  ;;  %4845 = vmatpush1.bf16.msra.mxu1 %v6631_v35  ;;  %v2836_v46 = vrot.slane %v2829_v58, %v7642_v56  ;;  %v6649_v40 = vld [vmem:[%s8326_s5 + $0x60] sm:$0xff]  }
 0x279   : > { %4846 = vmatprep.subr.bf16.mxu1 %v6636_v37  ;;  %v6648_v37 = vld [vmem:[%s8326_s5 + $0x28] sm:$0xff]  }
 0x27a   : > { %v2565_v47 = vadd.f32 %v2563_v42, %v2428_v44  ;;  %6017 = vmatpush3.bf16.msra.mxu0 %v6648_v37 }
 0x27b   : > { %6018 = vmatprep.subr.bf16.mxu0 %v6649_v40 }
 0x27c   : > { %4847 = vmatpush1.bf16.msra.mxu1 %v6634_v43  ;;  %v6650_v43 = vld [vmem:[%s8326_s5 + $0x20] sm:$0xff]  }
 0x27d   : > { %4848 = vmatprep.subr.bf16.mxu1 %v6639_v45  ;;  %v6651_v45 = vld [vmem:[%s8326_s5 + $0x58] sm:$0xff]  }
 0x27e   : > { %6019 = vmatpush3.bf16.msra.mxu0 %v6650_v43 }
 0x27f   : > { %6020 = vmatprep.subr.bf16.mxu0 %v6651_v45 }
 0x280   : > { %4849 = vmatpush1.bf16.msra.mxu1 %v6637_v49  ;;  %v6653_v49 = vld [vmem:[%s8326_s5 + $0x50] sm:$0xff]  }
 0x281   : > { %4850 = vmatprep.subr.bf16.mxu1 %v6642_v50  ;;  %v6654_v50 = vld [vmem:[%s8326_s5 + $0x10] sm:$0xff]  }
 0x284   : > { %4851 = vmatpush1.bf16.msra.mxu1 %v6640_v51 }
 0x287   : > { %v2677_v53 = vpop.f32.mrf.mxu1  ;;  %5963 = vmatmul.mubr.msk.bf16.vlgmr.msra.gmra.mxu1 %vm575_vm1, %v4771_v52  ;;  %v6655_v52 = vld [vmem:[%s8326_s5 + $0x48] sm:$0xff]  }
 0x289   : > { %v2679_v54 = vpop.f32.mrf.mxu1  ;;  %v3089_v55 = vpop.f32.mrf.mxu0 }
 0x28a   : > { %v2686_v57 = vcombine.low %v2677_v53, %v2679_v54  ;;  %v6656_v53 = vld [vmem:[%s8326_s5 + $0x8] sm:$0xff]   ;;  %v6657_v54 = vld [vmem:[%s8326_s5 + $0x40] sm:$0xff]  }
 0x28b   : > { %v2681_v61 = vpop.f32.mrf.mxu1  ;;  %v3091_v59 = vpop.f32.mrf.mxu0 }
 0x28c   : > { %v2693_v62 = vrot.slane %v2686_v57, %v7642_v56  ;;  %v3098_v63 = vcombine.low %v3089_v55, %v3091_v59  ;;  %v6658_v61 = vld [vmem:[%s8326_s5] sm:$0xff]  }
 0x28d   : > { %v2682_v0 = vpop.f32.mrf.mxu1  ;;  %v3093_v2 = vpop.f32.mrf.mxu0 }
 0x28e   : > { %v2700_v3 = vrot.slane %v2693_v62, %v7642_v56  ;;  %v3105_v8 = vrot.slane %v3098_v63, %v7642_v56 }
 0x28f   : > { %v3094_v60 = vpop.f32.mrf.mxu0 }
 0x290   : > { %v2702_v4 = vadd.f32 %v2700_v3, %v2565_v47  ;;  %v3112_v38 = vrot.slane %v3105_v8, %v7642_v56  ;;  %v6652_v47 = vld [vmem:[%s8326_s5 + $0x18] sm:$0xff]  }
 0x291   : > { %6021 = vmatpush3.bf16.msra.mxu0 %v6652_v47 }
 0x292   : > { %v2838_v5 = vadd.f32 %v2836_v46, %v2702_v4  ;;  %6022 = vmatprep.subr.bf16.mxu0 %v6653_v49 }
 0x295   : > { %6023 = vmatpush3.bf16.msra.mxu0 %v6654_v50 }
 0x296   : > { %6024 = vmatprep.subr.bf16.mxu0 %v6655_v52 }
 0x299   : > { %6025 = vmatpush3.bf16.msra.mxu0 %v6656_v53 }
 0x29a   : > { %6026 = vmatprep.subr.bf16.mxu0 %v6657_v54 }
 0x29d   : > { %6027 = vmatpush3.bf16.msra.mxu0 %v6658_v61 }
 0x29f   : > { %v2951_v6 = vpop.f32.mrf.mxu1 }
 0x2a1   : > { %v2953_v9 = vpop.f32.mrf.mxu1  ;;  %v3363_v10 = vpop.f32.mrf.mxu0 }
 0x2a2   : > { %v2960_v11 = vcombine.low %v2951_v6, %v2953_v9 }
 0x2a3   : > { %v2955_v12 = vpop.f32.mrf.mxu1  ;;  %v3365_v7 = vpop.f32.mrf.mxu0 }
 0x2a4   : > { %v2967_v13 = vrot.slane %v2960_v11, %v7642_v56  ;;  %v3372_v14 = vcombine.low %v3363_v10, %v3365_v7 }
 0x2a5   : > { %v2956_v15 = vpop.f32.mrf.mxu1  ;;  %v3367_v16 = vpop.f32.mrf.mxu0 }
 0x2a6   : > { %v2974_v17 = vrot.slane %v2967_v13, %v7642_v56  ;;  %v3379_v32 = vrot.slane %v3372_v14, %v7642_v56 }
 0x2a7   : > { %v3368_v18 = vpop.f32.mrf.mxu0 }
 0x2a8   : > { %v2976_v19 = vadd.f32 %v2974_v17, %v2838_v5  ;;  %v3386_v41 = vrot.slane %v3379_v32, %v7642_v56 }
 0x2aa   : > { %v3114_v20 = vadd.f32 %v3112_v38, %v2976_v19 }
 0x2b7   : > { %v3226_v22 = vpop.f32.mrf.mxu1 }
 0x2b9   : > { %v3228_v25 = vpop.f32.mrf.mxu1  ;;  %v3637_v26 = vpop.f32.mrf.mxu0 }
 0x2ba   : > { %v3235_v27 = vcombine.low %v3226_v22, %v3228_v25 }
 0x2bb   : > { %v3230_v30 = vpop.f32.mrf.mxu1  ;;  %v3639_v29 = vpop.f32.mrf.mxu0 }
 0x2bc   : > { %v3242_v33 = vrot.slane %v3235_v27, %v7642_v56  ;;  %v3646_v34 = vcombine.low %v3637_v26, %v3639_v29 }
 0x2bd   : > { %v3231_v35 = vpop.f32.mrf.mxu1  ;;  %v3641_v1 = vpop.f32.mrf.mxu0 }
 0x2be   : > { %v3249_v36 = vrot.slane %v3242_v33, %v7642_v56  ;;  %v3653_v63 = vrot.slane %v3646_v34, %v7642_v56 }
 0x2bf   : > { %v3642_v39 = vpop.f32.mrf.mxu0 }
 0x2c0   : > { %v3251_v42 = vadd.f32 %v3249_v36, %v3114_v20  ;;  %v3660_v5 = vrot.slane %v3653_v63, %v7642_v56 }
 0x2c2   : > { %v3388_v44 = vadd.f32 %v3386_v41, %v3251_v42 }
 0x2cf   : > { %v3500_v51 = vpop.f32.mrf.mxu1 }
 0x2d1   : > { %v3502_v55 = vpop.f32.mrf.mxu1  ;;  %v3911_v57 = vpop.f32.mrf.mxu0 }
 0x2d2   : > { %v3509_v58 = vcombine.low %v3500_v51, %v3502_v55 }
 0x2d3   : > { %v3504_v59 = vpop.f32.mrf.mxu1  ;;  %v3913_v62 = vpop.f32.mrf.mxu0 }
 0x2d4   : > { %v3516_v0 = vrot.slane %v3509_v58, %v7642_v56  ;;  %v3920_v2 = vcombine.low %v3911_v57, %v3913_v62 }
 0x2d5   : > { %v3505_v3 = vpop.f32.mrf.mxu1  ;;  %v3915_v46 = vpop.f32.mrf.mxu0 }
 0x2d6   : > { %v3523_v60 = vrot.slane %v3516_v0, %v7642_v56  ;;  %v3927_v14 = vrot.slane %v3920_v2, %v7642_v56 }
 0x2d7   : > { %v3916_v4 = vpop.f32.mrf.mxu0 }
 0x2d8   : > { %v3525_v6 = vadd.f32 %v3523_v60, %v3388_v44  ;;  %v3934_v20 = vrot.slane %v3927_v14, %v7642_v56  ;;  %v4900_v14 = vsub.s32 0, %v7624_v48 }
 0x2da   : > { %v3662_v9 = vadd.f32 %v3660_v5, %v3525_v6 }
 0x2e7   : > { %v3774_v10 = vpop.f32.mrf.mxu1 }
 0x2e9   : > { %v3776_v11 = vpop.f32.mrf.mxu1  ;;  %v4185_v12 = vpop.f32.mrf.mxu0 }
 0x2ea   : > { %v3783_v7 = vcombine.low %v3774_v10, %v3776_v11 }
 0x2eb   : > { %v3778_v8 = vpop.f32.mrf.mxu1  ;;  %v4187_v13 = vpop.f32.mrf.mxu0 }
 0x2ec   : > { %v3790_v15 = vrot.slane %v3783_v7, %v7642_v56  ;;  %v4194_v16 = vcombine.low %v4185_v12, %v4187_v13  ;;  %v4904_v13 = vsub.s32 1, %v7624_v48 }
 0x2ed   : > { %v3779_v17 = vpop.f32.mrf.mxu1  ;;  %v4189_v18 = vpop.f32.mrf.mxu0 }
 0x2ee   : > { %v3797_v38 = vrot.slane %v3790_v15, %v7642_v56  ;;  %v4201_v30 = vrot.slane %v4194_v16, %v7642_v56 }
 0x2ef   : > { %v4190_v19 = vpop.f32.mrf.mxu0 }
 0x2f0   : > { %v3799_v22 = vadd.f32 %v3797_v38, %v3662_v9  ;;  %v4208_v1 = vrot.slane %v4201_v30, %v7642_v56 }
 0x2f2   : > { %v3936_v23 = vadd.f32 %v3934_v20, %v3799_v22  ;;  %v4942_v20 = vld [vmem:[%s8327_s6] sm:$0x1] }
 0x2ff   : > { %v4048_v21 = vpop.f32.mrf.mxu1 }
 0x301   : > { %v4050_v24 = vpop.f32.mrf.mxu1  ;;  %v4459_v25 = vpop.f32.mrf.mxu0 }
 0x302   : > { %v4057_v26 = vcombine.low %v4048_v21, %v4050_v24 }
 0x303   : > { %v4052_v27 = vpop.f32.mrf.mxu1  ;;  %v4461_v28 = vpop.f32.mrf.mxu0 }
 0x304   : > { %v4064_v29 = vrot.slane %v4057_v26, %v7642_v56  ;;  %v4468_v31 = vcombine.low %v4459_v25, %v4461_v28 }
 0x305   : > { %v4053_v32 = vpop.f32.mrf.mxu1  ;;  %v4463_v33 = vpop.f32.mrf.mxu0 }
 0x306   : > { %v4071_v34 = vrot.slane %v4064_v29, %v7642_v56  ;;  %v4475_v45 = vrot.slane %v4468_v31, %v7642_v56 }
 0x307   : > { %v4464_v35 = vpop.f32.mrf.mxu0 }
 0x308   : > { %v4073_v36 = vadd.f32 %v4071_v34, %v3936_v23  ;;  %v4482_v53 = vrot.slane %v4475_v45, %v7642_v56 }
 0x30a   : > { %v4210_v37 = vadd.f32 %v4208_v1, %v4073_v36 }
 0x317   : > { %v4322_v39 = vpop.f32.mrf.mxu1 }
 0x319   : > { %v4324_v40 = vpop.f32.mrf.mxu1  ;;  %v4733_v41 = vpop.f32.mrf.mxu0 }
 0x31a   : > { %v4331_v42 = vcombine.low %v4322_v39, %v4324_v40 }
 0x31b   : > { %v4326_v44 = vpop.f32.mrf.mxu1  ;;  %v4735_v43 = vpop.f32.mrf.mxu0 }
 0x31c   : > { %v4338_v47 = vrot.slane %v4331_v42, %v7642_v56  ;;  %v4742_v0 = vcombine.low %v4733_v41, %v4735_v43 }
 0x31d   : > { %v4327_v49 = vpop.f32.mrf.mxu1  ;;  %v4737_v50 = vpop.f32.mrf.mxu0 }
 0x31e   : > { %v4345_v51 = vrot.slane %v4338_v47, %v7642_v56  ;;  %v4749_v46 = vrot.slane %v4742_v0, %v7642_v56 }
 0x31f   : > { %v4738_v52 = vpop.f32.mrf.mxu0 }
 0x320   : > { %v4347_v54 = vadd.f32 %v4345_v51, %v4210_v37  ;;  %v4756_v9 = vrot.slane %v4749_v46, %v7642_v56 }
 0x322   : > { %v4484_v55 = vadd.f32 %v4482_v53, %v4347_v54 }
 0x32f   : > { %v4596_v57 = vpop.f32.mrf.mxu1 }
 0x331   : > { %v4598_v58 = vpop.f32.mrf.mxu1 }
 0x332   : > { %v4605_v62 = vcombine.low %v4596_v57, %v4598_v58 }
 0x333   : > { %v4600_v61 = vpop.f32.mrf.mxu1 }
 0x334   : > { %v4612_v63 = vrot.slane %v4605_v62, %v7642_v56 }
 0x335   : > { %v4601_v59 = vpop.f32.mrf.mxu1 }
 0x336   : > { %v4619_v2 = vrot.slane %v4612_v63, %v7642_v56 }
 0x338   : > { %v4621_v4 = vadd.f32 %v4619_v2, %v4484_v55 }
 0x33a   : > { %v4758_v12 = vadd.f32 %v4756_v9, %v4621_v4 }
 0x347   : > { %v4870_v3 = vpop.f32.mrf.mxu1 }
 0x349   : > { %v4872_v60 = vpop.f32.mrf.mxu1 }
 0x34a   : > { %v4879_v5 = vcombine.low %v4870_v3, %v4872_v60 }
 0x34b   : > { %v4874_v6 = vpop.f32.mrf.mxu1 }
 0x34c   : > { %v4886_v10 = vrot.slane %v4879_v5, %v7642_v56 }
 0x34d   : > { %v4875_v11 = vpop.f32.mrf.mxu1 }
 0x34e   : > { %v4893_v7 = vrot.slane %v4886_v10, %v7642_v56 }
 0x350   : > { %v4895_v8 = vadd.f32 %v4893_v7, %v4758_v12 }
 0x352   : > { %v4896_v15 = vmax.f32 %v4895_v8, 0.0 }
 0x354   : > { %v4905_v16 = vrot.slane %v4896_v15, %v4904_v13  ;;  %v4901_v17 = vrot.slane %v4896_v15, %v4900_v14 }
 0x356   : > { %v4909_v18 = vpack.c.bf16 %v4905_v16, %v4905_v16  ;;  %v4908_v38 = vpack.c.bf16 %v4901_v17, %v4901_v17 }
 0x358   : > { %5071 = vmatprep.mubr.bf16.mxu0 %v4909_v18 }
 0x359   : > { %5072 = vmatmul.mubr.bf16.vlgmr.msra.gmra.mxu0 %v4908_v38 }
 0x419   : > { %v6028_v19 = vpop.f32.mrf.mxu0 }
 0x41b   : > { %v6029_v56 = vpop.f32.mrf.mxu0 }
 0x41c   : > { %v6030_v22 = vadd.f32 %v6029_v56, %v6028_v19 }
 0x41d   : > { %v6031_v48 = vpop.f32.mrf.mxu0 }
 0x41e   : > { %v5074_v23 = vadd.f32 %v6030_v22, %v4942_v20 }
 0x41f   : > { %v6032_v21 = vpop.f32.mrf.mxu0 }
 0x420   : > { %5080 = vst.msk [vmem:[%s270_s20] sm:$0x1] %vm5079_vm2, %v5074_v23 }
 0x421   : > { %6672 = shalt.err (!%p6669_p3)
}
 0x422   : > { %s6673_s15 = scalar_lea.hbm %s8286_s29, 16  ;;  %s6677_s18 = scalar_lea.hbm %s8328_s7, 32 }
 0x423   : > { %p6674_p4 = scmp.ne.s32.totalorder %s8286_s29, %s6673_s15  ;;  %p6678_p9 = scmp.lt.s32.totalorder %s8286_s29, %s8328_s7 }
 0x424   : > { %p6679_p10 = scmp.lt.s32.totalorder %s6677_s18, %s6673_s15 }
 0x425   : > { %p6675_p7 = pnand %p6674_p4, %p6802_p5 }
 0x426   : > { %p6680_p11 = por %p6679_p10, %p6678_p9 }
 0x427   : > { %p6676_p8 = pneg %p6675_p7 }
 0x429   : > { %p6681_p12 = pnand %p6680_p11, %p6676_p8 }
 0x42b   : > { %6684 = shalt.err (!%p6681_p12)
}
 0x42c   : > { %6034 = dma.vmem_to_hbm [thread:$0]  (%p6802_p5), %s5095_s21, 16, %s8286_s29, %s5082_s8  }
 0x42d PF: > { %p6040_p13 = scmp.ge.s32.totalorder %s6719_s27, 2  ;;  %s5106_s22 = sand.u32 1, %s6707_s24  }
 0x42e   : > { %s5107_s23 = scalar_lea.sflag [#allocation3], %s5106_s22 }
 0x42f   : > { %p6037_p0 = pnand %p6040_p13, %p6806_p6 }
 0x431   : > { %p6038_p1 = pneg %p6037_p0 }
 0x433   : > { %6702 = dma.done.wait (%p6038_p1), %s5107_s23, 16  }
 0x434   : > { %6704 = vsyncadd (%p6038_p1), %s5107_s23, 4294967280  ;;  %p17_p2 = scmp.ge.s32.totalorder %s6789_s30, 4   ;;  %s8331_s24 = smov %s6711_s25 }
 0x435   : > { %s8332_s25 = smov %s6715_s26  ;;  %s8333_s26 = smov %s6800_s10 }
 0x436   : > { %s8334_s27 = smov %s6789_s30  ;;  %19 = sbr.rel (!%p17_p2) target bundleno = 3 (0x3), region = 114 }
 0x43b   :  { %5111 = vsyncpa [#allocation3], 1 }
 0x43c   :  { %5113 = vsyncpa [#allocation3 + $0x1], 1 }

</bundles_post_ra>
